<compile_context>
chip_gen: v5e
topology: v5e:2x2
jax: 0.10.0
libtpu: 0.0.40
codegen_flags: <defaults>
</compile_context>

<pallas_src>
import functools

import jax
import jax.numpy as jnp
from jax import lax
from jax.experimental import pallas as pl
from jax.experimental.pallas import tpu as pltpu

EPS = 1e-5


# ----------------------------- fused Pallas kernel -------------------------- #

def _resblock_kernel(x_ref, w1_ref, w2_ref, wd_ref, bn_ref, o_ref,
                     z_sc, stat_sc, *,
                     stride, ho, wo, h_s, cin_p, cout_p, n_batch, has_ds):
    s = stride
    phase = pl.program_id(0)
    b = pl.program_id(1)
    m_rows = ho * wo
    inv_m = 1.0 / float(n_batch * ho * wo)

    def tap_x(kh, kw, flat=True):
        # xpad[s*i + kh, s*j + kw, :] for all output pixels (i, j), read from the
        # stride-phase-decomposed x tile (all indices static).  bf16.
        p_idx = (kh % s) * s + (kw % s)
        start = p_idx * h_s + kh // s
        wi = kw // s
        v = x_ref[0, start:start + ho, wi:wi + wo, :]          # (ho, wo, cin_p)
        return v.reshape(m_rows, cin_p) if flat else v

    def accum_stats(z, row):                                   # z: f32 (m_rows, cout_p)
        stat_sc[row:row + 1, :] = stat_sc[row:row + 1, :] + \
            jnp.sum(z, axis=0, keepdims=True)
        stat_sc[row + 1:row + 2, :] = stat_sc[row + 1:row + 2, :] + \
            jnp.sum(z * z, axis=0, keepdims=True)

    def fold_affine(row, g_row):
        # Replace accumulated (sum, sumsq) rows with folded BN (scale, shift):
        #   z*scale + shift == (z - mean) * rsqrt(var + eps) * gamma + beta
        mean = stat_sc[row:row + 1, :] * inv_m
        var = jnp.maximum(stat_sc[row + 1:row + 2, :] * inv_m - mean * mean, 0.0)
        scale = bn_ref[g_row:g_row + 1, :] * lax.rsqrt(var + EPS)
        shift = bn_ref[g_row + 1:g_row + 2, :] - mean * scale
        stat_sc[row:row + 1, :] = scale
        stat_sc[row + 1:row + 2, :] = shift

    # ---------------- phase 0: conv1 (+ shortcut BN stats) ------------------ #
    @pl.when((phase == 0) & (b == 0))
    def _init():
        stat_sc[...] = jnp.zeros_like(stat_sc)
        # One-time zero so the conv2 halo reads zeros; interiors get overwritten.
        z_sc[...] = jnp.zeros_like(z_sc)

    @pl.when(phase == 0)
    def _phase0():
        # conv1: 3x3, stride s, pad 1 — ONE K = 9*cin_p matmul (bf16 in, f32 acc).
        a1 = jnp.concatenate(
            [tap_x(kh, kw) for kh in range(3) for kw in range(3)], axis=-1)
        z1 = jnp.dot(a1, w1_ref[...], preferred_element_type=jnp.float32)
        accum_stats(z1, 0)
        z_sc[b, 1:ho + 1, 1:wo + 1, :] = \
            z1.reshape(ho, wo, cout_p).astype(z_sc.dtype)
        if has_ds:
            # 1x1 stride-s shortcut conv: only its BN statistics are needed now;
            # the cheap matmul is recomputed in phase 2 instead of being stored.
            sp = jnp.dot(tap_x(1, 1), wd_ref[...],
                         preferred_element_type=jnp.float32)
            accum_stats(sp, 2)

    # ---------------- phase 1: BN1 + ReLU (in place) + conv2 ---------------- #
    @pl.when((phase == 1) & (b == 0))
    def _fold1():
        fold_affine(0, 0)                        # rows 0/1 -> BN1 scale/shift

    @pl.when(phase == 1)
    def _phase1():
        scale1 = stat_sc[0:1, :].reshape(1, 1, cout_p)
        shift1 = stat_sc[1:2, :].reshape(1, 1, cout_p)
        z1 = z_sc[b, 1:ho + 1, 1:wo + 1, :].astype(jnp.float32)
        y1 = jnp.maximum(z1 * scale1 + shift1, 0.0)
        z_sc[b, 1:ho + 1, 1:wo + 1, :] = y1.astype(z_sc.dtype)  # in place; halo stays 0
        # conv2: 3x3, stride 1, pad 1 — ONE K = 9*cout_p matmul from the halo'd
        # scratch (taps read straight from VMEM, no pad buffer, no copy).
        a2 = jnp.concatenate(
            [z_sc[b, kh:kh + ho, kw:kw + wo, :].reshape(m_rows, cout_p)
             for kh in range(3) for kw in range(3)], axis=-1)
        z2 = jnp.dot(a2, w2_ref[...], preferred_element_type=jnp.float32)
        accum_stats(z2, 4)
        z_sc[b, 1:ho + 1, 1:wo + 1, :] = \
            z2.reshape(ho, wo, cout_p).astype(z_sc.dtype)       # reuse: y1 -> z2

    # ------------- phase 2: BN2 (+BNd) + residual + ReLU + store ------------ #
    @pl.when((phase == 2) & (b == 0))
    def _fold2():
        fold_affine(4, 2)                        # rows 4/5 -> BN2 scale/shift
        if has_ds:
            fold_affine(2, 4)                    # rows 2/3 -> BNd scale/shift

    @pl.when(phase == 2)
    def _phase2():
        scale2 = stat_sc[4:5, :].reshape(1, 1, cout_p)
        shift2 = stat_sc[5:6, :].reshape(1, 1, cout_p)
        left = z_sc[b, 1:ho + 1, 1:wo + 1, :].astype(jnp.float32) * scale2 + shift2
        if has_ds:
            sp = jnp.dot(tap_x(1, 1), wd_ref[...],
                         preferred_element_type=jnp.float32)
            short = (sp * stat_sc[2:3, :] + stat_sc[3:4, :]).reshape(ho, wo, cout_p)
        else:
            # Identity shortcut: center tap of x (bf16-rounded), lane-embedded.
            t = tap_x(1, 1, flat=False).astype(jnp.float32)
            if cout_p > cin_p:
                t = jnp.concatenate(
                    [t, jnp.zeros((ho, wo, cout_p - cin_p), jnp.float32)], axis=-1)
            short = t
        o_ref[0] = jnp.maximum(left + short, 0.0)


# ------------------------------ JAX-side wrapper ---------------------------- #

def _round_up(v, m):
    return (v + m - 1) // m * m


def _vmem_limit_bytes():
    # Use most of physical VMEM (128 MiB on v5e/v6e, 64 MiB on v7x); conservative
    # fallback if the query is unavailable.
    try:
        cap = pltpu.get_tpu_info().vmem_capacity_bytes
    except Exception:
        cap = 64 * 1024 * 1024
    return min(int(cap * 0.8), 112 * 1024 * 1024)


def residual_block_forward(x_nchw, params, stride):
    """Pallas implementation of ResidualBlock.forward.  x is NCHW; returns NCHW."""
    x = jnp.transpose(x_nchw, (0, 2, 3, 1)).astype(jnp.bfloat16)   # NHWC bf16
    n, h, w, cin = x.shape
    cout = params["w1"].shape[0]
    has_ds = (stride != 1) or (cin != cout)
    s = stride

    cin_p = _round_up(cin, 8)          # K padding per tap
    cout_p = _round_up(cout, 128)      # lane-dense output channels
    ho = (h - 1) // s + 1
    wo = (w - 1) // s + 1

    # 1-pixel halo, channel pad, round spatial dims to a stride multiple and
    # space-to-phase decompose so every conv tap is a contiguous in-kernel slice.
    hp2 = _round_up(h + 2, s)
    wp2 = _round_up(w + 2, s)
    h_s, w_s = hp2 // s, wp2 // s
    xpad = jnp.pad(x, ((0, 0), (1, hp2 - h - 1), (1, wp2 - w - 1), (0, cin_p - cin)))
    xph = xpad.reshape(n, h_s, s, w_s, s, cin_p)
    xph = jnp.transpose(xph, (0, 2, 4, 1, 3, 5)).reshape(n, s * s * h_s, w_s, cin_p)

    def prep3x3(wt, c_in, c_in_pad):
        # (cout, c_in, 3, 3) -> (9*c_in_pad, cout_p) bf16; K = (kh*3 + kw)*c_in_pad + c
        wm = jnp.transpose(wt, (2, 3, 1, 0)).astype(jnp.float32)   # (3,3,c_in,cout)
        wm = jnp.pad(wm, ((0, 0), (0, 0), (0, c_in_pad - c_in), (0, cout_p - cout)))
        return wm.reshape(9 * c_in_pad, cout_p).astype(jnp.bfloat16)

    w1p = prep3x3(params["w1"], cin, cin_p)
    w2p = prep3x3(params["w2"], cout, cout_p)
    if has_ds:
        wd = jnp.transpose(params["wd"][:, :, 0, 0])               # (cin, cout)
        wdp = jnp.pad(wd, ((0, cin_p - cin), (0, cout_p - cout))).astype(jnp.bfloat16)
    else:
        wdp = jnp.zeros((cin_p, cout_p), jnp.bfloat16)             # unused dummy

    def padc(v):
        return jnp.pad(v.astype(jnp.float32), (0, cout_p - cout))

    zeros_c = jnp.zeros((cout_p,), jnp.float32)
    bnp = jnp.stack([padc(params["g1"]), padc(params["b1"]),
                     padc(params["g2"]), padc(params["b2"]),
                     padc(params["gd"]) if has_ds else zeros_c,
                     padc(params["bd"]) if has_ds else zeros_c], axis=0)

    kernel = functools.partial(
        _resblock_kernel, stride=s, ho=ho, wo=wo, h_s=h_s,
        cin_p=cin_p, cout_p=cout_p, n_batch=n, has_ds=has_ds)

    out_pad = pl.pallas_call(
        kernel,
        out_shape=jax.ShapeDtypeStruct((n, ho, wo, cout_p), jnp.float32),
        grid=(3, n),                                   # (phase, image) — phase-major
        in_specs=[
            # x is only read in phases 0 and 2 — collapse its block index in phase 1.
            pl.BlockSpec((1, s * s * h_s, w_s, cin_p),
                         lambda p, b: (jnp.where(p == 1, 0, b), 0, 0, 0)),
            pl.BlockSpec(w1p.shape, lambda p, b: (0, 0)),
            pl.BlockSpec(w2p.shape, lambda p, b: (0, 0)),
            pl.BlockSpec(wdp.shape, lambda p, b: (0, 0)),
            pl.BlockSpec(bnp.shape, lambda p, b: (0, 0)),
        ],
        # Output only written in phase 2 — collapse its block index elsewhere so
        # each output tile hits HBM exactly once.
        out_specs=pl.BlockSpec((1, ho, wo, cout_p),
                               lambda p, b: (jnp.where(p == 2, b, 0), 0, 0, 0)),
        scratch_shapes=[
            pltpu.VMEM((n, ho + 2, wo + 2, cout_p), jnp.bfloat16),  # halo'd z1->y1->z2
            pltpu.VMEM((8, cout_p), jnp.float32),                   # BN sum/ssq -> scale/shift
        ],
        compiler_params=pltpu.CompilerParams(
            dimension_semantics=("arbitrary", "arbitrary"),
            vmem_limit_bytes=_vmem_limit_bytes()),
    )(xph, w1p, w2p, wdp, bnp)

    out = out_pad[:, :, :, :cout]
    return jnp.transpose(out, (0, 3, 1, 2))            # back to NCHW


# ------------------------- pure-JAX reference (check) ----------------------- #

def reference_forward(x_nchw, params, stride):
    def conv(x, wgt, s, pad):
        return lax.conv_general_dilated(
            x, wgt, (s, s), ((pad, pad), (pad, pad)),
            dimension_numbers=("NCHW", "OIHW", "NCHW"),
            precision=lax.Precision.HIGHEST)

    def bn(x, g, b):
        mean = jnp.mean(x, axis=(0, 2, 3), keepdims=True)
        var = jnp.mean((x - mean) ** 2, axis=(0, 2, 3), keepdims=True)
        return (x - mean) * lax.rsqrt(var + EPS) * g.reshape(1, -1, 1, 1) \
            + b.reshape(1, -1, 1, 1)

    cout, cin = params["w1"].shape[0], params["w1"].shape[1]
    left = jnp.maximum(bn(conv(x_nchw, params["w1"], stride, 1),
                          params["g1"], params["b1"]), 0.0)
    left = bn(conv(left, params["w2"], 1, 1), params["g2"], params["b2"])
    if stride != 1 or cin != cout:
        short = bn(conv(x_nchw, params["wd"], stride, 0), params["gd"], params["bd"])
    else:
        short = x_nchw
    return jnp.maximum(left + short, 0.0)


# ------------------------------ deterministic init -------------------------- #

def init_params(key, cin, cout, stride):
    ks = jax.random.split(key, 10)
    p = {
        "w1": 0.1 * jax.random.normal(ks[0], (cout, cin, 3, 3), jnp.float32),
        "g1": 1.0 + 0.1 * jax.random.normal(ks[1], (cout,), jnp.float32),
        "b1": 0.1 * jax.random.normal(ks[2], (cout,), jnp.float32),
        "w2": 0.1 * jax.random.normal(ks[3], (cout, cout, 3, 3), jnp.float32),
        "g2": 1.0 + 0.1 * jax.random.normal(ks[4], (cout,), jnp.float32),
        "b2": 0.1 * jax.random.normal(ks[5], (cout,), jnp.float32),
    }
    if stride != 1 or cin != cout:
        p["wd"] = 0.1 * jax.random.normal(ks[6], (cout, cin, 1, 1), jnp.float32)
        p["gd"] = 1.0 + 0.1 * jax.random.normal(ks[7], (cout,), jnp.float32)
        p["bd"] = 0.1 * jax.random.normal(ks[8], (cout,), jnp.float32)
    return p


if __name__ == "__main__":
    key = jax.random.PRNGKey(0)
    kx, kp1, kp2 = jax.random.split(key, 3)

    # Tolerance accounts for bf16 MXU operands / bf16 x and z storage (f32 acc).
    ATOL = RTOL = 3e-2

    # Case 1: downsample path (stride=2, inchannels=4 -> outchannels=8).
    x = jax.random.normal(kx, (2, 4, 16, 16), jnp.float32)
    params_ds = init_params(kp1, 4, 8, stride=2)
    out_ds = jax.block_until_ready(residual_block_forward(x, params_ds, stride=2))
    ref_ds = reference_forward(x, params_ds, stride=2)
    assert out_ds.shape == (2, 8, 8, 8)
    assert jnp.allclose(out_ds, ref_ds, atol=ATOL, rtol=RTOL), \
        float(jnp.max(jnp.abs(out_ds - ref_ds)))

    # Case 2: identity shortcut (stride=1, inchannels == outchannels == 4).
    params_id = init_params(kp2, 4, 4, stride=1)
    out_id = jax.block_until_ready(residual_block_forward(x, params_id, stride=1))
    ref_id = reference_forward(x, params_id, stride=1)
    assert out_id.shape == (2, 4, 16, 16)
    assert jnp.allclose(out_id, ref_id, atol=ATOL, rtol=RTOL), \
        float(jnp.max(jnp.abs(out_id - ref_id)))

    print("KERNEL_OK")
</pallas_src>

<mosaic_0001>
module attributes {stable_mosaic.version = 11 : i64} {
  func.func @_resblock_kernel(%arg0: i32, %arg1: i32, %arg2: memref<1x36x9x8xbf16, #tpu.memory_space<vmem>>, %arg3: memref<72x128xbf16, #tpu.memory_space<vmem>>, %arg4: memref<1152x128xbf16, #tpu.memory_space<vmem>>, %arg5: memref<8x128xbf16, #tpu.memory_space<vmem>>, %arg6: memref<6x128xf32, #tpu.memory_space<vmem>>, %arg7: memref<1x8x8x128xf32, #tpu.memory_space<vmem>>, %arg8: memref<2x10x10x128xbf16, #tpu.memory_space<vmem>>, %arg9: memref<8x128xf32, #tpu.memory_space<vmem>>) attributes {dimension_semantics = [#tpu.dimension_semantics<arbitrary>, #tpu.dimension_semantics<arbitrary>], iteration_bounds = array<i64: 3, 2>, scalar_prefetch = 0 : i64, scratch_operands = 2 : i64, tpu.core_type = #tpu.core_type<tc>, window_params = [{transform_indices = @transform_0, window_bounds = array<i64: 1, 36, 9, 8>}, {pipeline_mode = #tpu.pipeline_mode<synchronous>, transform_indices = @transform_1, window_bounds = array<i64: 72, 128>}, {pipeline_mode = #tpu.pipeline_mode<synchronous>, transform_indices = @transform_2, window_bounds = array<i64: 1152, 128>}, {pipeline_mode = #tpu.pipeline_mode<synchronous>, transform_indices = @transform_3, window_bounds = array<i64: 8, 128>}, {pipeline_mode = #tpu.pipeline_mode<synchronous>, transform_indices = @transform_4, window_bounds = array<i64: 6, 128>}, {transform_indices = @transform_5, window_bounds = array<i64: 1, 8, 8, 128>}]} {
    %c0_i32 = arith.constant 0 : i32
    %0 = arith.cmpi eq, %arg0, %c0_i32 : i32
    %c0_i32_0 = arith.constant 0 : i32
    %1 = arith.cmpi eq, %arg1, %c0_i32_0 : i32
    %2 = arith.andi %0, %1 : i1
    %3 = arith.extui %2 : i1 to i32
    %c0_i32_1 = arith.constant 0 : i32
    %4 = arith.cmpi ne, %3, %c0_i32_1 : i32
    scf.if %4 {
      %cst = arith.constant 0.000000e+00 : f32
      %24 = vector.broadcast %cst : f32 to vector<8x128xf32>
      %c0 = arith.constant 0 : index
      %c0_12 = arith.constant 0 : index
      %25 = vector.load %arg9[%c0, %c0_12] : memref<8x128xf32, #tpu.memory_space<vmem>>, vector<8x128xf32>
      tpu.vector_store %arg9[%c0, %c0_12], %24 {strides = array<i32>} : memref<8x128xf32, #tpu.memory_space<vmem>>, vector<8x128xf32>,
      %cst_13 = arith.constant 0.000000e+00 : bf16
      %26 = vector.broadcast %cst_13 : bf16 to vector<2x10x10x128xbf16>
      %c0_14 = arith.constant 0 : index
      %c0_15 = arith.constant 0 : index
      %c0_16 = arith.constant 0 : index
      %c0_17 = arith.constant 0 : index
      %27 = vector.load %arg8[%c0_14, %c0_15, %c0_16, %c0_17] : memref<2x10x10x128xbf16, #tpu.memory_space<vmem>>, vector<2x10x10x128xbf16>
      tpu.vector_store %arg8[%c0_14, %c0_15, %c0_16, %c0_17], %26 {strides = array<i32>} : memref<2x10x10x128xbf16, #tpu.memory_space<vmem>>, vector<2x10x10x128xbf16>,
    } else {
    }
    %c0_i32_2 = arith.constant 0 : i32
    %5 = arith.cmpi eq, %arg0, %c0_i32_2 : i32
    %6 = arith.extui %5 : i1 to i32
    %c0_i32_3 = arith.constant 0 : i32
    %7 = arith.cmpi ne, %6, %c0_i32_3 : i32
    scf.if %7 {
      %c0 = arith.constant 0 : index
      %c0_12 = arith.constant 0 : index
      %c0_13 = arith.constant 0 : index
      %c0_14 = arith.constant 0 : index
      %24 = vector.load %arg2[%c0, %c0_12, %c0_13, %c0_14] : memref<1x36x9x8xbf16, #tpu.memory_space<vmem>>, vector<1x8x8x8xbf16>
      %25 = vector.shape_cast %24 : vector<1x8x8x8xbf16> to vector<8x8x8xbf16>
      %26 = vector.shape_cast %25 : vector<8x8x8xbf16> to vector<64x8xbf16>
      %c0_15 = arith.constant 0 : index
      %c9 = arith.constant 9 : index
      %c0_16 = arith.constant 0 : index
      %c0_17 = arith.constant 0 : index
      %27 = vector.load %arg2[%c0_15, %c9, %c0_16, %c0_17] : memref<1x36x9x8xbf16, #tpu.memory_space<vmem>>, vector<1x8x8x8xbf16>
      %28 = vector.shape_cast %27 : vector<1x8x8x8xbf16> to vector<8x8x8xbf16>
      %29 = vector.shape_cast %28 : vector<8x8x8xbf16> to vector<64x8xbf16>
      %c0_18 = arith.constant 0 : index
      %c0_19 = arith.constant 0 : index
      %c1 = arith.constant 1 : index
      %c0_20 = arith.constant 0 : index
      %30 = vector.load %arg2[%c0_18, %c0_19, %c1, %c0_20] : memref<1x36x9x8xbf16, #tpu.memory_space<vmem>>, vector<1x8x8x8xbf16>
      %31 = vector.shape_cast %30 : vector<1x8x8x8xbf16> to vector<8x8x8xbf16>
      %32 = vector.shape_cast %31 : vector<8x8x8xbf16> to vector<64x8xbf16>
      %c0_21 = arith.constant 0 : index
      %c18 = arith.constant 18 : index
      %c0_22 = arith.constant 0 : index
      %c0_23 = arith.constant 0 : index
      %33 = vector.load %arg2[%c0_21, %c18, %c0_22, %c0_23] : memref<1x36x9x8xbf16, #tpu.memory_space<vmem>>, vector<1x8x8x8xbf16>
      %34 = vector.shape_cast %33 : vector<1x8x8x8xbf16> to vector<8x8x8xbf16>
      %35 = vector.shape_cast %34 : vector<8x8x8xbf16> to vector<64x8xbf16>
      %c0_24 = arith.constant 0 : index
      %c27 = arith.constant 27 : index
      %c0_25 = arith.constant 0 : index
      %c0_26 = arith.constant 0 : index
      %36 = vector.load %arg2[%c0_24, %c27, %c0_25, %c0_26] : memref<1x36x9x8xbf16, #tpu.memory_space<vmem>>, vector<1x8x8x8xbf16>
      %37 = vector.shape_cast %36 : vector<1x8x8x8xbf16> to vector<8x8x8xbf16>
      %38 = vector.shape_cast %37 : vector<8x8x8xbf16> to vector<64x8xbf16>
      %c0_27 = arith.constant 0 : index
      %c18_28 = arith.constant 18 : index
      %c1_29 = arith.constant 1 : index
      %c0_30 = arith.constant 0 : index
      %39 = vector.load %arg2[%c0_27, %c18_28, %c1_29, %c0_30] : memref<1x36x9x8xbf16, #tpu.memory_space<vmem>>, vector<1x8x8x8xbf16>
      %40 = vector.shape_cast %39 : vector<1x8x8x8xbf16> to vector<8x8x8xbf16>
      %41 = vector.shape_cast %40 : vector<8x8x8xbf16> to vector<64x8xbf16>
      %c0_31 = arith.constant 0 : index
      %c1_32 = arith.constant 1 : index
      %c0_33 = arith.constant 0 : index
      %c0_34 = arith.constant 0 : index
      %42 = vector.load %arg2[%c0_31, %c1_32, %c0_33, %c0_34] : memref<1x36x9x8xbf16, #tpu.memory_space<vmem>>, vector<1x8x8x8xbf16>
      %43 = vector.shape_cast %42 : vector<1x8x8x8xbf16> to vector<8x8x8xbf16>
      %44 = vector.shape_cast %43 : vector<8x8x8xbf16> to vector<64x8xbf16>
      %c0_35 = arith.constant 0 : index
      %c10 = arith.constant 10 : index
      %c0_36 = arith.constant 0 : index
      %c0_37 = arith.constant 0 : index
      %45 = vector.load %arg2[%c0_35, %c10, %c0_36, %c0_37] : memref<1x36x9x8xbf16, #tpu.memory_space<vmem>>, vector<1x8x8x8xbf16>
      %46 = vector.shape_cast %45 : vector<1x8x8x8xbf16> to vector<8x8x8xbf16>
      %47 = vector.shape_cast %46 : vector<8x8x8xbf16> to vector<64x8xbf16>
      %c0_38 = arith.constant 0 : index
      %c1_39 = arith.constant 1 : index
      %c1_40 = arith.constant 1 : index
      %c0_41 = arith.constant 0 : index
      %48 = vector.load %arg2[%c0_38, %c1_39, %c1_40, %c0_41] : memref<1x36x9x8xbf16, #tpu.memory_space<vmem>>, vector<1x8x8x8xbf16>
      %49 = vector.shape_cast %48 : vector<1x8x8x8xbf16> to vector<8x8x8xbf16>
      %50 = vector.shape_cast %49 : vector<8x8x8xbf16> to vector<64x8xbf16>
      %51 = tpu.concatenate %26, %29, %32, %35, %38, %41, %44, %47, %50 in 1 : vector<64x8xbf16>, vector<64x8xbf16>, vector<64x8xbf16>, vector<64x8xbf16>, vector<64x8xbf16>, vector<64x8xbf16>, vector<64x8xbf16>, vector<64x8xbf16>, vector<64x8xbf16> -> vector<64x72xbf16>
      %c0_42 = arith.constant 0 : index
      %c0_43 = arith.constant 0 : index
      %52 = vector.load %arg3[%c0_42, %c0_43] : memref<72x128xbf16, #tpu.memory_space<vmem>>, vector<72x128xbf16>
      %cst = arith.constant dense<0.000000e+00> : vector<64x128xf32>
      %53 = tpu.matmul %51, %52, %cst {dimension_numbers = #tpu.dot_dimension_numbers<[1], [0], [0], [1], [0, 0, 1, 1], [], []>} : vector<64x72xbf16>, vector<72x128xbf16>, vector<64x128xf32> -> vector<64x128xf32>
      %c0_44 = arith.constant 0 : index
      %c0_45 = arith.constant 0 : index
      %54 = vector.load %arg9[%c0_44, %c0_45] : memref<8x128xf32, #tpu.memory_space<vmem>>, vector<1x128xf32>
      %cst_46 = arith.constant dense<0.000000e+00> : vector<128xf32>
      %55 = vector.multi_reduction <add>, %53, %cst_46 [0] : vector<64x128xf32> to vector<128xf32>
      %56 = vector.shape_cast %55 : vector<128xf32> to vector<1x128xf32>
      %57 = arith.addf %54, %56 : vector<1x128xf32>
      %c0_47 = arith.constant 0 : index
      %c0_48 = arith.constant 0 : index
      %58 = vector.load %arg9[%c0_47, %c0_48] : memref<8x128xf32, #tpu.memory_space<vmem>>, vector<1x128xf32>
      tpu.vector_store %arg9[%c0_47, %c0_48], %57 {strides = array<i32>} : memref<8x128xf32, #tpu.memory_space<vmem>>, vector<1x128xf32>,
      %c1_49 = arith.constant 1 : index
      %c0_50 = arith.constant 0 : index
      %59 = vector.load %arg9[%c1_49, %c0_50] : memref<8x128xf32, #tpu.memory_space<vmem>>, vector<1x128xf32>
      %60 = arith.mulf %53, %53 : vector<64x128xf32>
      %cst_51 = arith.constant dense<0.000000e+00> : vector<128xf32>
      %61 = vector.multi_reduction <add>, %60, %cst_51 [0] : vector<64x128xf32> to vector<128xf32>
      %62 = vector.shape_cast %61 : vector<128xf32> to vector<1x128xf32>
      %63 = arith.addf %59, %62 : vector<1x128xf32>
      %c1_52 = arith.constant 1 : index
      %c0_53 = arith.constant 0 : index
      %64 = vector.load %arg9[%c1_52, %c0_53] : memref<8x128xf32, #tpu.memory_space<vmem>>, vector<1x128xf32>
      tpu.vector_store %arg9[%c1_52, %c0_53], %63 {strides = array<i32>} : memref<8x128xf32, #tpu.memory_space<vmem>>, vector<1x128xf32>,
      %65 = vector.shape_cast %53 : vector<64x128xf32> to vector<8x8x128xf32>
      %66 = arith.truncf %65 : vector<8x8x128xf32> to vector<8x8x128xbf16>
      %67 = arith.index_cast %arg1 : i32 to index
      %c1_54 = arith.constant 1 : index
      %c1_55 = arith.constant 1 : index
      %c0_56 = arith.constant 0 : index
      %68 = vector.load %arg8[%67, %c1_54, %c1_55, %c0_56] : memref<2x10x10x128xbf16, #tpu.memory_space<vmem>>, vector<1x8x8x128xbf16>
      %69 = vector.shape_cast %68 : vector<1x8x8x128xbf16> to vector<8x8x128xbf16>
      %70 = vector.shape_cast %66 : vector<8x8x128xbf16> to vector<1x8x8x128xbf16>
      tpu.vector_store %arg8[%67, %c1_54, %c1_55, %c0_56], %70 {strides = array<i32>} : memref<2x10x10x128xbf16, #tpu.memory_space<vmem>>, vector<1x8x8x128xbf16>,
      %c0_57 = arith.constant 0 : index
      %c27_58 = arith.constant 27 : index
      %c0_59 = arith.constant 0 : index
      %c0_60 = arith.constant 0 : index
      %71 = vector.load %arg2[%c0_57, %c27_58, %c0_59, %c0_60] : memref<1x36x9x8xbf16, #tpu.memory_space<vmem>>, vector<1x8x8x8xbf16>
      %72 = vector.shape_cast %71 : vector<1x8x8x8xbf16> to vector<8x8x8xbf16>
      %73 = vector.shape_cast %72 : vector<8x8x8xbf16> to vector<64x8xbf16>
      %c0_61 = arith.constant 0 : index
      %c0_62 = arith.constant 0 : index
      %74 = vector.load %arg5[%c0_61, %c0_62] : memref<8x128xbf16, #tpu.memory_space<vmem>>, vector<8x128xbf16>
      %cst_63 = arith.constant dense<0.000000e+00> : vector<64x128xf32>
      %75 = tpu.matmul %73, %74, %cst_63 {dimension_numbers = #tpu.dot_dimension_numbers<[1], [0], [0], [1], [0, 0, 1, 1], [], []>} : vector<64x8xbf16>, vector<8x128xbf16>, vector<64x128xf32> -> vector<64x128xf32>
      %c2 = arith.constant 2 : index
      %c0_64 = arith.constant 0 : index
      %76 = vector.load %arg9[%c2, %c0_64] : memref<8x128xf32, #tpu.memory_space<vmem>>, vector<1x128xf32>
      %cst_65 = arith.constant dense<0.000000e+00> : vector<128xf32>
      %77 = vector.multi_reduction <add>, %75, %cst_65 [0] : vector<64x128xf32> to vector<128xf32>
      %78 = vector.shape_cast %77 : vector<128xf32> to vector<1x128xf32>
      %79 = arith.addf %76, %78 : vector<1x128xf32>
      %c2_66 = arith.constant 2 : index
      %c0_67 = arith.constant 0 : index
      %80 = vector.load %arg9[%c2_66, %c0_67] : memref<8x128xf32, #tpu.memory_space<vmem>>, vector<1x128xf32>
      tpu.vector_store %arg9[%c2_66, %c0_67], %79 {strides = array<i32>} : memref<8x128xf32, #tpu.memory_space<vmem>>, vector<1x128xf32>,
      %c3 = arith.constant 3 : index
      %c0_68 = arith.constant 0 : index
      %81 = vector.load %arg9[%c3, %c0_68] : memref<8x128xf32, #tpu.memory_space<vmem>>, vector<1x128xf32>
      %82 = arith.mulf %75, %75 : vector<64x128xf32>
      %cst_69 = arith.constant dense<0.000000e+00> : vector<128xf32>
      %83 = vector.multi_reduction <add>, %82, %cst_69 [0] : vector<64x128xf32> to vector<128xf32>
      %84 = vector.shape_cast %83 : vector<128xf32> to vector<1x128xf32>
      %85 = arith.addf %81, %84 : vector<1x128xf32>
      %c3_70 = arith.constant 3 : index
      %c0_71 = arith.constant 0 : index
      %86 = vector.load %arg9[%c3_70, %c0_71] : memref<8x128xf32, #tpu.memory_space<vmem>>, vector<1x128xf32>
      tpu.vector_store %arg9[%c3_70, %c0_71], %85 {strides = array<i32>} : memref<8x128xf32, #tpu.memory_space<vmem>>, vector<1x128xf32>,
    } else {
    }
    %c1_i32 = arith.constant 1 : i32
    %8 = arith.cmpi eq, %arg0, %c1_i32 : i32
    %c0_i32_4 = arith.constant 0 : i32
    %9 = arith.cmpi eq, %arg1, %c0_i32_4 : i32
    %10 = arith.andi %8, %9 : i1
    %11 = arith.extui %10 : i1 to i32
    %c0_i32_5 = arith.constant 0 : i32
    %12 = arith.cmpi ne, %11, %c0_i32_5 : i32
    scf.if %12 {
      %c0 = arith.constant 0 : index
      %c0_12 = arith.constant 0 : index
      %24 = vector.load %arg9[%c0, %c0_12] : memref<8x128xf32, #tpu.memory_space<vmem>>, vector<1x128xf32>
      %cst = arith.constant 7.812500e-03 : f32
      %25 = vector.broadcast %cst : f32 to vector<1x128xf32>
      %26 = arith.mulf %24, %25 : vector<1x128xf32>
      %c1 = arith.constant 1 : index
      %c0_13 = arith.constant 0 : index
      %27 = vector.load %arg9[%c1, %c0_13] : memref<8x128xf32, #tpu.memory_space<vmem>>, vector<1x128xf32>
      %cst_14 = arith.constant 7.812500e-03 : f32
      %28 = vector.broadcast %cst_14 : f32 to vector<1x128xf32>
      %29 = arith.mulf %27, %28 : vector<1x128xf32>
      %30 = arith.mulf %26, %26 : vector<1x128xf32>
      %31 = arith.subf %29, %30 : vector<1x128xf32>
      %cst_15 = arith.constant 0.000000e+00 : f32
      %32 = vector.broadcast %cst_15 : f32 to vector<1x128xf32>
      %33 = arith.maximumf %31, %32 : vector<1x128xf32>
      %c0_16 = arith.constant 0 : index
      %c0_17 = arith.constant 0 : index
      %34 = vector.load %arg6[%c0_16, %c0_17] : memref<6x128xf32, #tpu.memory_space<vmem>>, vector<1x128xf32>
      %cst_18 = arith.constant 9.99999974E-6 : f32
      %35 = vector.broadcast %cst_18 : f32 to vector<1x128xf32>
      %36 = arith.addf %33, %35 : vector<1x128xf32>
      %37 = math.rsqrt %36 : vector<1x128xf32>
      %38 = arith.mulf %34, %37 : vector<1x128xf32>
      %c1_19 = arith.constant 1 : index
      %c0_20 = arith.constant 0 : index
      %39 = vector.load %arg6[%c1_19, %c0_20] : memref<6x128xf32, #tpu.memory_space<vmem>>, vector<1x128xf32>
      %40 = arith.mulf %26, %38 : vector<1x128xf32>
      %41 = arith.subf %39, %40 : vector<1x128xf32>
      %c0_21 = arith.constant 0 : index
      %c0_22 = arith.constant 0 : index
      %42 = vector.load %arg9[%c0_21, %c0_22] : memref<8x128xf32, #tpu.memory_space<vmem>>, vector<1x128xf32>
      tpu.vector_store %arg9[%c0_21, %c0_22], %38 {strides = array<i32>} : memref<8x128xf32, #tpu.memory_space<vmem>>, vector<1x128xf32>,
      %c1_23 = arith.constant 1 : index
      %c0_24 = arith.constant 0 : index
      %43 = vector.load %arg9[%c1_23, %c0_24] : memref<8x128xf32, #tpu.memory_space<vmem>>, vector<1x128xf32>
      tpu.vector_store %arg9[%c1_23, %c0_24], %41 {strides = array<i32>} : memref<8x128xf32, #tpu.memory_space<vmem>>, vector<1x128xf32>,
    } else {
    }
    %c1_i32_6 = arith.constant 1 : i32
    %13 = arith.cmpi eq, %arg0, %c1_i32_6 : i32
    %14 = arith.extui %13 : i1 to i32
    %c0_i32_7 = arith.constant 0 : i32
    %15 = arith.cmpi ne, %14, %c0_i32_7 : i32
    scf.if %15 {
      %c0 = arith.constant 0 : index
      %c0_12 = arith.constant 0 : index
      %24 = vector.load %arg9[%c0, %c0_12] : memref<8x128xf32, #tpu.memory_space<vmem>>, vector<1x128xf32>
      %25 = vector.shape_cast %24 : vector<1x128xf32> to vector<1x1x128xf32>
      %c1 = arith.constant 1 : index
      %c0_13 = arith.constant 0 : index
      %26 = vector.load %arg9[%c1, %c0_13] : memref<8x128xf32, #tpu.memory_space<vmem>>, vector<1x128xf32>
      %27 = vector.shape_cast %26 : vector<1x128xf32> to vector<1x1x128xf32>
      %28 = arith.index_cast %arg1 : i32 to index
      %c1_14 = arith.constant 1 : index
      %c1_15 = arith.constant 1 : index
      %c0_16 = arith.constant 0 : index
      %29 = vector.load %arg8[%28, %c1_14, %c1_15, %c0_16] : memref<2x10x10x128xbf16, #tpu.memory_space<vmem>>, vector<1x8x8x128xbf16>
      %30 = vector.shape_cast %29 : vector<1x8x8x128xbf16> to vector<8x8x128xbf16>
      %31 = arith.extf %30 : vector<8x8x128xbf16> to vector<8x8x128xf32>
      %32 = vector.broadcast %25 : vector<1x1x128xf32> to vector<8x8x128xf32>
      %33 = arith.mulf %31, %32 : vector<8x8x128xf32>
      %34 = vector.broadcast %27 : vector<1x1x128xf32> to vector<8x8x128xf32>
      %35 = arith.addf %33, %34 : vector<8x8x128xf32>
      %cst = arith.constant 0.000000e+00 : f32
      %36 = vector.broadcast %cst : f32 to vector<8x8x128xf32>
      %37 = arith.maximumf %35, %36 : vector<8x8x128xf32>
      %38 = arith.truncf %37 : vector<8x8x128xf32> to vector<8x8x128xbf16>
      %39 = arith.index_cast %arg1 : i32 to index
      %c1_17 = arith.constant 1 : index
      %c1_18 = arith.constant 1 : index
      %c0_19 = arith.constant 0 : index
      %40 = vector.load %arg8[%39, %c1_17, %c1_18, %c0_19] : memref<2x10x10x128xbf16, #tpu.memory_space<vmem>>, vector<1x8x8x128xbf16>
      %41 = vector.shape_cast %40 : vector<1x8x8x128xbf16> to vector<8x8x128xbf16>
      %42 = vector.shape_cast %38 : vector<8x8x128xbf16> to vector<1x8x8x128xbf16>
      tpu.vector_store %arg8[%39, %c1_17, %c1_18, %c0_19], %42 {strides = array<i32>} : memref<2x10x10x128xbf16, #tpu.memory_space<vmem>>, vector<1x8x8x128xbf16>,
      %43 = arith.index_cast %arg1 : i32 to index
      %c0_20 = arith.constant 0 : index
      %c0_21 = arith.constant 0 : index
      %c0_22 = arith.constant 0 : index
      %44 = vector.load %arg8[%43, %c0_20, %c0_21, %c0_22] : memref<2x10x10x128xbf16, #tpu.memory_space<vmem>>, vector<1x8x8x128xbf16>
      %45 = vector.shape_cast %44 : vector<1x8x8x128xbf16> to vector<8x8x128xbf16>
      %46 = vector.shape_cast %45 : vector<8x8x128xbf16> to vector<64x128xbf16>
      %47 = arith.index_cast %arg1 : i32 to index
      %c0_23 = arith.constant 0 : index
      %c1_24 = arith.constant 1 : index
      %c0_25 = arith.constant 0 : index
      %48 = vector.load %arg8[%47, %c0_23, %c1_24, %c0_25] : memref<2x10x10x128xbf16, #tpu.memory_space<vmem>>, vector<1x8x8x128xbf16>
      %49 = vector.shape_cast %48 : vector<1x8x8x128xbf16> to vector<8x8x128xbf16>
      %50 = vector.shape_cast %49 : vector<8x8x128xbf16> to vector<64x128xbf16>
      %51 = arith.index_cast %arg1 : i32 to index
      %c0_26 = arith.constant 0 : index
      %c2 = arith.constant 2 : index
      %c0_27 = arith.constant 0 : index
      %52 = vector.load %arg8[%51, %c0_26, %c2, %c0_27] : memref<2x10x10x128xbf16, #tpu.memory_space<vmem>>, vector<1x8x8x128xbf16>
      %53 = vector.shape_cast %52 : vector<1x8x8x128xbf16> to vector<8x8x128xbf16>
      %54 = vector.shape_cast %53 : vector<8x8x128xbf16> to vector<64x128xbf16>
      %55 = arith.index_cast %arg1 : i32 to index
      %c1_28 = arith.constant 1 : index
      %c0_29 = arith.constant 0 : index
      %c0_30 = arith.constant 0 : index
      %56 = vector.load %arg8[%55, %c1_28, %c0_29, %c0_30] : memref<2x10x10x128xbf16, #tpu.memory_space<vmem>>, vector<1x8x8x128xbf16>
      %57 = vector.shape_cast %56 : vector<1x8x8x128xbf16> to vector<8x8x128xbf16>
      %58 = vector.shape_cast %57 : vector<8x8x128xbf16> to vector<64x128xbf16>
      %59 = arith.index_cast %arg1 : i32 to index
      %c1_31 = arith.constant 1 : index
      %c1_32 = arith.constant 1 : index
      %c0_33 = arith.constant 0 : index
      %60 = vector.load %arg8[%59, %c1_31, %c1_32, %c0_33] : memref<2x10x10x128xbf16, #tpu.memory_space<vmem>>, vector<1x8x8x128xbf16>
      %61 = vector.shape_cast %60 : vector<1x8x8x128xbf16> to vector<8x8x128xbf16>
      %62 = vector.shape_cast %61 : vector<8x8x128xbf16> to vector<64x128xbf16>
      %63 = arith.index_cast %arg1 : i32 to index
      %c1_34 = arith.constant 1 : index
      %c2_35 = arith.constant 2 : index
      %c0_36 = arith.constant 0 : index
      %64 = vector.load %arg8[%63, %c1_34, %c2_35, %c0_36] : memref<2x10x10x128xbf16, #tpu.memory_space<vmem>>, vector<1x8x8x128xbf16>
      %65 = vector.shape_cast %64 : vector<1x8x8x128xbf16> to vector<8x8x128xbf16>
      %66 = vector.shape_cast %65 : vector<8x8x128xbf16> to vector<64x128xbf16>
      %67 = arith.index_cast %arg1 : i32 to index
      %c2_37 = arith.constant 2 : index
      %c0_38 = arith.constant 0 : index
      %c0_39 = arith.constant 0 : index
      %68 = vector.load %arg8[%67, %c2_37, %c0_38, %c0_39] : memref<2x10x10x128xbf16, #tpu.memory_space<vmem>>, vector<1x8x8x128xbf16>
      %69 = vector.shape_cast %68 : vector<1x8x8x128xbf16> to vector<8x8x128xbf16>
      %70 = vector.shape_cast %69 : vector<8x8x128xbf16> to vector<64x128xbf16>
      %71 = arith.index_cast %arg1 : i32 to index
      %c2_40 = arith.constant 2 : index
      %c1_41 = arith.constant 1 : index
      %c0_42 = arith.constant 0 : index
      %72 = vector.load %arg8[%71, %c2_40, %c1_41, %c0_42] : memref<2x10x10x128xbf16, #tpu.memory_space<vmem>>, vector<1x8x8x128xbf16>
      %73 = vector.shape_cast %72 : vector<1x8x8x128xbf16> to vector<8x8x128xbf16>
      %74 = vector.shape_cast %73 : vector<8x8x128xbf16> to vector<64x128xbf16>
      %75 = arith.index_cast %arg1 : i32 to index
      %c2_43 = arith.constant 2 : index
      %c2_44 = arith.constant 2 : index
      %c0_45 = arith.constant 0 : index
      %76 = vector.load %arg8[%75, %c2_43, %c2_44, %c0_45] : memref<2x10x10x128xbf16, #tpu.memory_space<vmem>>, vector<1x8x8x128xbf16>
      %77 = vector.shape_cast %76 : vector<1x8x8x128xbf16> to vector<8x8x128xbf16>
      %78 = vector.shape_cast %77 : vector<8x8x128xbf16> to vector<64x128xbf16>
      %79 = tpu.concatenate %46, %50, %54, %58, %62, %66, %70, %74, %78 in 1 : vector<64x128xbf16>, vector<64x128xbf16>, vector<64x128xbf16>, vector<64x128xbf16>, vector<64x128xbf16>, vector<64x128xbf16>, vector<64x128xbf16>, vector<64x128xbf16>, vector<64x128xbf16> -> vector<64x1152xbf16>
      %c0_46 = arith.constant 0 : index
      %c0_47 = arith.constant 0 : index
      %80 = vector.load %arg4[%c0_46, %c0_47] : memref<1152x128xbf16, #tpu.memory_space<vmem>>, vector<1152x128xbf16>
      %cst_48 = arith.constant dense<0.000000e+00> : vector<64x128xf32>
      %81 = tpu.matmul %79, %80, %cst_48 {dimension_numbers = #tpu.dot_dimension_numbers<[1], [0], [0], [1], [0, 0, 1, 1], [], []>} : vector<64x1152xbf16>, vector<1152x128xbf16>, vector<64x128xf32> -> vector<64x128xf32>
      %c4 = arith.constant 4 : index
      %c0_49 = arith.constant 0 : index
      %82 = vector.load %arg9[%c4, %c0_49] : memref<8x128xf32, #tpu.memory_space<vmem>>, vector<1x128xf32>
      %cst_50 = arith.constant dense<0.000000e+00> : vector<128xf32>
      %83 = vector.multi_reduction <add>, %81, %cst_50 [0] : vector<64x128xf32> to vector<128xf32>
      %84 = vector.shape_cast %83 : vector<128xf32> to vector<1x128xf32>
      %85 = arith.addf %82, %84 : vector<1x128xf32>
      %c4_51 = arith.constant 4 : index
      %c0_52 = arith.constant 0 : index
      %86 = vector.load %arg9[%c4_51, %c0_52] : memref<8x128xf32, #tpu.memory_space<vmem>>, vector<1x128xf32>
      tpu.vector_store %arg9[%c4_51, %c0_52], %85 {strides = array<i32>} : memref<8x128xf32, #tpu.memory_space<vmem>>, vector<1x128xf32>,
      %c5 = arith.constant 5 : index
      %c0_53 = arith.constant 0 : index
      %87 = vector.load %arg9[%c5, %c0_53] : memref<8x128xf32, #tpu.memory_space<vmem>>, vector<1x128xf32>
      %88 = arith.mulf %81, %81 : vector<64x128xf32>
      %cst_54 = arith.constant dense<0.000000e+00> : vector<128xf32>
      %89 = vector.multi_reduction <add>, %88, %cst_54 [0] : vector<64x128xf32> to vector<128xf32>
      %90 = vector.shape_cast %89 : vector<128xf32> to vector<1x128xf32>
      %91 = arith.addf %87, %90 : vector<1x128xf32>
      %c5_55 = arith.constant 5 : index
      %c0_56 = arith.constant 0 : index
      %92 = vector.load %arg9[%c5_55, %c0_56] : memref<8x128xf32, #tpu.memory_space<vmem>>, vector<1x128xf32>
      tpu.vector_store %arg9[%c5_55, %c0_56], %91 {strides = array<i32>} : memref<8x128xf32, #tpu.memory_space<vmem>>, vector<1x128xf32>,
      %93 = vector.shape_cast %81 : vector<64x128xf32> to vector<8x8x128xf32>
      %94 = arith.truncf %93 : vector<8x8x128xf32> to vector<8x8x128xbf16>
      %95 = arith.index_cast %arg1 : i32 to index
      %c1_57 = arith.constant 1 : index
      %c1_58 = arith.constant 1 : index
      %c0_59 = arith.constant 0 : index
      %96 = vector.load %arg8[%95, %c1_57, %c1_58, %c0_59] : memref<2x10x10x128xbf16, #tpu.memory_space<vmem>>, vector<1x8x8x128xbf16>
      %97 = vector.shape_cast %96 : vector<1x8x8x128xbf16> to vector<8x8x128xbf16>
      %98 = vector.shape_cast %94 : vector<8x8x128xbf16> to vector<1x8x8x128xbf16>
      tpu.vector_store %arg8[%95, %c1_57, %c1_58, %c0_59], %98 {strides = array<i32>} : memref<2x10x10x128xbf16, #tpu.memory_space<vmem>>, vector<1x8x8x128xbf16>,
    } else {
    }
    %c2_i32 = arith.constant 2 : i32
    %16 = arith.cmpi eq, %arg0, %c2_i32 : i32
    %c0_i32_8 = arith.constant 0 : i32
    %17 = arith.cmpi eq, %arg1, %c0_i32_8 : i32
    %18 = arith.andi %16, %17 : i1
    %19 = arith.extui %18 : i1 to i32
    %c0_i32_9 = arith.constant 0 : i32
    %20 = arith.cmpi ne, %19, %c0_i32_9 : i32
    scf.if %20 {
      %c4 = arith.constant 4 : index
      %c0 = arith.constant 0 : index
      %24 = vector.load %arg9[%c4, %c0] : memref<8x128xf32, #tpu.memory_space<vmem>>, vector<1x128xf32>
      %cst = arith.constant 7.812500e-03 : f32
      %25 = vector.broadcast %cst : f32 to vector<1x128xf32>
      %26 = arith.mulf %24, %25 : vector<1x128xf32>
      %c5 = arith.constant 5 : index
      %c0_12 = arith.constant 0 : index
      %27 = vector.load %arg9[%c5, %c0_12] : memref<8x128xf32, #tpu.memory_space<vmem>>, vector<1x128xf32>
      %cst_13 = arith.constant 7.812500e-03 : f32
      %28 = vector.broadcast %cst_13 : f32 to vector<1x128xf32>
      %29 = arith.mulf %27, %28 : vector<1x128xf32>
      %30 = arith.mulf %26, %26 : vector<1x128xf32>
      %31 = arith.subf %29, %30 : vector<1x128xf32>
      %cst_14 = arith.constant 0.000000e+00 : f32
      %32 = vector.broadcast %cst_14 : f32 to vector<1x128xf32>
      %33 = arith.maximumf %31, %32 : vector<1x128xf32>
      %c2 = arith.constant 2 : index
      %c0_15 = arith.constant 0 : index
      %34 = vector.load %arg6[%c2, %c0_15] : memref<6x128xf32, #tpu.memory_space<vmem>>, vector<1x128xf32>
      %cst_16 = arith.constant 9.99999974E-6 : f32
      %35 = vector.broadcast %cst_16 : f32 to vector<1x128xf32>
      %36 = arith.addf %33, %35 : vector<1x128xf32>
      %37 = math.rsqrt %36 : vector<1x128xf32>
      %38 = arith.mulf %34, %37 : vector<1x128xf32>
      %c3 = arith.constant 3 : index
      %c0_17 = arith.constant 0 : index
      %39 = vector.load %arg6[%c3, %c0_17] : memref<6x128xf32, #tpu.memory_space<vmem>>, vector<1x128xf32>
      %40 = arith.mulf %26, %38 : vector<1x128xf32>
      %41 = arith.subf %39, %40 : vector<1x128xf32>
      %c4_18 = arith.constant 4 : index
      %c0_19 = arith.constant 0 : index
      %42 = vector.load %arg9[%c4_18, %c0_19] : memref<8x128xf32, #tpu.memory_space<vmem>>, vector<1x128xf32>
      tpu.vector_store %arg9[%c4_18, %c0_19], %38 {strides = array<i32>} : memref<8x128xf32, #tpu.memory_space<vmem>>, vector<1x128xf32>,
      %c5_20 = arith.constant 5 : index
      %c0_21 = arith.constant 0 : index
      %43 = vector.load %arg9[%c5_20, %c0_21] : memref<8x128xf32, #tpu.memory_space<vmem>>, vector<1x128xf32>
      tpu.vector_store %arg9[%c5_20, %c0_21], %41 {strides = array<i32>} : memref<8x128xf32, #tpu.memory_space<vmem>>, vector<1x128xf32>,
      %c2_22 = arith.constant 2 : index
      %c0_23 = arith.constant 0 : index
      %44 = vector.load %arg9[%c2_22, %c0_23] : memref<8x128xf32, #tpu.memory_space<vmem>>, vector<1x128xf32>
      %cst_24 = arith.constant 7.812500e-03 : f32
      %45 = vector.broadcast %cst_24 : f32 to vector<1x128xf32>
      %46 = arith.mulf %44, %45 : vector<1x128xf32>
      %c3_25 = arith.constant 3 : index
      %c0_26 = arith.constant 0 : index
      %47 = vector.load %arg9[%c3_25, %c0_26] : memref<8x128xf32, #tpu.memory_space<vmem>>, vector<1x128xf32>
      %cst_27 = arith.constant 7.812500e-03 : f32
      %48 = vector.broadcast %cst_27 : f32 to vector<1x128xf32>
      %49 = arith.mulf %47, %48 : vector<1x128xf32>
      %50 = arith.mulf %46, %46 : vector<1x128xf32>
      %51 = arith.subf %49, %50 : vector<1x128xf32>
      %cst_28 = arith.constant 0.000000e+00 : f32
      %52 = vector.broadcast %cst_28 : f32 to vector<1x128xf32>
      %53 = arith.maximumf %51, %52 : vector<1x128xf32>
      %c4_29 = arith.constant 4 : index
      %c0_30 = arith.constant 0 : index
      %54 = vector.load %arg6[%c4_29, %c0_30] : memref<6x128xf32, #tpu.memory_space<vmem>>, vector<1x128xf32>
      %cst_31 = arith.constant 9.99999974E-6 : f32
      %55 = vector.broadcast %cst_31 : f32 to vector<1x128xf32>
      %56 = arith.addf %53, %55 : vector<1x128xf32>
      %57 = math.rsqrt %56 : vector<1x128xf32>
      %58 = arith.mulf %54, %57 : vector<1x128xf32>
      %c5_32 = arith.constant 5 : index
      %c0_33 = arith.constant 0 : index
      %59 = vector.load %arg6[%c5_32, %c0_33] : memref<6x128xf32, #tpu.memory_space<vmem>>, vector<1x128xf32>
      %60 = arith.mulf %46, %58 : vector<1x128xf32>
      %61 = arith.subf %59, %60 : vector<1x128xf32>
      %c2_34 = arith.constant 2 : index
      %c0_35 = arith.constant 0 : index
      %62 = vector.load %arg9[%c2_34, %c0_35] : memref<8x128xf32, #tpu.memory_space<vmem>>, vector<1x128xf32>
      tpu.vector_store %arg9[%c2_34, %c0_35], %58 {strides = array<i32>} : memref<8x128xf32, #tpu.memory_space<vmem>>, vector<1x128xf32>,
      %c3_36 = arith.constant 3 : index
      %c0_37 = arith.constant 0 : index
      %63 = vector.load %arg9[%c3_36, %c0_37] : memref<8x128xf32, #tpu.memory_space<vmem>>, vector<1x128xf32>
      tpu.vector_store %arg9[%c3_36, %c0_37], %61 {strides = array<i32>} : memref<8x128xf32, #tpu.memory_space<vmem>>, vector<1x128xf32>,
    } else {
    }
    %c2_i32_10 = arith.constant 2 : i32
    %21 = arith.cmpi eq, %arg0, %c2_i32_10 : i32
    %22 = arith.extui %21 : i1 to i32
    %c0_i32_11 = arith.constant 0 : i32
    %23 = arith.cmpi ne, %22, %c0_i32_11 : i32
    scf.if %23 {
      %c4 = arith.constant 4 : index
      %c0 = arith.constant 0 : index
      %24 = vector.load %arg9[%c4, %c0] : memref<8x128xf32, #tpu.memory_space<vmem>>, vector<1x128xf32>
      %25 = vector.shape_cast %24 : vector<1x128xf32> to vector<1x1x128xf32>
      %c5 = arith.constant 5 : index
      %c0_12 = arith.constant 0 : index
      %26 = vector.load %arg9[%c5, %c0_12] : memref<8x128xf32, #tpu.memory_space<vmem>>, vector<1x128xf32>
      %27 = vector.shape_cast %26 : vector<1x128xf32> to vector<1x1x128xf32>
      %28 = arith.index_cast %arg1 : i32 to index
      %c1 = arith.constant 1 : index
      %c1_13 = arith.constant 1 : index
      %c0_14 = arith.constant 0 : index
      %29 = vector.load %arg8[%28, %c1, %c1_13, %c0_14] : memref<2x10x10x128xbf16, #tpu.memory_space<vmem>>, vector<1x8x8x128xbf16>
      %30 = vector.shape_cast %29 : vector<1x8x8x128xbf16> to vector<8x8x128xbf16>
      %31 = arith.extf %30 : vector<8x8x128xbf16> to vector<8x8x128xf32>
      %32 = vector.broadcast %25 : vector<1x1x128xf32> to vector<8x8x128xf32>
      %33 = arith.mulf %31, %32 : vector<8x8x128xf32>
      %34 = vector.broadcast %27 : vector<1x1x128xf32> to vector<8x8x128xf32>
      %35 = arith.addf %33, %34 : vector<8x8x128xf32>
      %c0_15 = arith.constant 0 : index
      %c27 = arith.constant 27 : index
      %c0_16 = arith.constant 0 : index
      %c0_17 = arith.constant 0 : index
      %36 = vector.load %arg2[%c0_15, %c27, %c0_16, %c0_17] : memref<1x36x9x8xbf16, #tpu.memory_space<vmem>>, vector<1x8x8x8xbf16>
      %37 = vector.shape_cast %36 : vector<1x8x8x8xbf16> to vector<8x8x8xbf16>
      %38 = vector.shape_cast %37 : vector<8x8x8xbf16> to vector<64x8xbf16>
      %c0_18 = arith.constant 0 : index
      %c0_19 = arith.constant 0 : index
      %39 = vector.load %arg5[%c0_18, %c0_19] : memref<8x128xbf16, #tpu.memory_space<vmem>>, vector<8x128xbf16>
      %cst = arith.constant dense<0.000000e+00> : vector<64x128xf32>
      %40 = tpu.matmul %38, %39, %cst {dimension_numbers = #tpu.dot_dimension_numbers<[1], [0], [0], [1], [0, 0, 1, 1], [], []>} : vector<64x8xbf16>, vector<8x128xbf16>, vector<64x128xf32> -> vector<64x128xf32>
      %c2 = arith.constant 2 : index
      %c0_20 = arith.constant 0 : index
      %41 = vector.load %arg9[%c2, %c0_20] : memref<8x128xf32, #tpu.memory_space<vmem>>, vector<1x128xf32>
      %42 = vector.broadcast %41 : vector<1x128xf32> to vector<64x128xf32>
      %43 = arith.mulf %40, %42 : vector<64x128xf32>
      %c3 = arith.constant 3 : index
      %c0_21 = arith.constant 0 : index
      %44 = vector.load %arg9[%c3, %c0_21] : memref<8x128xf32, #tpu.memory_space<vmem>>, vector<1x128xf32>
      %45 = vector.broadcast %44 : vector<1x128xf32> to vector<64x128xf32>
      %46 = arith.addf %43, %45 : vector<64x128xf32>
      %47 = vector.shape_cast %46 : vector<64x128xf32> to vector<8x8x128xf32>
      %48 = arith.addf %35, %47 : vector<8x8x128xf32>
      %cst_22 = arith.constant 0.000000e+00 : f32
      %49 = vector.broadcast %cst_22 : f32 to vector<8x8x128xf32>
      %50 = arith.maximumf %48, %49 : vector<8x8x128xf32>
      %c0_23 = arith.constant 0 : index
      %c0_24 = arith.constant 0 : index
      %c0_25 = arith.constant 0 : index
      %c0_26 = arith.constant 0 : index
      %51 = vector.load %arg7[%c0_23, %c0_24, %c0_25, %c0_26] : memref<1x8x8x128xf32, #tpu.memory_space<vmem>>, vector<1x8x8x128xf32>
      %52 = vector.shape_cast %51 : vector<1x8x8x128xf32> to vector<8x8x128xf32>
      %53 = vector.shape_cast %50 : vector<8x8x128xf32> to vector<1x8x8x128xf32>
      tpu.vector_store %arg7[%c0_23, %c0_24, %c0_25, %c0_26], %53 {strides = array<i32>} : memref<1x8x8x128xf32, #tpu.memory_space<vmem>>, vector<1x8x8x128xf32>,
    } else {
    }
    return
  }
  func.func @transform_0(%arg0: i32, %arg1: i32) -> (i32, i32, i32, i32) {
    %c1_i32 = arith.constant 1 : i32
    %0 = arith.cmpi eq, %arg0, %c1_i32 : i32
    %c0_i32 = arith.constant 0 : i32
    %1 = arith.select %0, %c0_i32, %arg1 : i32
    %c0_i32_0 = arith.constant 0 : i32
    %c0_i32_1 = arith.constant 0 : i32
    %c0_i32_2 = arith.constant 0 : i32
    %c0_i32_3 = arith.constant 0 : i32
    return %1, %c0_i32_0, %c0_i32_1, %c0_i32_2 : i32, i32, i32, i32
  }
  func.func @transform_1(%arg0: i32, %arg1: i32) -> (i32, i32) {
    %c0_i32 = arith.constant 0 : i32
    %c0_i32_0 = arith.constant 0 : i32
    %c0_i32_1 = arith.constant 0 : i32
    return %c0_i32, %c0_i32_0 : i32, i32
  }
  func.func @transform_2(%arg0: i32, %arg1: i32) -> (i32, i32) {
    %c0_i32 = arith.constant 0 : i32
    %c0_i32_0 = arith.constant 0 : i32
    %c0_i32_1 = arith.constant 0 : i32
    return %c0_i32, %c0_i32_0 : i32, i32
  }
  func.func @transform_3(%arg0: i32, %arg1: i32) -> (i32, i32) {
    %c0_i32 = arith.constant 0 : i32
    %c0_i32_0 = arith.constant 0 : i32
    %c0_i32_1 = arith.constant 0 : i32
    return %c0_i32, %c0_i32_0 : i32, i32
  }
  func.func @transform_4(%arg0: i32, %arg1: i32) -> (i32, i32) {
    %c0_i32 = arith.constant 0 : i32
    %c0_i32_0 = arith.constant 0 : i32
    %c0_i32_1 = arith.constant 0 : i32
    return %c0_i32, %c0_i32_0 : i32, i32
  }
  func.func @transform_5(%arg0: i32, %arg1: i32) -> (i32, i32, i32, i32) {
    %c2_i32 = arith.constant 2 : i32
    %0 = arith.cmpi eq, %arg0, %c2_i32 : i32
    %c0_i32 = arith.constant 0 : i32
    %1 = arith.select %0, %arg1, %c0_i32 : i32
    %c0_i32_0 = arith.constant 0 : i32
    %c0_i32_1 = arith.constant 0 : i32
    %c0_i32_2 = arith.constant 0 : i32
    %c0_i32_3 = arith.constant 0 : i32
    return %1, %c0_i32_0, %c0_i32_1, %c0_i32_2 : i32, i32, i32, i32
  }
}

</mosaic_0001>

<bundles_post_ra>
// kernel: tpu_custom_call.1
= control target key start
LH: loop header
LB: loop body
LE: loop exit
PB: predicated region body
PF: predicated region fallthrough
CT: control target
= control target key end

     0   :  { %s6378_s0 = inlined_call_operand.vmem [shape: bf16[2,36,9,8], index: 0, kind: input, shape index: {}]   ;;  %s6379_s1 = inlined_call_operand.vmem [shape: bf16[72,128], index: 1, kind: input, shape index: {}]   ;;  %s6380_s2 = inlined_call_operand.vmem [shape: bf16[1152,128], index: 2, kind: input, shape index: {}]   ;;  %s6381_s3 = inlined_call_operand.vmem [shape: bf16[8,128], index: 3, kind: input, shape index: {}]   ;;  %s6382_s4 = inlined_call_operand.vmem [shape: f32[6,128], index: 4, kind: input, shape index: {}]   ;;  %s6383_s5 = inlined_call_operand.hbm [shape: f32[2,8,8,128], index: 5, kind: output, shape index: {}]  }
   0x1   :  { %6385 = sst [smem:[#allocation7_spill]] %s6378_s0 }
   0x2   :  { %10 = vsyncpa [#allocation5], 0 }
   0x3   :  { %12 = vsyncpa [#allocation5 + $0x1], 0  ;;  %s4901_s18 = smov 0   ;;  %s4903_s19 = smov 0  }
   0x4   :  { %s4905_s20 = smov 0   ;;  %s4907_s21 = smov 0  }
   0x5   :  { %s4909_s22 = smov 0   ;;  %s4911_s23 = smov 0  }
   0x6   :  { %s4913_s24 = smov 0   ;;  %s4915_s25 = smov 0  }
   0x7 LB: > { %s3736_s26 = sadd.s32 4294967295, %s4857_s25   ;;  %s27_s27 = sadd.s32 1, %s4849_s23  ;;  %s4857_s25 = sphi %s4915_s25, %s18_s25   ;;  %s4853_s24 = sphi %s4913_s24, %s6410_s24   ;;  %s4849_s23 = sphi %s4911_s23, %s6409_s23   ;;  %s4845_s22 = sphi %s4909_s22, %s6408_s22   ;;  %s4841_s21 = sphi %s4907_s21, %s6407_s21   ;;  %s4837_s20 = sphi %s4905_s20, %s6406_s20   ;;  %s4833_s19 = sphi %s4903_s19, %s6405_s19   ;;  %s4829_s18 = sphi %s4901_s18, %s6404_s18  }
   0x8   : > { %s30_s28 = sadd.s32 1, %s4853_s24  ;;  %p28_p0 = scmp.ge.s32.totalorder %s27_s27, 2 }
   0x9   : > { %p148_p1 = scmp.eq.s32.totalorder %s4853_s24, 2  ;;  %s3737_s29 = sadd.s32 4294967294, %s4857_s25  }
   0xa   : > { %p165_p2 = scmp.ne.s32.totalorder %s4837_s20, %s4833_s19  ;;  %s6412_s27 = smov (%p28_p0, %s27_s27), 0 }
   0xb   : > { %s6414_s28 = smov (!%p28_p0, %s30_s28), %s4853_s24  ;;  %p166_p4 = scmp.eq.s32.totalorder %s3736_s26, 5 }
   0xc   : > { %s149_s30 = scalar_select %p148_p1, %s4849_s23, 0 }
   0xd   : > { %p32_p3 = scmp.ge.s32.totalorder %s6414_s28, 3  ;;  %p171_p5 = scmp.ne.s32.totalorder %s4833_s19, %s4829_s18 }
   0xe   : > { %p172_p6 = scmp.eq.s32.totalorder %s3737_s29, 5  ;;  %p4956_p7 = por %p166_p4, %p165_p2 }
   0xf   : > { %s6416_s28 = smov (%p32_p3, %s6414_s28), 0  ;;  %p3740_p10 = scmp.ge.s32.totalorder %s4857_s25, 1 }
  0x10   : > { %p4960_p8 = por %p172_p6, %p171_p5  ;;  %p150_p9 = scmp.eq.s32.totalorder %s6416_s28, 2 }
  0x11   : > { %p214_p11 = scmp.lt.s32.totalorder %s4857_s25, 7  ;;  %s155_s10 = sadd.s32 1, %s4837_s20 }
  0x12   : > { %s151_s8 = scalar_select %p150_p9, %s6412_s27, 0 }
  0x13   : > { %p215_p12 = pnand %p3740_p10, %p214_p11 }
  0x14   : > { %s152_s9 = ssub.s32 %s149_s30, %s151_s8  ;;  %s6384_s12 = sand.u32 (!%p215_p12), 1, %s4833_s19  }
  0x15   : > { %p153_p13 = scmp.eq.s32.totalorder %s152_s9, 0  ;;  %218 = sbr.rel (%p215_p12) target bundleno = 1068 (0x42c), region = 40 }
  0x16   : > { %p244_p0 = scmp.eq.s32.totalorder (!%p215_p12), %s4845_s22, 1  ;;  %s3741_s13 = sshll.u32 (!%p215_p12), %s6384_s12, 6 }
  0x17   : > { %s4970_s11 = scalar_select %p153_p13, %s4837_s20, %s155_s10  }
  0x18   : > { %p256_p1 = scmp.eq.s32.totalorder (!%p215_p12), %s4845_s22, 0  ;;  %p257_p2 = scmp.eq.s32.totalorder (!%p215_p12), %s4841_s21, 0 }
  0x19   : > { %s6388_s0 = sld [smem:[#allocation7_spill]] (!%p215_p12)  ;;  %s4988_s29 = scalar_lea.vmem (!%p215_p12), [#allocation4], %s3741_s13 }
  0x1a   : > { %s245_s14 = scalar_select %p244_p0, 0, %s4841_s21 }
  0x1b   : > { %p258_p3 = pnand %p257_p2, %p256_p1 }
  0x1c   : > { %p246_p4 = scmp.lt.s32.totalorder %s245_s14, 1 }
  0x1d   : > { %261 = sbr.rel (%p258_p3) target bundleno = 76 (0x4c), region = 44 }
  0x1e   : > { %s6418_s14 = smov (!%p246_p4, %s245_s14), 1 }
  0x1f   : > { %s4666_s15 = smul.u32 288, %s6418_s14 }
  0x21   : > { %s4986_s26 = scalar_lea.vmem %s6388_s0, %s4666_s15 }
  0x22   : > { %v4859_v0 = vmov 0.0   ;;  %v4860_v1 = vmov 0  }
  0x23   : > { %262 = vst [vmem:[#allocation3] sm:$0xff] %v4859_v0 }
  0x24   : > { %263 = vst [vmem:[#allocation2] sm:$0xf] %v4860_v1 }
  0x25   : > { %264 = vst [vmem:[#allocation2 + $0x4] sm:$0x1] %v4860_v1 }
  0x26   : > { %265 = vst [vmem:[#allocation2 + $0x8] sm:$0xf] %v4860_v1 }
  0x27   : > { %266 = vst [vmem:[#allocation2 + $0xc] sm:$0x1] %v4860_v1 }
  0x28   : > { %267 = vst [vmem:[#allocation2 + $0x10] sm:$0xf] %v4860_v1 }
  0x29   : > { %268 = vst [vmem:[#allocation2 + $0x14] sm:$0x1] %v4860_v1 }
  0x2a   : > { %269 = vst [vmem:[#allocation2 + $0x18] sm:$0xf] %v4860_v1 }
  0x2b   : > { %270 = vst [vmem:[#allocation2 + $0x1c] sm:$0x1] %v4860_v1 }
  0x2c   : > { %271 = vst [vmem:[#allocation2 + $0x20] sm:$0xf] %v4860_v1 }
  0x2d   : > { %272 = vst [vmem:[#allocation2 + $0x24] sm:$0x1] %v4860_v1 }
  0x2e   : > { %273 = vst [vmem:[#allocation2 + $0x28] sm:$0xf] %v4860_v1 }
  0x2f   : > { %274 = vst [vmem:[#allocation2 + $0x2c] sm:$0x1] %v4860_v1 }
  0x30   : > { %275 = vst [vmem:[#allocation2 + $0x30] sm:$0xf] %v4860_v1 }
  0x31   : > { %276 = vst [vmem:[#allocation2 + $0x34] sm:$0x1] %v4860_v1 }
  0x32   : > { %277 = vst [vmem:[#allocation2 + $0x38] sm:$0xf] %v4860_v1 }
  0x33   : > { %278 = vst [vmem:[#allocation2 + $0x3c] sm:$0x1] %v4860_v1 }
  0x34   : > { %279 = vst [vmem:[#allocation2 + $0x40] sm:$0xf] %v4860_v1 }
  0x35   : > { %280 = vst [vmem:[#allocation2 + $0x44] sm:$0x1] %v4860_v1 }
  0x36   : > { %281 = vst [vmem:[#allocation2 + $0x48] sm:$0xf] %v4860_v1 }
  0x37   : > { %282 = vst [vmem:[#allocation2 + $0x4c] sm:$0x1] %v4860_v1 }
  0x38   : > { %283 = vst [vmem:[#allocation2 + $0x50] sm:$0xf] %v4860_v1 }
  0x39   : > { %284 = vst [vmem:[#allocation2 + $0x54] sm:$0x1] %v4860_v1 }
  0x3a   : > { %285 = vst [vmem:[#allocation2 + $0x58] sm:$0xf] %v4860_v1 }
  0x3b   : > { %286 = vst [vmem:[#allocation2 + $0x5c] sm:$0x1] %v4860_v1 }
  0x3c   : > { %287 = vst [vmem:[#allocation2 + $0x60] sm:$0xf] %v4860_v1 }
  0x3d   : > { %288 = vst [vmem:[#allocation2 + $0x64] sm:$0x1] %v4860_v1 }
  0x3e   : > { %289 = vst [vmem:[#allocation2 + $0x68] sm:$0xf] %v4860_v1 }
  0x3f   : > { %290 = vst [vmem:[#allocation2 + $0x6c] sm:$0x1] %v4860_v1 }
  0x40   : > { %291 = vst [vmem:[#allocation2 + $0x70] sm:$0xf] %v4860_v1 }
  0x41   : > { %292 = vst [vmem:[#allocation2 + $0x74] sm:$0x1] %v4860_v1 }
  0x42   : > { %293 = vst [vmem:[#allocation2 + $0x78] sm:$0xf] %v4860_v1 }
  0x43   : > { %294 = vst [vmem:[#allocation2 + $0x7c] sm:$0x1] %v4860_v1 }
  0x44   : > { %295 = vst [vmem:[#allocation2 + $0x80] sm:$0xf] %v4860_v1 }
  0x45   : > { %296 = vst [vmem:[#allocation2 + $0x84] sm:$0x1] %v4860_v1 }
  0x46   : > { %297 = vst [vmem:[#allocation2 + $0x88] sm:$0xf] %v4860_v1 }
  0x47   : > { %298 = vst [vmem:[#allocation2 + $0x8c] sm:$0x1] %v4860_v1 }
  0x48   : > { %299 = vst [vmem:[#allocation2 + $0x90] sm:$0xf] %v4860_v1 }
  0x49   : > { %300 = vst [vmem:[#allocation2 + $0x94] sm:$0x1] %v4860_v1 }
  0x4a   : > { %301 = vst [vmem:[#allocation2 + $0x98] sm:$0xf] %v4860_v1 }
  0x4b   : > { %302 = vst [vmem:[#allocation2 + $0x9c] sm:$0x1] %v4860_v1 }
  0x4c PF: > { %p3743_p5 = scmp.ne.s32.totalorder %s4845_s22, 0 }
  0x4d   : > { %s4861_s30 = smov (!%p3743_p5), 8   ;;  %s4862_s8 = smov (!%p3743_p5), 24  }
  0x4e   : > { %305 = sbr.rel (%p3743_p5) target bundleno = 449 (0x1c1), region = 48  ;;  %s4863_s9 = smov (!%p3743_p5), 32  }
  0x4f   : > { %s4864_s10 = smov (!%p3743_p5), 16   ;;  %s4865_s13 = smov (!%p3743_p5), 40  }
  0x50   : > { %s4866_s14 = smov (!%p3743_p5), 48   ;;  %s4867_s15 = smov (!%p3743_p5), 64  }
  0x51   : > { %s4868_s16 = smov (!%p3743_p5), 56  }
  0x53   : > { %v3826_v2 = vld [vmem:[%s4986_s26 + $0x68] sm:$0xf]  ;;  %v4525_v3 = vld [vmem:[%s4986_s26 + $0x6c] sm:$0xf0]  ;;  %v4527_v9 = vld [vmem:[%s4986_s26 + $0x94] sm:$0xf0] }
  0x54   : > { %v3827_v4 = vor.u32 %v4525_v3, %v3826_v2  ;;  %v3818_v5 = vld [vmem:[%s4986_s26 + $0x48] sm:$0xf]  ;;  %v4523_v6 = vld [vmem:[%s4986_s26 + $0x4c] sm:$0xf0]  ;;  %v306_v10 = vld [vmem:[%s4986_s26] sm:$0xf] }
  0x55   : > { %v3834_v7 = vld [vmem:[%s4986_s26 + $0x90] sm:$0xf]  ;;  %v3819_v8 = vor.u32 %v4523_v6, %v3818_v5  ;;  %v307_v11 = vld [vmem:[%s4986_s26 + $0x8] sm:$0xf]  ;;  %v323_v12 = vld [vmem:[%s4986_s26 + $0x4] sm:$0x1] }
  0x56   : > { %766 = vrot.lane.b32.xlu1 %v3827_v4, %s4861_s30  ;;  %v324_v13 = vld [vmem:[%s4986_s26 + $0xc] sm:$0x1]  ;;  %vm331_vm0 = vsmask.f32 3328  ;;  %vm332_vm1 = vsmask.f32 7440  ;;  %v3835_v17 = vor.u32 %v4527_v9, %v3834_v7 }
  0x57   : > { %762 = vrot.lane.b32.xlu0 %v3819_v8, %s4861_s30  ;;  %v335_v14 = vshrl.u32 %v306_v10, 16  ;;  %v338_v15 = vshll.u32 %v306_v10, 16  ;;  %v344_v16 = vshll.u32 %v323_v12, 16  ;;  %v349_v18 = vshrl.u32 %v307_v11, 16  ;;  %v3752_v21 = vld [vmem:[%s4986_s26 + $0x90] sm:$0xf]  ;;  %vm5009_vm2 = vmor %vm331_vm0, %vm332_vm1 }
  0x58   : > { %v352_v19 = vshll.u32 %v307_v11, 16  ;;  %v358_v20 = vshll.u32 %v324_v13, 16  ;;  %v3753_v25 = vld [vmem:[%s4986_s26 + $0x98] sm:$0xf]  ;;  %v473_v26 = vshrl.u32 %v3752_v21, 16  ;;  %v476_v31 = vshll.u32 %v3752_v21, 16 }
  0x59   : > { %v337_v22 = vrot.slane %v335_v14, 4  ;;  %v340_v23 = vrot.slane %v338_v15, 5  ;;  %v346_v24 = vrot.slane %v344_v16, 5  ;;  %v351_v27 = vrot.slane %v349_v18, 4  ;;  %v3768_v30 = vld [vmem:[%s4986_s26 + $0x94] sm:$0x1] }
  0x5a   : > { %v354_v28 = vrot.slane %v352_v19, 5  ;;  %v360_v29 = vrot.slane %v358_v20, 5  ;;  %v3769_v33 = vld [vmem:[%s4986_s26 + $0x9c] sm:$0x1]  ;;  %v475_v34 = vrot.slane %v473_v26, 4  ;;  %v482_v35 = vshll.u32 %v3768_v30, 16 }
  0x5b   : > { %v341_v32 = vor.u32 %v340_v23, %v337_v22  ;;  %v487_v36 = vshrl.u32 %v3753_v25, 16  ;;  %v478_v39 = vrot.slane %v476_v31, 5  ;;  %v490_v40 = vshll.u32 %v3753_v25, 16  ;;  %v3850_v49 = vld [vmem:[%s4986_s26 + $0xd8] sm:$0xf] }
  0x5c   : > { %v355_v38 = vor.u32 %v354_v28, %v351_v27  ;;  %v496_v41 = vshll.u32 %v3769_v33, 16  ;;  %v484_v43 = vrot.slane %v482_v35, 5  ;;  %v4531_v51 = vld [vmem:[%s4986_s26 + $0xdc] sm:$0xf0]  ;;  %v3756_v52 = vld [vmem:[%s4986_s26 + $0xb0] sm:$0xf] }
  0x5d   : > { %v342_v42 = vrot.slane %v341_v32, 4  ;;  %v489_v44 = vrot.slane %v487_v36, 4  ;;  %v479_v46 = vor.u32 %v478_v39, %v475_v34  ;;  %v492_v47 = vrot.slane %v490_v40, 5  ;;  %v3757_v53 = vld [vmem:[%s4986_s26 + $0xb8] sm:$0xf] }
  0x5e   : > { %810 = vrot.lane.b32.xlu1 %v3835_v17, %s4862_s8  ;;  %v356_v45 = vrot.slane %v355_v38, 4  ;;  %v498_v48 = vrot.slane %v496_v41, 5  ;;  %v3772_v58 = vld [vmem:[%s4986_s26 + $0xb4] sm:$0x1]  ;;  %v3851_v60 = vor.u32 %v4531_v51, %v3850_v49  ;;  %v529_v61 = vshrl.u32 %v3756_v52, 16 }
  0x5f   : > { %v347_v50 = vsel %vm5009_vm2, %v342_v42, %v346_v24  ;;  %v480_v56 = vrot.slane %v479_v46, 4  ;;  %v493_v57 = vor.u32 %v492_v47, %v489_v44  ;;  %v532_v62 = vshll.u32 %v3756_v52, 16  ;;  %v3842_v1 = vld [vmem:[%s4986_s26 + $0xb0] sm:$0xf]  ;;  %v3773_v2 = vld [vmem:[%s4986_s26 + $0xbc] sm:$0x1] }
  0x60   : > { %v361_v54 = vsel %vm5009_vm2, %v356_v45, %v360_v29  ;;  %v770_v55 = vunpack.c.l.b16 %v347_v50  ;;  %v538_v3 = vshll.u32 %v3772_v58, 16  ;;  %v543_v4 = vshrl.u32 %v3757_v53, 16  ;;  %838 = vrot.lane.b32.xlu2 %v3851_v60, %s4863_s9  ;;  %v310_v9 = vld [vmem:[%s4986_s26 + $0x20] sm:$0xf]  ;;  %v327_v10 = vld [vmem:[%s4986_s26 + $0x24] sm:$0x1] }
  0x61   : > { %v771_v59 = vunpack.c.l.b16 %v361_v54  ;;  %v485_v63 = vsel %vm5009_vm2, %v480_v56, %v484_v43  ;;  %v494_v0 = vrot.slane %v493_v57, 4  ;;  %v531_v7 = vrot.slane %v529_v61, 4  ;;  %v4529_v12 = vld [vmem:[%s4986_s26 + $0xb4] sm:$0xf0]  ;;  %v311_v15 = vld [vmem:[%s4986_s26 + $0x28] sm:$0xf] }
  0x62   : > { %v846_v6 = vunpack.c.l.b16 %v485_v63  ;;  %v534_v8 = vrot.slane %v532_v62, 5  ;;  %v545_v13 = vrot.slane %v543_v4, 4  ;;  %v546_v14 = vshll.u32 %v3757_v53, 16  ;;  %v328_v21 = vld [vmem:[%s4986_s26 + $0x2c] sm:$0x1] }
  0x63   : > { %v778_v5 = vpack.c.b16 %v771_v59, %v770_v55  ;;  %v499_v11 = vsel %vm5009_vm2, %v494_v0, %v498_v48  ;;  %v540_v18 = vrot.slane %v538_v3, 5  ;;  %v552_v19 = vshll.u32 %v3773_v2, 16  ;;  %v3776_v29 = vld [vmem:[%s4986_s26 + $0x8] sm:$0xf]  ;;  %v3792_v34 = vld [vmem:[%s4986_s26 + $0xc] sm:$0x1] }
  0x64   : > { %v847_v16 = vunpack.c.l.b16 %v499_v11  ;;  %v535_v17 = vor.u32 %v534_v8, %v531_v7  ;;  %v548_v20 = vrot.slane %v546_v14, 5  ;;  %v391_v22 = vshrl.u32 %v310_v9, 16  ;;  %v3777_v40 = vld [vmem:[%s4986_s26 + $0x10] sm:$0xf]  ;;  %v3793_v47 = vld [vmem:[%s4986_s26 + $0x14] sm:$0x1] }
  0x65   : > { %782 = vrot.lane.b32.xlu0 %v778_v5, %s4864_s10  ;;  %v394_v23 = vshll.u32 %v310_v9, 16  ;;  %v400_v24 = vshll.u32 %v327_v10, 16  ;;  %v3843_v26 = vor.u32 %v4529_v12, %v3842_v1  ;;  %v405_v28 = vshrl.u32 %v311_v15, 16  ;;  %v3866_v55 = vld [vmem:[%s4986_s26 + $0x8] sm:$0xf] }
  0x66   : > { %v854_v25 = vpack.c.b16 %v847_v16, %v846_v6  ;;  %v536_v27 = vrot.slane %v535_v17, 4  ;;  %v549_v30 = vor.u32 %v548_v20, %v545_v13  ;;  %v554_v31 = vrot.slane %v552_v19, 5  ;;  %v4535_v56 = vld [vmem:[%s4986_s26 + $0xc] sm:$0xf0]  ;;  %v3780_v0 = vld [vmem:[%s4986_s26 + $0x28] sm:$0xf] }
  0x67   : > { %v393_v32 = vrot.slane %v391_v22, 4  ;;  %v396_v33 = vrot.slane %v394_v23, 5  ;;  %v407_v36 = vrot.slane %v405_v28, 4  ;;  %v408_v38 = vshll.u32 %v311_v15, 16  ;;  %v3781_v5 = vld [vmem:[%s4986_s26 + $0x30] sm:$0xf] }
  0x68   : > { %858 = vrot.lane.b32.xlu1 %v854_v25, %s4865_s13  ;;  %v541_v35 = vsel %vm5009_vm2, %v536_v27, %v540_v18  ;;  %v414_v39 = vshll.u32 %v328_v21, 16  ;;  %v550_v41 = vrot.slane %v549_v30, 4  ;;  %v402_v43 = vrot.slane %v400_v24, 5  ;;  %v3796_v6 = vld [vmem:[%s4986_s26 + $0x2c] sm:$0x1] }
  0x69   : > { %v397_v42 = vor.u32 %v396_v33, %v393_v32  ;;  %v611_v44 = vshrl.u32 %v3776_v29, 16  ;;  %v850_v45 = vunpack.c.l.b16 %v541_v35  ;;  %v410_v46 = vrot.slane %v408_v38, 5  ;;  %v3797_v17 = vld [vmem:[%s4986_s26 + $0x34] sm:$0x1]  ;;  %v3874_v27 = vld [vmem:[%s4986_s26 + $0x28] sm:$0xf] }
  0x6a   : > { %v614_v48 = vshll.u32 %v3776_v29, 16  ;;  %v620_v49 = vshll.u32 %v3792_v34, 16  ;;  %v555_v50 = vsel %vm5009_vm2, %v550_v41, %v554_v31  ;;  %v625_v53 = vshrl.u32 %v3777_v40, 16  ;;  %v4537_v33 = vld [vmem:[%s4986_s26 + $0x2c] sm:$0xf0] }
  0x6b   : > { %v398_v51 = vrot.slane %v397_v42, 4  ;;  %v613_v52 = vrot.slane %v611_v44, 4  ;;  %v851_v54 = vunpack.c.l.b16 %v555_v50  ;;  %v411_v57 = vor.u32 %v410_v46, %v407_v36  ;;  %v3858_v35 = vld [vmem:[%s4986_s26 + $0xf8] sm:$0xf]  ;;  %v4533_v41 = vld [vmem:[%s4986_s26 + $0xfc] sm:$0xf0] }
  0x6c   : > { %v416_v58 = vrot.slane %v414_v39, 5  ;;  %v616_v59 = vrot.slane %v614_v48, 5  ;;  %v627_v61 = vrot.slane %v625_v53, 4  ;;  %v628_v62 = vshll.u32 %v3777_v40, 16  ;;  %v308_v42 = vld [vmem:[%s4986_s26 + $0x10] sm:$0xf] }
  0x6d   : > { %814 = vrot.lane.b32.xlu0 %v3843_v26, %s4862_s8  ;;  %v403_v60 = vsel %vm5009_vm2, %v398_v51, %v402_v43  ;;  %v634_v63 = vshll.u32 %v3793_v47, 16  ;;  %v856_v1 = vpack.c.b16 %v851_v54, %v850_v45  ;;  %v412_v2 = vrot.slane %v411_v57, 4  ;;  %v309_v43 = vld [vmem:[%s4986_s26 + $0x18] sm:$0xf]  ;;  %v1290_v37 = vld [vmem:[%s6381_s3] sm:$0xf] }
  0x6e   : > { %v617_v3 = vor.u32 %v616_v59, %v613_v52  ;;  %v622_v4 = vrot.slane %v620_v49, 5  ;;  %v3867_v7 = vor.u32 %v4535_v56, %v3866_v55  ;;  %v774_v8 = vunpack.c.l.b16 %v403_v60  ;;  %v3822_v51 = vld [vmem:[%s4986_s26 + $0x58] sm:$0xf]  ;;  %v4524_v52 = vld [vmem:[%s4986_s26 + $0x5c] sm:$0xf0] }
  0x6f   : > { %v630_v9 = vrot.slane %v628_v62, 5  ;;  %v636_v10 = vrot.slane %v634_v63, 5  ;;  %v417_v11 = vsel %vm5009_vm2, %v412_v2, %v416_v58  ;;  %v667_v13 = vshrl.u32 %v3780_v0, 16  ;;  %v325_v56 = vld [vmem:[%s4986_s26 + $0x14] sm:$0x1] }
  0x70   : > { %862 = vrot.lane.b32.xlu1 %v856_v1, %s4865_s13  ;;  %v618_v12 = vrot.slane %v617_v3, 4  ;;  %v670_v14 = vshll.u32 %v3780_v0, 16  ;;  %v775_v15 = vunpack.c.l.b16 %v417_v11  ;;  %v676_v18 = vshll.u32 %v3796_v6, 16  ;;  %v312_v59 = vld [vmem:[%s4986_s26 + $0x30] sm:$0xf] }
  0x71   : > { %v631_v16 = vor.u32 %v630_v9, %v627_v61  ;;  %v681_v19 = vshrl.u32 %v3781_v5, 16  ;;  %v669_v21 = vrot.slane %v667_v13, 4  ;;  %v684_v23 = vshll.u32 %v3781_v5, 16  ;;  %v326_v62 = vld [vmem:[%s4986_s26 + $0x1c] sm:$0x1] }
  0x72   : > { %v623_v20 = vsel %vm5009_vm2, %v618_v12, %v622_v4  ;;  %v672_v22 = vrot.slane %v670_v14, 5  ;;  %v780_v24 = vpack.c.b16 %v775_v15, %v774_v8  ;;  %v690_v31 = vshll.u32 %v3797_v17, 16  ;;  %v313_v1 = vld [vmem:[%s4986_s26 + $0x38] sm:$0xf]  ;;  %v3882_v3 = vld [vmem:[%s4986_s26 + $0x50] sm:$0xf] }
  0x73   : > { %v632_v25 = vrot.slane %v631_v16, 4  ;;  %v922_v26 = vunpack.c.l.b16 %v623_v20  ;;  %v683_v29 = vrot.slane %v681_v19, 4  ;;  %v686_v30 = vrot.slane %v684_v23, 5  ;;  %v4539_v4 = vld [vmem:[%s4986_s26 + $0x54] sm:$0xf0] }
  0x74   : > { %v673_v28 = vor.u32 %v672_v22, %v669_v21  ;;  %786 = vrot.lane.b32.xlu2 %v780_v24, %s4864_s10  ;;  %v678_v34 = vrot.slane %v676_v18, 5  ;;  %v692_v40 = vrot.slane %v690_v31, 5  ;;  %v3875_v45 = vor.u32 %v4537_v33, %v3874_v27  ;;  %v3838_v14 = vld [vmem:[%s4986_s26 + $0xa0] sm:$0xf]  ;;  %v329_v16 = vld [vmem:[%s4986_s26 + $0x34] sm:$0x1] }
  0x75   : > { %886 = vrot.lane.b32.xlu0 %v3867_v7, %s4866_s14  ;;  %v637_v32 = vsel %vm5009_vm2, %v632_v25, %v636_v10  ;;  %v687_v39 = vor.u32 %v686_v30, %v683_v29  ;;  %v3859_v48 = vor.u32 %v4533_v41, %v3858_v35  ;;  %v363_v49 = vshrl.u32 %v308_v42, 16  ;;  %v330_v19 = vld [vmem:[%s4986_s26 + $0x3c] sm:$0x1]  ;;  %v4528_v22 = vld [vmem:[%s4986_s26 + $0xa4] sm:$0xf0] }
  0x76   : > { %v923_v36 = vunpack.c.l.b16 %v637_v32  ;;  %v674_v38 = vrot.slane %v673_v28, 4  ;;  %v366_v50 = vshll.u32 %v308_v42, 16  ;;  %v377_v54 = vshrl.u32 %v309_v43, 16  ;;  %v3830_v27 = vld [vmem:[%s4986_s26 + $0x78] sm:$0xf] }
  0x77   : > { %v688_v46 = vrot.slane %v687_v39, 4  ;;  %v380_v55 = vshll.u32 %v309_v43, 16  ;;  %v365_v57 = vrot.slane %v363_v49, 4  ;;  %v3823_v2 = vor.u32 %v4524_v52, %v3822_v51  ;;  %v4526_v28 = vld [vmem:[%s4986_s26 + $0x7c] sm:$0xf0] }
  0x78   : > { %v930_v44 = vpack.c.b16 %v923_v36, %v922_v26  ;;  %v679_v47 = vsel %vm5009_vm2, %v674_v38, %v678_v34  ;;  %v368_v58 = vrot.slane %v366_v50, 5  ;;  %v379_v63 = vrot.slane %v377_v54, 4  ;;  %v3890_v29 = vld [vmem:[%s4986_s26 + $0x70] sm:$0xf]  ;;  %v4541_v30 = vld [vmem:[%s4986_s26 + $0x74] sm:$0xf0] }
  0x79   : > { %v693_v53 = vsel %vm5009_vm2, %v688_v46, %v692_v40  ;;  %v926_v60 = vunpack.c.l.b16 %v679_v47  ;;  %v382_v0 = vrot.slane %v380_v55, 5  ;;  %v372_v6 = vshll.u32 %v325_v56, 16  ;;  %v3754_v36 = vld [vmem:[%s4986_s26 + $0xa0] sm:$0xf]  ;;  %v3782_v40 = vld [vmem:[%s4986_s26 + $0x38] sm:$0xf] }
  0x7a   : > { %934 = vrot.lane.b32.xlu1 %v930_v44, %s4867_s15  ;;  %v927_v61 = vunpack.c.l.b16 %v693_v53  ;;  %v369_v5 = vor.u32 %v368_v58, %v365_v57  ;;  %v419_v7 = vshrl.u32 %v312_v59, 16  ;;  %v386_v9 = vshll.u32 %v326_v62, 16  ;;  %v3755_v43 = vld [vmem:[%s4986_s26 + $0xa8] sm:$0xf]  ;;  %v3846_v44 = vld [vmem:[%s4986_s26 + $0xc0] sm:$0xf] }
  0x7b   : > { %v383_v8 = vor.u32 %v382_v0, %v379_v63  ;;  %v422_v10 = vshll.u32 %v312_v59, 16  ;;  %v433_v11 = vshrl.u32 %v313_v1, 16  ;;  %v436_v13 = vshll.u32 %v313_v1, 16  ;;  %v3783_v49 = vld [vmem:[%s4986_s26 + $0x40] sm:$0xf] }
  0x7c   : > { %842 = vrot.lane.b32.xlu2 %v3859_v48, %s4863_s9  ;;  %v932_v12 = vpack.c.b16 %v927_v61, %v926_v60  ;;  %v3883_v15 = vor.u32 %v4539_v4, %v3882_v3  ;;  %v370_v17 = vrot.slane %v369_v5, 4  ;;  %v374_v18 = vrot.slane %v372_v6, 5  ;;  %v3854_v51 = vld [vmem:[%s4986_s26 + $0xe8] sm:$0xf]  ;;  %v4532_v56 = vld [vmem:[%s4986_s26 + $0xec] sm:$0xf0] }
  0x7d   : > { %890 = vrot.lane.b32.xlu0 %v3875_v45, %s4866_s14  ;;  %v421_v20 = vrot.slane %v419_v7, 4  ;;  %v424_v21 = vrot.slane %v422_v10, 5  ;;  %v384_v23 = vrot.slane %v383_v8, 4  ;;  %v388_v24 = vrot.slane %v386_v9, 5  ;;  %v4530_v45 = vld [vmem:[%s4986_s26 + $0xc4] sm:$0xf0] }
  0x7e   : > { %v435_v25 = vrot.slane %v433_v11, 4  ;;  %v438_v26 = vrot.slane %v436_v13, 5  ;;  %v428_v31 = vshll.u32 %v329_v16, 16  ;;  %v442_v32 = vshll.u32 %v330_v19, 16  ;;  %v3770_v63 = vld [vmem:[%s4986_s26 + $0xa4] sm:$0x1] }
  0x7f   : > { %v3839_v33 = vor.u32 %v4528_v22, %v3838_v14  ;;  %v375_v34 = vsel %vm5009_vm2, %v370_v17, %v374_v18  ;;  %v425_v35 = vor.u32 %v424_v21, %v421_v20  ;;  %v389_v38 = vsel %vm5009_vm2, %v384_v23, %v388_v24  ;;  %v3771_v0 = vld [vmem:[%s4986_s26 + $0xac] sm:$0x1]  ;;  %v3758_v8 = vld [vmem:[%s4986_s26 + $0xc0] sm:$0xf]  ;;  %v3798_v11 = vld [vmem:[%s4986_s26 + $0x3c] sm:$0x1] }
  0x80   : > { %v439_v39 = vor.u32 %v438_v26, %v435_v25  ;;  %v3831_v41 = vor.u32 %v4526_v28, %v3830_v27  ;;  %v3891_v42 = vor.u32 %v4541_v30, %v3890_v29  ;;  %v772_v46 = vunpack.c.l.b16 %v375_v34  ;;  %v3759_v14 = vld [vmem:[%s4986_s26 + $0xc8] sm:$0xf]  ;;  %v3870_v24 = vld [vmem:[%s4986_s26 + $0x18] sm:$0xf]  ;;  %v4536_v27 = vld [vmem:[%s4986_s26 + $0x1c] sm:$0xf0] }
  0x81   : > { %v430_v47 = vrot.slane %v428_v31, 5  ;;  %v444_v48 = vrot.slane %v442_v32, 5  ;;  %v501_v50 = vshrl.u32 %v3754_v36, 16  ;;  %v773_v52 = vunpack.c.l.b16 %v389_v38  ;;  %v3862_v28 = vld [vmem:[%s4986_s26 + $0x108] sm:$0xf] }
  0x82   : > { %764 = vrot.lane.b32.xlu1 %v3823_v2, %s4861_s30  ;;  %v426_v53 = vrot.slane %v425_v35, 4  ;;  %v695_v54 = vshrl.u32 %v3782_v40, 16  ;;  %v504_v55 = vshll.u32 %v3754_v36, 16  ;;  %v440_v57 = vrot.slane %v439_v39, 4  ;;  %v3774_v39 = vld [vmem:[%s4986_s26 + $0xc4] sm:$0x1] }
  0x83   : > { %v698_v58 = vshll.u32 %v3782_v40, 16  ;;  %v515_v59 = vshrl.u32 %v3755_v43, 16  ;;  %v518_v60 = vshll.u32 %v3755_v43, 16  ;;  %v709_v61 = vshrl.u32 %v3783_v49, 16 }
  0x84   : > { %914 = vrot.lane.b32.xlu2 %v3883_v15, %s4868_s16  ;;  %v712_v62 = vshll.u32 %v3783_v49, 16  ;;  %v503_v1 = vrot.slane %v501_v50, 4  ;;  %v506_v2 = vrot.slane %v504_v55, 5  ;;  %v3847_v5 = vor.u32 %v4530_v45, %v3846_v44  ;;  %v3799_v15 = vld [vmem:[%s4986_s26 + $0x44] sm:$0x1] }
  0x85   : > { %938 = vrot.lane.b32.xlu0 %v932_v12, %s4867_s15  ;;  %v517_v3 = vrot.slane %v515_v59, 4  ;;  %v520_v4 = vrot.slane %v518_v60, 5  ;;  %v3855_v6 = vor.u32 %v4532_v56, %v3854_v51  ;;  %v779_v7 = vpack.c.b16 %v773_v52, %v772_v46  ;;  %v3878_v50 = vld [vmem:[%s4986_s26 + $0x38] sm:$0xf]  ;;  %v4538_v55 = vld [vmem:[%s4986_s26 + $0x3c] sm:$0xf0] }
  0x86   : > { %v431_v9 = vsel %vm5009_vm2, %v426_v53, %v430_v47  ;;  %v445_v10 = vsel %vm5009_vm2, %v440_v57, %v444_v48  ;;  %v697_v12 = vrot.slane %v695_v54, 4  ;;  %v700_v13 = vrot.slane %v698_v58, 5  ;;  %v3778_v48 = vld [vmem:[%s4986_s26 + $0x18] sm:$0xf]  ;;  %v3779_v54 = vld [vmem:[%s4986_s26 + $0x20] sm:$0xf] }
  0x87   : > { %v711_v16 = vrot.slane %v709_v61, 4  ;;  %v714_v17 = vrot.slane %v712_v62, 5  ;;  %v510_v18 = vshll.u32 %v3770_v63, 16  ;;  %v524_v19 = vshll.u32 %v3771_v0, 16 }
  0x88   : > { %v507_v20 = vor.u32 %v506_v2, %v503_v1  ;;  %v521_v21 = vor.u32 %v520_v4, %v517_v3  ;;  %v557_v22 = vshrl.u32 %v3758_v8, 16  ;;  %v560_v23 = vshll.u32 %v3758_v8, 16 }
  0x89   : > { %v571_v25 = vshrl.u32 %v3759_v14, 16  ;;  %v574_v26 = vshll.u32 %v3759_v14, 16  ;;  %v776_v29 = vunpack.c.l.b16 %v431_v9  ;;  %v777_v30 = vunpack.c.l.b16 %v445_v10  ;;  %v4540_v10 = vld [vmem:[%s4986_s26 + $0x64] sm:$0xf0] }
  0x8a   : > { %812 = vrot.lane.b32.xlu1 %v3839_v33, %s4862_s8  ;;  %v704_v31 = vshll.u32 %v3798_v11, 16  ;;  %v718_v32 = vshll.u32 %v3799_v15, 16  ;;  %v4534_v33 = vld [vmem:[%s4986_s26 + $0x10c] sm:$0xf0]  ;;  %v701_v34 = vor.u32 %v700_v13, %v697_v12  ;;  %v715_v35 = vor.u32 %v714_v17, %v711_v16  ;;  %v3794_v16 = vld [vmem:[%s4986_s26 + $0x1c] sm:$0x1] }
  0x8b   : > { %v512_v36 = vrot.slane %v510_v18, 5  ;;  %v526_v38 = vrot.slane %v524_v19, 5  ;;  %v508_v40 = vrot.slane %v507_v20, 4  ;;  %v559_v43 = vrot.slane %v557_v22, 4  ;;  %v3795_v20 = vld [vmem:[%s4986_s26 + $0x24] sm:$0x1] }
  0x8c   : > { %918 = vrot.lane.b32.xlu2 %v3891_v42, %s4868_s16  ;;  %v3775_v42 = vld [vmem:[%s4986_s26 + $0xcc] sm:$0x1]  ;;  %v562_v44 = vrot.slane %v560_v23, 5  ;;  %v3871_v45 = vor.u32 %v4536_v27, %v3870_v24  ;;  %v573_v46 = vrot.slane %v571_v25, 4  ;;  %v576_v47 = vrot.slane %v574_v26, 5 }
  0x8d   : > { %768 = vrot.lane.b32.xlu0 %v3831_v41, %s4861_s30  ;;  %v522_v41 = vrot.slane %v521_v21, 4  ;;  %v3863_v49 = vor.u32 %v4534_v33, %v3862_v28  ;;  %v781_v51 = vpack.c.b16 %v777_v30, %v776_v29  ;;  %v706_v52 = vrot.slane %v704_v31, 5  ;;  %v3894_v31 = vld [vmem:[%s4986_s26 + $0x80] sm:$0xf] }
  0x8e   : > { %v720_v53 = vrot.slane %v718_v32, 5  ;;  %v702_v56 = vrot.slane %v701_v34, 4  ;;  %v716_v57 = vrot.slane %v715_v35, 4  ;;  %v566_v58 = vshll.u32 %v3774_v39, 16  ;;  %v4542_v32 = vld [vmem:[%s4986_s26 + $0x84] sm:$0xf0] }
  0x8f   : > { %v580_v59 = vshll.u32 %v3775_v42, 16  ;;  %v513_v60 = vsel %vm5009_vm2, %v508_v40, %v512_v36  ;;  %v527_v61 = vsel %vm5009_vm2, %v522_v41, %v526_v38  ;;  %v563_v62 = vor.u32 %v562_v44, %v559_v43 }
  0x90   : > { %v639_v63 = vshrl.u32 %v3778_v48, 16  ;;  %v577_v0 = vor.u32 %v576_v47, %v573_v46  ;;  %v642_v1 = vshll.u32 %v3778_v48, 16  ;;  %v653_v2 = vshrl.u32 %v3779_v54, 16  ;;  %v1026_v48 = vld [vmem:[%s6379_s1 + $0x20] sm:$0xf] }
  0x91   : > { %v656_v3 = vshll.u32 %v3779_v54, 16  ;;  %v3879_v4 = vor.u32 %v4538_v55, %v3878_v50  ;;  %v848_v8 = vunpack.c.l.b16 %v513_v60  ;;  %v568_v9 = vrot.slane %v566_v58, 5  ;;  %v4544_v58 = vld [vmem:[%s6379_s1 + $0x8] sm:$0xff] }
  0x92   : > { %816 = vrot.lane.b32.xlu1 %v3847_v5, %s4862_s8  ;;  %v3886_v5 = vld [vmem:[%s4986_s26 + $0x60] sm:$0xf]  ;;  %v849_v11 = vunpack.c.l.b16 %v527_v61  ;;  %v564_v12 = vrot.slane %v563_v62, 4  ;;  %v582_v13 = vrot.slane %v580_v59, 5  ;;  %v641_v14 = vrot.slane %v639_v63, 4 }
  0x93   : > { %v578_v15 = vrot.slane %v577_v0, 4  ;;  %v644_v17 = vrot.slane %v642_v1, 5  ;;  %v655_v18 = vrot.slane %v653_v2, 4  ;;  %v658_v19 = vrot.slane %v656_v3, 5  ;;  %v4543_v61 = vld [vmem:[%s6379_s1] sm:$0xff] }
  0x94   : > { %784 = vrot.lane.b32.xlu2 %v779_v7, %s4864_s10  ;;  %v721_v7 = vsel %vm5009_vm2, %v716_v57, %v720_v53  ;;  %v3887_v21 = vor.u32 %v4540_v10, %v3886_v5  ;;  %v855_v24 = vpack.c.b16 %v849_v11, %v848_v8  ;;  %v569_v25 = vsel %vm5009_vm2, %v564_v12, %v568_v9  ;;  %v4548_v53 = vld [vmem:[%s4986_s26 + $0xec] sm:$0xf0]  ;;  %v3967_v62 = vld [vmem:[%s4986_s26 + $0xf8] sm:$0xf]  ;;  %v4549_v63 = vld [vmem:[%s4986_s26 + $0xfc] sm:$0xf0] }
  0x95   : > { %840 = vrot.lane.b32.xlu0 %v3855_v6, %s4863_s9  ;;  %v707_v6 = vsel %vm5009_vm2, %v702_v56, %v706_v52  ;;  %v929_v23 = vunpack.c.l.b16 %v721_v7  ;;  %v648_v26 = vshll.u32 %v3794_v16, 16  ;;  %v583_v27 = vsel %vm5009_vm2, %v578_v15, %v582_v13  ;;  %v3963_v52 = vld [vmem:[%s4986_s26 + $0xe8] sm:$0xf]  ;;  %v4546_v56 = vld [vmem:[%s6379_s1 + $0x18] sm:$0xff]  ;;  %v4545_v57 = vld [vmem:[%s6379_s1 + $0x10] sm:$0xff] }
  0x96   : > { %v928_v22 = vunpack.c.l.b16 %v707_v6  ;;  %v645_v28 = vor.u32 %v644_v17, %v641_v14  ;;  %v659_v29 = vor.u32 %v658_v19, %v655_v18  ;;  %v662_v30 = vshll.u32 %v3795_v20, 16  ;;  %v4547_v5 = vld [vmem:[%s4986_s26 + $0xdc] sm:$0xf0]  ;;  %v3971_v9 = vld [vmem:[%s4986_s26 + $0x108] sm:$0xf] }
  0x97   : > { %v852_v34 = vunpack.c.l.b16 %v569_v25  ;;  %v853_v35 = vunpack.c.l.b16 %v583_v27  ;;  %v650_v38 = vrot.slane %v648_v26, 5  ;;  %v3895_v41 = vor.u32 %v4542_v32, %v3894_v31  ;;  %v4550_v10 = vld [vmem:[%s4986_s26 + $0x10c] sm:$0xf0]  ;;  %v3802_v11 = vld [vmem:[%s4986_s26] sm:$0xf] }
  0x98   : > { %v933_v33 = vpack.c.b16 %v929_v23, %v928_v22  ;;  %v646_v36 = vrot.slane %v645_v28, 4  ;;  %v660_v39 = vrot.slane %v659_v29, 4  ;;  %v664_v40 = vrot.slane %v662_v30, 5  ;;  %v4519_v12 = vld [vmem:[%s4986_s26 + $0x4] sm:$0xf0] }
  0x99   : > { %v857_v42 = vpack.c.b16 %v853_v35, %v852_v34  ;;  %vm1063_vm3 = vcmask 1043456   ;;  %v3964_v55 = vor.u32 %v4548_v53, %v3963_v52  ;;  %vm942_vm4 = vcmask 64512   ;;  %v4521_v22 = vld [vmem:[%s4986_s26 + $0x24] sm:$0xf0] }
  0x9a   : > { %888 = vrot.lane.b32.xlu1 %v3871_v45, %s4866_s14  ;;  %v651_v43 = vsel %vm5009_vm2, %v646_v36, %v650_v38  ;;  %v665_v44 = vsel %vm5009_vm2, %v660_v39, %v664_v40  ;;  %v1324_v50 = vsel %vm1063_vm3, %v1290_v37, 0  ;;  %v3968_v0 = vor.u32 %v4549_v63, %v3967_v62 }
  0x9b   : > { %v924_v45 = vunpack.c.l.b16 %v651_v43  ;;  %v925_v46 = vunpack.c.l.b16 %v665_v44  ;;  %4646 = vmatpush.bf16.msra.mxu3 %v1324_v50  ;;  %1333 = vmatpush.bf16.msra.mxu1 %v1324_v50  ;;  %v3972_v13 = vor.u32 %v4550_v10, %v3971_v9  ;;  %v3803_v15 = vor.u32 %v4519_v12, %v3802_v11  ;;  %v3806_v50 = vld [vmem:[%s4986_s26 + $0x10] sm:$0xf] }
  0x9c   : > { %788 = vrot.lane.b32.xlu2 %v781_v51, %s4864_s10  ;;  %vm955_vm5 = vcmask 130048   ;;  %vm964_vm6 = vcmask 195584   ;;  %vm973_vm7 = vcmask 261120   ;;  %vm982_vm8 = vcmask 326656  }
  0x9d   : > { %844 = vrot.lane.b32.xlu0 %v3863_v49, %s4863_s9  ;;  %v931_v47 = vpack.c.b16 %v925_v46, %v924_v45  ;;  %v1044_v49 = vunpack.c.l.b16 %v1026_v48  ;;  %vm991_vm9 = vcmask 392192   ;;  %vm1000_vm10 = vcmask 457728   ;;  %s3916_s9 = smul.u32 80, %s4841_s21 }
  0x9e   : > { %3974 = vmatmul.msk.bf16.vlgmr.msra.gmra.mxu3 %vm942_vm4, %v3964_v55  ;;  %vm1009_vm11 = vcmask 523264   ;;  %vm1054_vm12 = vcmask 588800   ;;  %vm1229_vm13 = vsmask.f32 7938  ;;  %vm1234_vm14 = vcmask 1040384  }
  0x9f   : > { %v1049_v51 = vpack.c.b16 %v1044_v49, %v1044_v49  ;;  %vm1235_vm15 = vsmask.f32 256  ;;  %vm5247_vm0 = vmand %vm1063_vm3, %vm1229_vm13  ;;  %s5251_s10 = scalar_lea.vmem [#allocation2], %s3916_s9 }
  0xa0   : > { %vm5254_vm1 = vmand %vm1234_vm14, %vm1235_vm15 }
  0xa1   : > { %v1065_v54 = vsel %vm1063_vm3, %v1049_v51, 0  ;;  %v4520_v51 = vld [vmem:[%s4986_s26 + $0x14] sm:$0xf0] }
  0xa2   : > { %892 = vrot.lane.b32.xlu1 %v3879_v4, %s4866_s14  ;;  %1070 = vmatpush.bf16.msra.mxu0 %v1065_v54  ;;  %v3959_v4 = vld [vmem:[%s4986_s26 + $0xd8] sm:$0xf]  ;;  %v3807_v53 = vor.u32 %v4520_v51, %v3806_v50 }
  0xa3   : > { %4641 = vmatpush.bf16.msra.mxu2 %v1065_v54  ;;  %v3960_v6 = vor.u32 %v4547_v5, %v3959_v4 }
  0xa4   : > { %860 = vrot.lane.b32.xlu2 %v855_v24, %s4865_s13 }
  0xa5   : > { %916 = vrot.lane.b32.xlu0 %v3887_v21, %s4868_s16  ;;  %3973 = vmatmul.msk.bf16.vlgmr.msra.gmra.mxu1 %vm942_vm4, %v3960_v6  ;;  %v3810_v21 = vld [vmem:[%s4986_s26 + $0x20] sm:$0xf] }
  0xa6   : > { %1071 = vmatpush.bf16.msra.mxu0 %v4546_v56  ;;  %v3811_v24 = vor.u32 %v4521_v22, %v3810_v21 }
  0xa7   : > { %4642 = vmatpush.bf16.msra.mxu2 %v4546_v56 }
  0xaa   : > { %940 = vrot.lane.b32.xlu1 %v933_v33, %s4867_s15  ;;  %1072 = vmatpush.bf16.msra.mxu0 %v4545_v57 }
  0xab   : > { %4643 = vmatpush.bf16.msra.mxu2 %v4545_v57  ;;  %v3814_v57 = vld [vmem:[%s4986_s26 + $0x30] sm:$0xf] }
  0xac   : > { %864 = vrot.lane.b32.xlu2 %v857_v42, %s4865_s13 }
  0xad   : > { %920 = vrot.lane.b32.xlu0 %v3895_v41, %s4868_s16 }
  0xae   : > { %1073 = vmatpush.bf16.msra.mxu0 %v4544_v58  ;;  %3975 = vmatmul.msk.bf16.gmra.mxu3 %vm942_vm4, %v3968_v0 }
  0xaf   : > { %4644 = vmatpush.bf16.msra.mxu2 %v4544_v58  ;;  %v4522_v58 = vld [vmem:[%s4986_s26 + $0x34] sm:$0xf0] }
  0xb0   : > { %v3815_v62 = vor.u32 %v4522_v58, %v3814_v57  ;;  %v3917_v57 = vld [vmem:[%s5251_s10 + $0x8] sm:$0xf] }
  0xb2   : > { %1074 = vmatpush.bf16.msra.mxu0 %v4543_v61 }
  0xb3   : > { %4645 = vmatpush.bf16.msra.mxu2 %v4543_v61 }
  0xb4   : > { %936 = vrot.lane.b32.xlu2 %v931_v47, %s4867_s15 }
  0xba   : > { %v839_v59 = vpop.permute.xlu2 %838 }
  0xbe   : > { %3976 = vmatmul.msk.bf16.gmra.mxu3 %vm942_vm4, %v3972_v13 }
  0xc8   : > { %v767_v60 = vpop.permute.xlu1 %766 }
  0xc9   : > { %v763_v1 = vpop.permute.xlu0 %762  ;;  %v951_v30 = vsel %vm942_vm4, %v3811_v24, %v767_v60 }
  0xca   : > { %v945_v18 = vsel %vm942_vm4, %v3803_v15, %v763_v1 }
  0xce   : > { %v787_v2 = vpop.permute.xlu2 %786 }
  0xcf   : > { %v961_v33 = vsel %vm955_vm5, %v951_v30, %v787_v2 }
  0xd0   : > { %v811_v3 = vpop.permute.xlu1 %810 }
  0xd6   : > { %v843_v8 = vpop.permute.xlu2 %842 }
  0xd7   : > { %v783_v7 = vpop.permute.xlu0 %782 }
  0xd8   : > { %v957_v19 = vsel %vm955_vm5, %v945_v18, %v783_v7 }
  0xd9   : > { %v966_v23 = vsel %vm964_vm6, %v957_v19, %v811_v3 }
  0xda   : > { %v859_v14 = vpop.permute.xlu1 %858  ;;  %v975_v26 = vsel %vm973_vm7, %v966_v23, %v839_v59 }
  0xdb   : > { %v984_v28 = vsel %vm982_vm8, %v975_v26, %v859_v14 }
  0xde   : > { %v915_v17 = vpop.permute.xlu2 %914 }
  0xdf   : > { %v815_v16 = vpop.permute.xlu0 %814 }
  0xe0   : > { %v970_v35 = vsel %vm964_vm6, %v961_v33, %v815_v16 }
  0xe1   : > { %v979_v39 = vsel %vm973_vm7, %v970_v35, %v843_v8 }
  0xe2   : > { %v863_v20 = vpop.permute.xlu1 %862 }
  0xe3   : > { %v988_v40 = vsel %vm982_vm8, %v979_v39, %v863_v20 }
  0xe6   : > { %v919_v27 = vpop.permute.xlu2 %918 }
  0xe7   : > { %v887_v25 = vpop.permute.xlu0 %886 }
  0xe8   : > { %v993_v29 = vsel %vm991_vm9, %v984_v28, %v887_v25 }
  0xe9   : > { %v1002_v31 = vsel %vm1000_vm10, %v993_v29, %v915_v17 }
  0xec   : > { %v935_v32 = vpop.permute.xlu1 %934 }
  0xed   : > { %v1011_v34 = vsel %vm1009_vm11, %v1002_v31, %v935_v32 }
  0xee   : > { %3912 = vmatmul.msk.bf16.vlgmr.msra.gmra.mxu0 %vm1054_vm12, %v1011_v34  ;;  %v785_v38 = vpop.permute.xlu2 %784 }
  0xef   : > { %v891_v36 = vpop.permute.xlu0 %890 }
  0xf0   : > { %v997_v41 = vsel %vm991_vm9, %v988_v40, %v891_v36 }
  0xf1   : > { %v1006_v43 = vsel %vm1000_vm10, %v997_v41, %v919_v27 }
  0xf4   : > { %v765_v42 = vpop.permute.xlu1 %764 }
  0xf5   : > { %v948_v56 = vsel %vm942_vm4, %v3807_v53, %v765_v42 }
  0xf6   : > { %v789_v46 = vpop.permute.xlu2 %788  ;;  %v959_v60 = vsel %vm955_vm5, %v948_v56, %v785_v38 }
  0xf7   : > { %v939_v44 = vpop.permute.xlu0 %938 }
  0xf8   : > { %v1015_v45 = vsel %vm1009_vm11, %v1006_v43, %v939_v44 }
  0xf9   : > { %3914 = vmatmul.msk.bf16.vlgmr.msra.gmra.mxu2 %vm1054_vm12, %v1015_v45 }
  0xfc   : > { %v813_v47 = vpop.permute.xlu1 %812 }
  0xfd   : > { %v968_v61 = vsel %vm964_vm6, %v959_v60, %v813_v47 }
  0xfe   : > { %v861_v49 = vpop.permute.xlu2 %860 }
  0xff   : > { %v769_v48 = vpop.permute.xlu0 %768 }
 0x100   : > { %v954_v0 = vsel %vm942_vm4, %v3815_v62, %v769_v48 }
 0x101   : > { %v963_v7 = vsel %vm955_vm5, %v954_v0, %v789_v46 }
 0x104   : > { %v817_v37 = vpop.permute.xlu1 %816 }
 0x105   : > { %v972_v9 = vsel %vm964_vm6, %v963_v7, %v817_v37  ;;  %v1355_v7 = vld [vmem:[#allocation3 + $0x2] sm:$0x1] }
 0x106   : > { %v865_v54 = vpop.permute.xlu2 %864 }
 0x107   : > { %v841_v52 = vpop.permute.xlu0 %840 }
 0x108   : > { %v977_v63 = vsel %vm973_vm7, %v968_v61, %v841_v52 }
 0x109   : > { %v986_v1 = vsel %vm982_vm8, %v977_v63, %v861_v49 }
 0x10c   : > { %v889_v55 = vpop.permute.xlu1 %888 }
 0x10d   : > { %v995_v4 = vsel %vm991_vm9, %v986_v1, %v889_v55 }
 0x10e   : > { %v937_v3 = vpop.permute.xlu2 %936 }
 0x10f   : > { %v845_v59 = vpop.permute.xlu0 %844 }
 0x110   : > { %v981_v10 = vsel %vm973_vm7, %v972_v9, %v845_v59  ;;  %v3919_v59 = vld [vmem:[%s5251_s10 + $0xc] sm:$0x1] }
 0x111   : > { %v990_v11 = vsel %vm982_vm8, %v981_v10, %v865_v54 }
 0x114   : > { %v893_v2 = vpop.permute.xlu1 %892 }
 0x115   : > { %v999_v13 = vsel %vm991_vm9, %v990_v11, %v893_v2  ;;  %v1371_v11 = vld [vmem:[#allocation3 + $0x3] sm:$0x1] }
 0x117   : > { %v917_v5 = vpop.permute.xlu0 %916 }
 0x118   : > { %v1004_v6 = vsel %vm1000_vm10, %v995_v4, %v917_v5 }
 0x119   : > { %v1013_v8 = vsel %vm1009_vm11, %v1004_v6, %v937_v3 }
 0x11a   : > { %3913 = vmatmul.msk.bf16.gmra.mxu0 %vm1054_vm12, %v1013_v8 }
 0x11c   : > { %v941_v12 = vpop.permute.xlu1 %940 }
 0x11f   : > { %v921_v14 = vpop.permute.xlu0 %920 }
 0x120   : > { %v1008_v15 = vsel %vm1000_vm10, %v999_v13, %v921_v14 }
 0x121   : > { %v1017_v16 = vsel %vm1009_vm11, %v1008_v15, %v941_v12  ;;  %v1340_v17 = vpop.f32.mrf.mxu3 }
 0x122   : > { %3915 = vmatmul.msk.bf16.gmra.mxu2 %vm1054_vm12, %v1017_v16  ;;  %v1335_v20 = vpop.f32.mrf.mxu1  ;;  %v1374_v23 = vmul.f32 %v1340_v17, %v1340_v17  ;;  %v3921_v16 = vld [vmem:[%s5251_s10 + $0x10] sm:$0xf] }
 0x123   : > { %v1372_v24 = vmul.f32 %v1335_v20, %v1335_v20 }
 0x129   : > { %v1342_v18 = vpop.f32.mrf.mxu3 }
 0x12a   : > { %v1337_v22 = vpop.f32.mrf.mxu1  ;;  %v1375_v27 = vmul.f32 %v1342_v18, %v1342_v18 }
 0x12b   : > { %v1356_v25 = vadd.f32 %v1337_v22, %v1335_v20  ;;  %v1373_v26 = vmul.f32 %v1337_v22, %v1337_v22 }
 0x12d   : > { %v1357_v28 = vadd.f32 %v1356_v25, %v1340_v17  ;;  %v1380_v29 = vadd.f32 %v1373_v26, %v1372_v24  ;;  %v3923_v17 = vld [vmem:[%s5251_s10 + $0x14] sm:$0x1] }
 0x12f   : > { %v1358_v32 = vadd.f32 %v1357_v28, %v1342_v18  ;;  %v1381_v33 = vadd.f32 %v1380_v29, %v1374_v23  ;;  %v3933_v28 = vld [vmem:[%s5251_s10 + $0x28] sm:$0xf]  ;;  %v3935_v29 = vld [vmem:[%s5251_s10 + $0x2c] sm:$0x1] }
 0x131   : > { %v1345_v19 = vpop.f32.mrf.mxu3  ;;  %v1382_v35 = vadd.f32 %v1381_v33, %v1375_v27 }
 0x132   : > { %v1376_v31 = vmul.f32 %v1345_v19, %v1345_v19  ;;  %v1359_v36 = vadd.f32 %v1358_v32, %v1345_v19 }
 0x134   : > { %v1383_v40 = vadd.f32 %v1382_v35, %v1376_v31 }
 0x139   : > { %v1347_v21 = vpop.f32.mrf.mxu3 }
 0x13a   : > { %v1377_v34 = vmul.f32 %v1347_v21, %v1347_v21  ;;  %v1360_v38 = vadd.f32 %v1359_v36, %v1347_v21 }
 0x13c   : > { %v1384_v42 = vadd.f32 %v1383_v40, %v1377_v34  ;;  %v3937_v40 = vld [vmem:[%s5251_s10 + $0x30] sm:$0xf] }
 0x141   : > { %v1350_v30 = vpop.f32.mrf.mxu3 }
 0x142   : > { %v1378_v39 = vmul.f32 %v1350_v30, %v1350_v30  ;;  %v1361_v41 = vadd.f32 %v1360_v38, %v1350_v30 }
 0x144   : > { %v1385_v44 = vadd.f32 %v1384_v42, %v1378_v39 }
 0x149   : > { %v1352_v43 = vpop.f32.mrf.mxu3 }
 0x14a   : > { %v1362_v45 = vadd.f32 %v1361_v41, %v1352_v43  ;;  %v1379_v46 = vmul.f32 %v1352_v43, %v1352_v43  ;;  %v3939_v41 = vld [vmem:[%s5251_s10 + $0x34] sm:$0x1] }
 0x14c   : > { %v1363_v49 = vrot.slane %v1362_v45, 4  ;;  %v1386_v37 = vadd.f32 %v1385_v44, %v1379_v46 }
 0x14e   : > { %v1364_v51 = vadd.f32 %v1363_v49, %v1362_v45  ;;  %v1387_v52 = vrot.slane %v1386_v37, 4 }
 0x150   : > { %v1365_v56 = vrot.slane %v1364_v51, 2  ;;  %v1388_v60 = vadd.f32 %v1387_v52, %v1386_v37 }
 0x152   : > { %v1366_v63 = vadd.f32 %v1365_v56, %v1364_v51  ;;  %v1389_v1 = vrot.slane %v1388_v60, 2 }
 0x154   : > { %v1367_v5 = vrot.slane %v1366_v63, 1  ;;  %v1390_v6 = vadd.f32 %v1389_v1, %v1388_v60 }
 0x156   : > { %v1368_v9 = vadd.f32 %v1367_v5, %v1366_v63  ;;  %v1391_v10 = vrot.slane %v1390_v6, 1 }
 0x158   : > { %v1369_v14 = vadd.f32 %v1368_v9, %v1355_v7  ;;  %v1392_v15 = vadd.f32 %v1391_v10, %v1390_v6 }
 0x15a   : > { %1370 = vst [vmem:[#allocation3 + $0x2] sm:$0x1] %v1369_v14  ;;  %v1393_v21 = vadd.f32 %v1392_v15, %v1371_v11  ;;  %v3931_v14 = vld [vmem:[%s5251_s10 + $0x24] sm:$0x1] }
 0x15c   : > { %1394 = vst [vmem:[#allocation3 + $0x3] sm:$0x1] %v1393_v21 }
 0x16b   : > { %v5242_v47 = vpop.f32.mrf.mxu0 }
 0x16c   : > { %v1136_v48 = vpack.c.bf16 %v5242_v47, %v5242_v47 }
 0x16e   : > { %v1145_v50 = vshrl.u32 %v1136_v48, 16  ;;  %v1148_v55 = vshll.u32 %v1136_v48, 16 }
 0x170   : > { %v1147_v54 = vrot.slane %v1145_v50, 7  ;;  %v1113_v50 = vmul.f32 %v5242_v47, %v5242_v47 }
 0x172   : > { %v1150_v61 = vor.u32 %v1148_v55, %v1147_v54  ;;  %v1151_v62 = vrot.slane %v1147_v54, 4 }
 0x173   : > { %v1078_v0 = vpop.f32.mrf.mxu0 }
 0x174   : > { %v1232_v2 = vsel %vm5247_vm0, %v1150_v61, %v3917_v57  ;;  %v1238_v3 = vsel %vm5254_vm1, %v1151_v62, %v3919_v59  ;;  %v1137_v4 = vpack.c.bf16 %v1078_v0, %v1078_v0  ;;  %v1114_v49 = vmul.f32 %v1078_v0, %v1078_v0  ;;  %v3925_v57 = vld [vmem:[%s5251_s10 + $0x18] sm:$0xf]  ;;  %v3927_v59 = vld [vmem:[%s5251_s10 + $0x1c] sm:$0x1] }
 0x175   : > { %3918 = vst [vmem:[%s5251_s10 + $0x8] sm:$0xf] %v1232_v2  ;;  %v1097_v52 = vadd.f32 %v1078_v0, %v5242_v47 }
 0x176   : > { %3920 = vst [vmem:[%s5251_s10 + $0xc] sm:$0x1] %v1238_v3  ;;  %v1153_v8 = vshrl.u32 %v1137_v4, 16  ;;  %v1156_v13 = vshll.u32 %v1137_v4, 16  ;;  %v1121_v56 = vadd.f32 %v1114_v49, %v1113_v50  ;;  %v3947_v50 = vld [vmem:[%s5251_s10 + $0x44] sm:$0x1] }
 0x178   : > { %v1155_v12 = vrot.slane %v1153_v8, 7 }
 0x17a   : > { %v1158_v18 = vor.u32 %v1156_v13, %v1155_v12  ;;  %v1159_v19 = vrot.slane %v1155_v12, 4  ;;  %v3929_v13 = vld [vmem:[%s5251_s10 + $0x20] sm:$0xf] }
 0x17c   : > { %v1086_v20 = vpop.f32.mrf.mxu2  ;;  %v1241_v23 = vsel %vm5247_vm0, %v1158_v18, %v3921_v16  ;;  %v1244_v24 = vsel %vm5254_vm1, %v1159_v19, %v3923_v17 }
 0x17d   : > { %v1140_v22 = vpack.c.bf16 %v1086_v20, %v1086_v20  ;;  %3922 = vst [vmem:[%s5251_s10 + $0x10] sm:$0xf] %v1241_v23  ;;  %v1117_v6 = vmul.f32 %v1086_v20, %v1086_v20 }
 0x17e   : > { %3924 = vst [vmem:[%s5251_s10 + $0x14] sm:$0x1] %v1244_v24 }
 0x17f   : > { %v1177_v25 = vshrl.u32 %v1140_v22, 16  ;;  %v1180_v27 = vshll.u32 %v1140_v22, 16 }
 0x181   : > { %v1179_v26 = vrot.slane %v1177_v25, 7 }
 0x183   : > { %v1182_v30 = vor.u32 %v1180_v27, %v1179_v26  ;;  %v1183_v31 = vrot.slane %v1179_v26, 4  ;;  %v3941_v27 = vld [vmem:[%s5251_s10 + $0x38] sm:$0xf] }
 0x184   : > { %v1088_v32 = vpop.f32.mrf.mxu2 }
 0x185   : > { %v1259_v33 = vsel %vm5247_vm0, %v1182_v30, %v3933_v28  ;;  %v1262_v34 = vsel %vm5254_vm1, %v1183_v31, %v3935_v29  ;;  %v1141_v35 = vpack.c.bf16 %v1088_v32, %v1088_v32  ;;  %v1118_v16 = vmul.f32 %v1088_v32, %v1088_v32  ;;  %v3943_v28 = vld [vmem:[%s5251_s10 + $0x3c] sm:$0x1] }
 0x186   : > { %3934 = vst [vmem:[%s5251_s10 + $0x28] sm:$0xf] %v1259_v33 }
 0x187   : > { %3936 = vst [vmem:[%s5251_s10 + $0x2c] sm:$0x1] %v1262_v34  ;;  %v1185_v36 = vshrl.u32 %v1141_v35, 16  ;;  %v1188_v39 = vshll.u32 %v1141_v35, 16 }
 0x189   : > { %v1187_v38 = vrot.slane %v1185_v36, 7 }
 0x18b   : > { %v1190_v42 = vor.u32 %v1188_v39, %v1187_v38  ;;  %v1191_v43 = vrot.slane %v1187_v38, 4 }
 0x18d   : > { %v1265_v44 = vsel %vm5247_vm0, %v1190_v42, %v3937_v40  ;;  %v1268_v45 = vsel %vm5254_vm1, %v1191_v43, %v3939_v41 }
 0x18e   : > { %3938 = vst [vmem:[%s5251_s10 + $0x30] sm:$0xf] %v1265_v44 }
 0x18f   : > { %3940 = vst [vmem:[%s5251_s10 + $0x34] sm:$0x1] %v1268_v45 }
 0x197   : > { %v1081_v46 = vpop.f32.mrf.mxu0 }
 0x198   : > { %v1138_v48 = vpack.c.bf16 %v1081_v46, %v1081_v46  ;;  %v1115_v51 = vmul.f32 %v1081_v46, %v1081_v46  ;;  %v1098_v60 = vadd.f32 %v1097_v52, %v1081_v46 }
 0x19a   : > { %v1161_v37 = vshrl.u32 %v1138_v48, 16  ;;  %v1164_v55 = vshll.u32 %v1138_v48, 16  ;;  %v1122_v63 = vadd.f32 %v1121_v56, %v1115_v51 }
 0x19c   : > { %v1163_v54 = vrot.slane %v1161_v37, 7  ;;  %v3945_v37 = vld [vmem:[%s5251_s10 + $0x40] sm:$0xf] }
 0x19e   : > { %v1166_v61 = vor.u32 %v1164_v55, %v1163_v54  ;;  %v1167_v62 = vrot.slane %v1163_v54, 4 }
 0x19f   : > { %v1083_v1 = vpop.f32.mrf.mxu0 }
 0x1a0   : > { %v1247_v2 = vsel %vm5247_vm0, %v1166_v61, %v3925_v57  ;;  %v1250_v3 = vsel %vm5254_vm1, %v1167_v62, %v3927_v59  ;;  %v1099_v47 = vadd.f32 %v1098_v60, %v1083_v1  ;;  %v1116_v0 = vmul.f32 %v1083_v1, %v1083_v1  ;;  %v1096_v61 = vld [vmem:[#allocation3] sm:$0x1] }
 0x1a1   : > { %3926 = vst [vmem:[%s5251_s10 + $0x18] sm:$0xf] %v1247_v2  ;;  %v1139_v4 = vpack.c.bf16 %v1083_v1, %v1083_v1  ;;  %v1112_v1 = vld [vmem:[#allocation3 + $0x1] sm:$0x1] }
 0x1a2   : > { %3928 = vst [vmem:[%s5251_s10 + $0x1c] sm:$0x1] %v1250_v3  ;;  %v1123_v5 = vadd.f32 %v1122_v63, %v1116_v0  ;;  %v1100_v8 = vadd.f32 %v1099_v47, %v1086_v20 }
 0x1a3   : > { %v1169_v7 = vshrl.u32 %v1139_v4, 16  ;;  %v1172_v11 = vshll.u32 %v1139_v4, 16 }
 0x1a4   : > { %v1124_v9 = vadd.f32 %v1123_v5, %v1117_v6  ;;  %v1101_v19 = vadd.f32 %v1100_v8, %v1088_v32 }
 0x1a5   : > { %v1171_v10 = vrot.slane %v1169_v7, 7  ;;  %v1091_v12 = vpop.f32.mrf.mxu2 }
 0x1a6   : > { %v1142_v15 = vpack.c.bf16 %v1091_v12, %v1091_v12  ;;  %v1119_v23 = vmul.f32 %v1091_v12, %v1091_v12  ;;  %v1125_v24 = vadd.f32 %v1124_v9, %v1118_v16  ;;  %v1102_v29 = vadd.f32 %v1101_v19, %v1091_v12 }
 0x1a7   : > { %v1174_v17 = vor.u32 %v1172_v11, %v1171_v10  ;;  %v1175_v18 = vrot.slane %v1171_v10, 4 }
 0x1a8   : > { %v1193_v21 = vshrl.u32 %v1142_v15, 16  ;;  %v1196_v26 = vshll.u32 %v1142_v15, 16  ;;  %v1126_v32 = vadd.f32 %v1125_v24, %v1119_v23 }
 0x1a9   : > { %v1253_v22 = vsel %vm5247_vm0, %v1174_v17, %v3929_v13  ;;  %v1256_v20 = vsel %vm5254_vm1, %v1175_v18, %v3931_v14 }
 0x1aa   : > { %3930 = vst [vmem:[%s5251_s10 + $0x20] sm:$0xf] %v1253_v22  ;;  %v1195_v25 = vrot.slane %v1193_v21, 7 }
 0x1ab   : > { %3932 = vst [vmem:[%s5251_s10 + $0x24] sm:$0x1] %v1256_v20 }
 0x1ac   : > { %v1198_v30 = vor.u32 %v1196_v26, %v1195_v25  ;;  %v1199_v31 = vrot.slane %v1195_v25, 4 }
 0x1ad   : > { %v1093_v33 = vpop.f32.mrf.mxu2 }
 0x1ae   : > { %v1271_v34 = vsel %vm5247_vm0, %v1198_v30, %v3941_v27  ;;  %v1274_v35 = vsel %vm5254_vm1, %v1199_v31, %v3943_v28  ;;  %v1103_v36 = vadd.f32 %v1102_v29, %v1093_v33  ;;  %v1120_v38 = vmul.f32 %v1093_v33, %v1093_v33 }
 0x1af   : > { %3942 = vst [vmem:[%s5251_s10 + $0x38] sm:$0xf] %v1271_v34  ;;  %v1143_v39 = vpack.c.bf16 %v1093_v33, %v1093_v33 }
 0x1b0   : > { %3944 = vst [vmem:[%s5251_s10 + $0x3c] sm:$0x1] %v1274_v35  ;;  %v1104_v40 = vrot.slane %v1103_v36, 4  ;;  %v1127_v41 = vadd.f32 %v1126_v32, %v1120_v38 }
 0x1b1   : > { %v1201_v42 = vshrl.u32 %v1143_v39, 16  ;;  %v1204_v46 = vshll.u32 %v1143_v39, 16 }
 0x1b2   : > { %v1105_v43 = vadd.f32 %v1104_v40, %v1103_v36  ;;  %v1128_v44 = vrot.slane %v1127_v41, 4 }
 0x1b3   : > { %v1203_v45 = vrot.slane %v1201_v42, 7 }
 0x1b4   : > { %v1106_v48 = vrot.slane %v1105_v43, 2  ;;  %v1129_v49 = vadd.f32 %v1128_v44, %v1127_v41 }
 0x1b5   : > { %v1206_v51 = vor.u32 %v1204_v46, %v1203_v45  ;;  %v1207_v52 = vrot.slane %v1203_v45, 4 }
 0x1b6   : > { %v1107_v54 = vadd.f32 %v1106_v48, %v1105_v43  ;;  %v1130_v55 = vrot.slane %v1129_v49, 2 }
 0x1b7   : > { %v1277_v56 = vsel %vm5247_vm0, %v1206_v51, %v3945_v37  ;;  %v1280_v57 = vsel %vm5254_vm1, %v1207_v52, %v3947_v50 }
 0x1b8   : > { %v1108_v59 = vrot.slane %v1107_v54, 1  ;;  %v1131_v60 = vadd.f32 %v1130_v55, %v1129_v49  ;;  %3946 = vst [vmem:[%s5251_s10 + $0x40] sm:$0xf] %v1277_v56 }
 0x1b9   : > { %3948 = vst [vmem:[%s5251_s10 + $0x44] sm:$0x1] %v1280_v57 }
 0x1ba   : > { %v1109_v62 = vadd.f32 %v1108_v59, %v1107_v54  ;;  %v1132_v63 = vrot.slane %v1131_v60, 1 }
 0x1bc   : > { %v1110_v2 = vadd.f32 %v1109_v62, %v1096_v61  ;;  %v1133_v3 = vadd.f32 %v1132_v63, %v1131_v60 }
 0x1be   : > { %1111 = vst [vmem:[#allocation3] sm:$0x1] %v1110_v2  ;;  %v1134_v47 = vadd.f32 %v1133_v3, %v1112_v1 }
 0x1c0   : > { %1135 = vst [vmem:[#allocation3 + $0x1] sm:$0x1] %v1134_v47 }
 0x1c1 PF: > { %p1396_p6 = pnand %p257_p2, %p244_p0 }
 0x1c3   : > { %1399 = sbr.rel (%p1396_p6) target bundleno = 492 (0x1ec), region = 52 }
 0x1c8   : > { %v1400_v53 = vld [vmem:[#allocation3] sm:$0x1]  ;;  %v1402_v58 = vld [vmem:[#allocation3 + $0x1] sm:$0x1] }
 0x1c9   : > { %v1401_v0 = vmul.f32 0.0078125, %v1400_v53  ;;  %v1403_v4 = vmul.f32 0.0078125, %v1402_v58  ;;  %v1407_v14 = vld [vmem:[%s6382_s4] sm:$0x1]  ;;  %v1420_v18 = vld [vmem:[%s6382_s4 + $0x1] sm:$0x1] }
 0x1cb   : > { %v1404_v5 = vmul.f32 %v1401_v0, %v1401_v0 }
 0x1cd   : > { %v1405_v6 = vsub.f32 %v1403_v4, %v1404_v5 }
 0x1cf   : > { %v1406_v7 = vmax.f32 %v1405_v6, 0.0 }
 0x1d1   : > { %v1408_v8 = vadd.f32 1e-05, %v1406_v7 }
 0x1d3   : > { %4750 = vrsqrt.f32 %v1408_v8  ;;  %vm1415_vm2 = vweird.f32 %v1408_v8 }
 0x1d9   : > { %v4751_v9 = vpop.eup %4750 }
 0x1da   : > { %v1410_v10 = vmul.f32 %v4751_v9, %v1408_v8  ;;  %vm1416_vm3 = vweird.f32 %v4751_v9 }
 0x1db   : > { %vm1417_vm4 = vmor %vm1415_vm2, %vm1416_vm3 }
 0x1dc   : > { %v1411_v11 = vmul.f32 %v4751_v9, %v1410_v10 }
 0x1de   : > { %v1412_v12 = vmul.f32 0.5, %v1411_v11 }
 0x1e0   : > { %v1413_v13 = vsub.f32 1.5, %v1412_v12 }
 0x1e2   : > { %v1414_v15 = vmul.f32 %v4751_v9, %v1413_v13 }
 0x1e4   : > { %v1418_v16 = vsel %vm1417_vm4, %v4751_v9, %v1414_v15 }
 0x1e5   : > { %v1419_v17 = vmul.f32 %v1418_v16, %v1407_v14 }
 0x1e7   : > { %1423 = vst [vmem:[#allocation3] sm:$0x1] %v1419_v17  ;;  %v1421_v19 = vmul.f32 %v1419_v17, %v1401_v0 }
 0x1e9   : > { %v1422_v21 = vsub.f32 %v1420_v18, %v1421_v19 }
 0x1eb   : > { %1424 = vst [vmem:[#allocation3 + $0x1] sm:$0x1] %v1422_v21 }
 0x1ec PF: > { %p3977_p9 = scmp.ne.s32.totalorder %s4845_s22, 1 }
 0x1ed   : > { %s3978_s8 = smul.u32 (!%p3977_p9), 80, %s4841_s21 }
 0x1ee   : > { %1427 = sbr.rel (%p3977_p9) target bundleno = 836 (0x344), region = 56 }
 0x1ef   : > { %s5357_s13 = scalar_lea.vmem (!%p3977_p9), [#allocation2], %s3978_s8 }
 0x1f3   : > { %v4571_v22 = vld [vmem:[%s6380_s2 + $0x38] sm:$0xff]  ;;  %v4570_v23 = vld [vmem:[%s6380_s2 + $0x30] sm:$0xff]  ;;  %v4569_v26 = vld [vmem:[%s6380_s2 + $0x28] sm:$0xff]  ;;  %vm1532_vm5 = vcmask 1043456   ;;  %vm1533_vm6 = vsmask.f32 7938 }
 0x1f4   : > { %v4587_v20 = vld [vmem:[%s6380_s2 + $0xb8] sm:$0xff]  ;;  %4647 = vmatpush.bf16.msra.mxu1 %v4571_v22  ;;  %2892 = vmatpush.bf16.msra.mxu0 %v4571_v22  ;;  %v4586_v24 = vld [vmem:[%s6380_s2 + $0xb0] sm:$0xff]  ;;  %v3985_v28 = vld [vmem:[%s5357_s13 + $0x20] sm:$0xf]  ;;  %vm1537_vm8 = vcmask 1040384   ;;  %vm1742_vm10 = vcmask 1042432  }
 0x1f5   : > { %2950 = vmatpush.bf16.msra.mxu2 %v4587_v20  ;;  %v4595_v25 = vld [vmem:[%s6380_s2 + $0xf8] sm:$0xff]  ;;  %v4594_v27 = vld [vmem:[%s6380_s2 + $0xf0] sm:$0xff]  ;;  %v3987_v29 = vld [vmem:[%s5357_s13 + $0x28] sm:$0xf]  ;;  %v1456_v31 = vunpack.c.l.bf16 %v3985_v28  ;;  %vm1538_vm9 = vsmask.f32 256 }
 0x1f6   : > { %2979 = vmatpush.bf16.msra.mxu3 %v4595_v25  ;;  %v4585_v30 = vld [vmem:[%s6380_s2 + $0xa8] sm:$0xff]  ;;  %v1458_v32 = vunpack.c.l.bf16 %v3987_v29  ;;  %v5364_v33 = vld [vmem:[#allocation3] ss:$0 sm:$0xff]  ;;  %v5366_v34 = vld [vmem:[#allocation3 + $0x1] ss:$0 sm:$0xff]  ;;  %vm1743_vm11 = vcmask 1046532  }
 0x1f7   : > { %v4593_v35 = vld [vmem:[%s6380_s2 + $0xe8] sm:$0xff]  ;;  %v1473_v36 = vmul.f32 %v5364_v33, %v1456_v31  ;;  %v4568_v39 = vld [vmem:[%s6380_s2 + $0x20] sm:$0xff]  ;;  %v4567_v46 = vld [vmem:[%s6380_s2 + $0x18] sm:$0xff]  ;;  %vm1603_vm14 = vsmask.f32 3328 }
 0x1f8   : > { %4648 = vmatpush.bf16.msra.mxu1 %v4570_v23  ;;  %2893 = vmatpush.bf16.msra.mxu0 %v4570_v23  ;;  %v1475_v38 = vmul.f32 %v5364_v33, %v1458_v32  ;;  %v5377_v40 = vld [vmem:[%s5357_s13 + $0x8] sm:$0xf]  ;;  %v4584_v41 = vld [vmem:[%s6380_s2 + $0xa0] sm:$0xff]  ;;  %v3980_v45 = vld [vmem:[%s5357_s13 + $0xc] sm:$0x1] }
 0x1f9   : > { %2951 = vmatpush.bf16.msra.mxu2 %v4586_v24  ;;  %v1490_v42 = vadd.f32 %v5366_v34, %v1473_v36  ;;  %v1450_v44 = vunpack.c.l.bf16 %v5377_v40  ;;  %v4592_v37 = vld [vmem:[%s6380_s2 + $0xe0] sm:$0xff]  ;;  %v1451_v51 = vunpack.c.l.bf16 %v3980_v45  ;;  %vm5394_vm7 = vmand %vm1532_vm5, %vm1533_vm6  ;;  %v4010_v55 = vld [vmem:[%s5357_s13 + $0x28] sm:$0xf]  ;;  %vm1604_vm15 = vsmask.f32 7440 }
 0x1fa   : > { %2980 = vmatpush.bf16.msra.mxu3 %v4594_v27  ;;  %v1492_v43 = vadd.f32 %v5366_v34, %v1475_v38  ;;  %v4006_v54 = vld [vmem:[%s5357_s13 + $0x20] sm:$0xf]  ;;  %v4583_v56 = vld [vmem:[%s6380_s2 + $0x98] sm:$0xff]  ;;  %v3989_v62 = vld [vmem:[%s5357_s13 + $0x30] sm:$0xf] }
 0x1fb   : > { %v1506_v48 = vmax.f32 %v1490_v42, 0.0  ;;  %v1467_v50 = vmul.f32 %v5364_v33, %v1450_v44  ;;  %v1468_v61 = vmul.f32 %v5364_v33, %v1451_v51  ;;  %v3991_v63 = vld [vmem:[%s5357_s13 + $0x38] sm:$0xf]  ;;  %v1460_v1 = vunpack.c.l.bf16 %v3989_v62  ;;  %v4566_v2 = vld [vmem:[%s6380_s2 + $0x10] sm:$0xff]  ;;  %v1718_v4 = vld [vmem:[%s5357_s13] sm:$0xe] }
 0x1fc   : > { %4649 = vmatpush.bf16.msra.mxu1 %v4569_v26  ;;  %2894 = vmatpush.bf16.msra.mxu0 %v4569_v26  ;;  %v1508_v49 = vmax.f32 %v1492_v43, 0.0  ;;  %v4591_v58 = vld [vmem:[%s6380_s2 + $0xd8] sm:$0xff]  ;;  %v5421_v5 = vld [vmem:[%s5357_s13 + $0x4] sm:$0x1]  ;;  %v1462_v6 = vunpack.c.l.bf16 %v3991_v63  ;;  %v3981_v8 = vld [vmem:[%s5357_s13 + $0x10] sm:$0xf] }
 0x1fd   : > { %2952 = vmatpush.bf16.msra.mxu2 %v4585_v30  ;;  %v1522_v57 = vpack.c.bf16 %v1506_v48, %v1506_v48  ;;  %v1484_v60 = vadd.f32 %v5366_v34, %v1467_v50  ;;  %v1485_v0 = vadd.f32 %v5366_v34, %v1468_v61  ;;  %v1477_v7 = vmul.f32 %v5364_v33, %v1460_v1  ;;  %v4582_v9 = vld [vmem:[%s6380_s2 + $0x90] sm:$0xff]  ;;  %v3983_v12 = vld [vmem:[%s5357_s13 + $0x18] sm:$0xf]  ;;  %vm5432_vm12 = vmand %vm1537_vm8, %vm1538_vm9 }
 0x1fe   : > { %2981 = vmatpush.bf16.msra.mxu3 %v4593_v35  ;;  %v1524_v59 = vpack.c.bf16 %v1508_v49, %v1508_v49  ;;  %v1452_v13 = vunpack.c.l.bf16 %v3981_v8  ;;  %v3996_v15 = vld [vmem:[%s5357_s13 + $0xc] sm:$0x1]  ;;  %v4027_v16 = vrot.slane %v1718_v4, 9  ;;  %v1479_v17 = vmul.f32 %v5364_v33, %v1462_v6  ;;  %v4590_v23 = vld [vmem:[%s6380_s2 + $0xd0] sm:$0xff]  ;;  %v3984_v26 = vld [vmem:[%s5357_s13 + $0x1c] sm:$0x1] }
 0x1ff   : > { %v1556_v3 = vsel %vm5394_vm7, %v1522_v57, %v4006_v54  ;;  %v1500_v53 = vmax.f32 %v1484_v60, 0.0  ;;  %v1501_v11 = vmax.f32 %v1485_v0, 0.0  ;;  %v1494_v18 = vadd.f32 %v5366_v34, %v1477_v7  ;;  %v3982_v25 = vld [vmem:[%s5357_s13 + $0x14] sm:$0x1]  ;;  %v4565_v27 = vld [vmem:[%s6380_s2 + $0x8] sm:$0xff]  ;;  %vm5455_vm13 = vmor %vm1742_vm10, %vm1743_vm11 }
 0x200   : > { %4650 = vmatpush.bf16.msra.mxu1 %v4568_v39  ;;  %2895 = vmatpush.bf16.msra.mxu0 %v4568_v39  ;;  %v1562_v47 = vsel %vm5394_vm7, %v1524_v59, %v4010_v55  ;;  %4007 = vst [vmem:[%s5357_s13 + $0x20] sm:$0xf] %v1556_v3  ;;  %v1454_v19 = vunpack.c.l.bf16 %v3983_v12  ;;  %v1747_v20 = vrot.slane %v5421_v5, 5  ;;  %v1469_v24 = vmul.f32 %v5364_v33, %v1452_v13  ;;  %v4581_v35 = vld [vmem:[%s6380_s2 + $0x88] sm:$0xff]  ;;  %v4014_v39 = vld [vmem:[%s5357_s13 + $0x30] sm:$0xf]  ;;  %vm5600_vm0 = vmor %vm1603_vm14, %vm1604_vm15 }
 0x201   : > { %2953 = vmatpush.bf16.msra.mxu2 %v4584_v41  ;;  %4011 = vst [vmem:[%s5357_s13 + $0x28] sm:$0xf] %v1562_v47  ;;  %v1516_v10 = vpack.c.bf16 %v1500_v53, %v1500_v53  ;;  %v1517_v22 = vpack.c.bf16 %v1501_v11, %v1501_v11  ;;  %v1496_v29 = vadd.f32 %v5366_v34, %v1479_v17  ;;  %v1510_v30 = vmax.f32 %v1494_v18, 0.0  ;;  %v4564_v43 = vld [vmem:[%s6380_s2] sm:$0xff]  ;;  %v4589_v44 = vld [vmem:[%s6380_s2 + $0xc8] sm:$0xff]  ;;  %v4579_v54 = vld [vmem:[%s6380_s2 + $0x78] sm:$0xff] }
 0x202   : > { %2982 = vmatpush.bf16.msra.mxu3 %v4592_v37  ;;  %v1471_v31 = vmul.f32 %v5364_v33, %v1454_v19  ;;  %v1453_v32 = vunpack.c.l.bf16 %v3982_v25  ;;  %v1616_v38 = vshll.u32 %v5421_v5, 16  ;;  %v1486_v41 = vadd.f32 %v5366_v34, %v1469_v24  ;;  %v3998_v49 = vld [vmem:[%s5357_s13 + $0x10] sm:$0xf]  ;;  %v5481_v50 = vld [vmem:[%s5357_s13] sm:$0xf]  ;;  %v4619_v8 = vld [vmem:[%s6380_s2 + $0x1b8] sm:$0xff] }
 0x203   : > { %v1535_v21 = vsel %vm5394_vm7, %v1516_v10, %v5377_v40  ;;  %v1541_v36 = vsel %vm5432_vm12, %v1517_v22, %v3996_v15  ;;  %v4018_v40 = vld [vmem:[%s5357_s13 + $0x38] sm:$0xf]  ;;  %v1455_v42 = vunpack.c.l.bf16 %v3984_v26  ;;  %v1512_v45 = vmax.f32 %v1496_v29, 0.0  ;;  %v5490_v55 = vld [vmem:[%s5357_s13] sm:$0xf]  ;;  %v4578_v15 = vld [vmem:[%s6380_s2 + $0x70] sm:$0xff] }
 0x204   : > { %4651 = vmatpush.bf16.msra.mxu1 %v4567_v46  ;;  %2896 = vmatpush.bf16.msra.mxu0 %v4567_v46  ;;  %3995 = vst [vmem:[%s5357_s13 + $0x8] sm:$0xf] %v1535_v21  ;;  %v1526_v46 = vpack.c.bf16 %v1510_v30, %v1510_v30  ;;  %v1488_v48 = vadd.f32 %v5366_v34, %v1471_v31  ;;  %v1502_v57 = vmax.f32 %v1486_v41, 0.0  ;;  %v4002_v59 = vld [vmem:[%s5357_s13 + $0x18] sm:$0xf]  ;;  %v1607_v61 = vshrl.u32 %v5481_v50, 16 }
 0x205   : > { %2954 = vmatpush.bf16.msra.mxu2 %v4583_v56  ;;  %3997 = vst [vmem:[%s5357_s13 + $0xc] sm:$0x1] %v1541_v36  ;;  %v1470_v37 = vmul.f32 %v5364_v33, %v1453_v32  ;;  %v5494_v56 = vsel %vm5455_vm13, %v4027_v16, %v1747_v20  ;;  %v1472_v60 = vmul.f32 %v5364_v33, %v1455_v42  ;;  %v4580_v63 = vld [vmem:[%s6380_s2 + $0x80] sm:$0xff]  ;;  %v1610_v6 = vshll.u32 %v5481_v50, 16  ;;  %v4000_v11 = vld [vmem:[%s5357_s13 + $0x14] sm:$0x1] }
 0x206   : > { %2983 = vmatpush.bf16.msra.mxu3 %v4591_v58  ;;  %v1528_v1 = vpack.c.bf16 %v1512_v45, %v1512_v45  ;;  %v1504_v3 = vmax.f32 %v1488_v48, 0.0  ;;  %v3986_v53 = vld [vmem:[%s5357_s13 + $0x24] sm:$0x1]  ;;  %v4603_v58 = vld [vmem:[%s6380_s2 + $0x138] sm:$0xff]  ;;  %v1518_v0 = vpack.c.bf16 %v1502_v57, %v1502_v57  ;;  %v3988_v12 = vld [vmem:[%s5357_s13 + $0x2c] sm:$0x1]  ;;  %v2188_v30 = vunpack.c.l.b16 %v5494_v56 }
 0x207   : > { %v5484_v51 = vld [vmem:[%s5357_s13 + $0x20] sm:$0xf]  ;;  %v1487_v47 = vadd.f32 %v5366_v34, %v1470_v37  ;;  %v1489_v4 = vadd.f32 %v5366_v34, %v1472_v60  ;;  %v4004_v19 = vld [vmem:[%s5357_s13 + $0x1c] sm:$0x1]  ;;  %v1457_v21 = vunpack.c.l.bf16 %v3986_v53  ;;  %v1459_v22 = vunpack.c.l.bf16 %v3988_v12  ;;  %v4618_v41 = vld [vmem:[%s6380_s2 + $0x1b0] sm:$0xff] }
 0x208   : > { %4652 = vmatpush.bf16.msra.mxu1 %v4566_v2  ;;  %2897 = vmatpush.bf16.msra.mxu0 %v4566_v2  ;;  %v4554_v62 = vld [vmem:[%s5357_s13 + $0x24] sm:$0xf0]  ;;  %v1568_v2 = vsel %vm5394_vm7, %v1526_v46, %v4014_v39  ;;  %v1574_v7 = vsel %vm5394_vm7, %v1528_v1, %v4018_v40  ;;  %v1544_v18 = vsel %vm5394_vm7, %v1518_v0, %v3998_v49  ;;  %v4588_v24 = vld [vmem:[%s6380_s2 + $0xc0] sm:$0xff]  ;;  %v4602_v39 = vld [vmem:[%s6380_s2 + $0x130] sm:$0xff]  ;;  %v1609_v42 = vrot.slane %v1607_v61, 4 }
 0x209   : > { %2955 = vmatpush.bf16.msra.mxu2 %v4582_v9  ;;  %4015 = vst [vmem:[%s5357_s13 + $0x30] sm:$0xf] %v1568_v2  ;;  %v1520_v9 = vpack.c.bf16 %v1504_v3, %v1504_v3  ;;  %v1503_v10 = vmax.f32 %v1487_v47, 0.0  ;;  %v4111_v13 = vor.u32 %v4554_v62, %v5484_v51  ;;  %v1505_v26 = vmax.f32 %v1489_v4, 0.0  ;;  %v4601_v51 = vld [vmem:[%s6380_s2 + $0x128] sm:$0xff]  ;;  %v4626_v2 = vld [vmem:[%s6380_s2 + $0x1f0] sm:$0xff] }
 0x20a   : > { %2984 = vmatpush.bf16.msra.mxu3 %v4590_v23  ;;  %4019 = vst [vmem:[%s5357_s13 + $0x38] sm:$0xf] %v1574_v7  ;;  %v1476_v37 = vmul.f32 %v5364_v33, %v1459_v22  ;;  %v5568_v56 = vrot.slane %v1616_v38, 5  ;;  %v4576_v47 = vld [vmem:[%s6380_s2 + $0x60] sm:$0xff] }
 0x20b   : > { %v4552_v16 = vld [vmem:[%s5357_s13 + $0x4] sm:$0xf0]  ;;  %3999 = vst [vmem:[%s5357_s13 + $0x10] sm:$0xf] %v1544_v18  ;;  %v1550_v25 = vsel %vm5394_vm7, %v1520_v9, %v4002_v59  ;;  %v1519_v31 = vpack.c.bf16 %v1503_v10, %v1503_v10  ;;  %v1521_v40 = vpack.c.bf16 %v1505_v26, %v1505_v26  ;;  %v4600_v18 = vld [vmem:[%s6380_s2 + $0x120] sm:$0xff] }
 0x20c   : > { %4653 = vmatpush.bf16.msra.mxu1 %v4565_v27  ;;  %2898 = vmatpush.bf16.msra.mxu0 %v4565_v27  ;;  %v1719_v17 = vld [vmem:[%s5357_s13 + $0x8] sm:$0xe]  ;;  %v4103_v20 = vor.u32 %v4552_v16, %v5490_v55  ;;  %v4627_v27 = vld [vmem:[%s6380_s2 + $0x1f8] sm:$0xff]  ;;  %v1596_v29 = vld [vmem:[%s5357_s13 + $0xc] sm:$0x1] }
 0x20d   : > { %2956 = vmatpush.bf16.msra.mxu2 %v4581_v35  ;;  %v4028_v23 = vrot.slane %v1719_v17, 9  ;;  %4003 = vst [vmem:[%s5357_s13 + $0x18] sm:$0xf] %v1550_v25  ;;  %v1588_v32 = vld [vmem:[%s5357_s13 + $0x8] sm:$0xf]  ;;  %v1474_v35 = vmul.f32 %v5364_v33, %v1457_v21  ;;  %v1751_v36 = vrot.slane %v1596_v29, 5  ;;  %v1547_v46 = vsel %vm5432_vm12, %v1519_v31, %v4000_v11 }
 0x20e   : > { %2985 = vmatpush.bf16.msra.mxu3 %v4589_v44  ;;  %v4577_v44 = vld [vmem:[%s6380_s2 + $0x68] sm:$0xff]  ;;  %v1621_v48 = vshrl.u32 %v1588_v32, 16  ;;  %v1624_v49 = vshll.u32 %v1588_v32, 16  ;;  %4001 = vst [vmem:[%s5357_s13 + $0x14] sm:$0x1] %v1547_v46  ;;  %v1630_v62 = vshll.u32 %v1596_v29, 16  ;;  %v1493_v17 = vadd.f32 %v5366_v34, %v1476_v37 }
 0x20f   : > { %v4118_v45 = vld [vmem:[%s5357_s13 + $0x8] sm:$0xf]  ;;  %v1752_v50 = vsel %vm5455_vm13, %v4028_v23, %v1751_v36  ;;  %v5592_v0 = vld [vmem:[%s5357_s13 + $0xc] sm:$0x1]  ;;  %v1491_v16 = vadd.f32 %v5366_v34, %v1474_v35 }
 0x210   : > { %4654 = vmatpush.bf16.msra.mxu1 %v4564_v43  ;;  %2899 = vmatpush.bf16.msra.mxu0 %v4564_v43  ;;  %v1612_v43 = vrot.slane %v1610_v6, 5  ;;  %v4035_v57 = vld [vmem:[%s5357_s13 + $0x8] sm:$0xf]  ;;  %v2189_v59 = vunpack.c.l.b16 %v1752_v50  ;;  %v1623_v60 = vrot.slane %v1621_v48, 4  ;;  %v1626_v61 = vrot.slane %v1624_v49, 5 }
 0x211   : > { %2957 = vmatpush.bf16.msra.mxu2 %v4580_v63  ;;  %v4617_v63 = vld [vmem:[%s6380_s2 + $0x1a8] sm:$0xff]  ;;  %v5576_v5 = vld [vmem:[%s5357_s13 + $0x30] sm:$0xf]  ;;  %v5579_v38 = vld [vmem:[%s5357_s13 + $0x34] sm:$0xf0]  ;;  %v1794_v10 = vshrl.u32 %v4035_v57, 16 }
 0x212   : > { %2986 = vmatpush.bf16.msra.mxu3 %v4588_v24  ;;  %v1613_v55 = vor.u32 %v1612_v43, %v1609_v42  ;;  %v2196_v3 = vpack.c.b16 %v2189_v59, %v2188_v30  ;;  %v4556_v53 = vld [vmem:[%s5357_s13 + $0xc] sm:$0xf0]  ;;  %v1627_v9 = vor.u32 %v1626_v61, %v1623_v60  ;;  %v1797_v22 = vshll.u32 %v4035_v57, 16  ;;  %v4625_v50 = vld [vmem:[%s6380_s2 + $0x1e8] sm:$0xff]  ;;  %v4008_v57 = vld [vmem:[%s5357_s13 + $0x24] sm:$0x1] }
 0x213   : > { %2910 = vmatmul.bf16.vlgmr.msra.gmra.mxu1 %v4111_v13  ;;  %2900 = vmatmul.bf16.vlgmr.msra.gmra.mxu0 %v4103_v20  ;;  %v5595_v4 = vld [vmem:[%s5357_s13 + $0x10] sm:$0xf]  ;;  %v4119_v6 = vor.u32 %v4556_v53, %v4118_v45  ;;  %v5607_v13 = vrot.slane %v1630_v62, 5  ;;  %v1796_v21 = vrot.slane %v1794_v10, 4  ;;  %v1803_v20 = vshll.u32 %v5592_v0, 16  ;;  %v4599_v45 = vld [vmem:[%s6380_s2 + $0x118] sm:$0xff] }
 0x214   : > { %2921 = vmatpush.bf16.msrb.mxu1 %v4579_v54  ;;  %3008 = vmatpush.bf16.msrb.mxu0 %v4603_v58  ;;  %v1553_v54 = vsel %vm5432_vm12, %v1521_v40, %v4004_v19  ;;  %v5581_v1 = vrot.slane %v1613_v55, 4  ;;  %v1720_v58 = vld [vmem:[%s5357_s13 + $0x10] sm:$0xe]  ;;  %v1721_v7 = vld [vmem:[%s5357_s13 + $0x18] sm:$0xe]  ;;  %v4115_v23 = vor.u32 %v5579_v38, %v5576_v5  ;;  %v5634_v35 = vrot.slane %v1627_v9, 4 }
 0x215   : > { %3066 = vmatpush.bf16.msrb.mxu2 %v4619_v8  ;;  %4005 = vst [vmem:[%s5357_s13 + $0x1c] sm:$0x1] %v1553_v54  ;;  %v5605_v11 = vld [vmem:[%s5357_s13 + $0x14] sm:$0xf0]  ;;  %v4029_v12 = vrot.slane %v1720_v58, 9  ;;  %2987 = vmatmul.bf16.vlgmr.msra.gmra.mxu3 %v4119_v6  ;;  %v4030_v19 = vrot.slane %v1721_v7, 9 }
 0x216   : > { %3095 = vmatpush.bf16.msrb.mxu3 %v4627_v27  ;;  %2958 = vmatmul.bf16.vlgmr.msra.gmra.mxu2 %v2196_v3  ;;  %v5619_v24 = vld [vmem:[%s5357_s13 + $0x14] sm:$0x1]  ;;  %v1619_v25 = vsel %vm5600_vm0, %v5581_v1, %v5568_v56  ;;  %v4107_v30 = vor.u32 %v5605_v11, %v5595_v4  ;;  %v1799_v36 = vrot.slane %v1797_v22, 5  ;;  %v4575_v40 = vld [vmem:[%s6380_s2 + $0x58] sm:$0xff]  ;;  %v5649_v49 = vrot.slane %v1803_v20, 5 }
 0x217   : > { %v5626_v26 = vld [vmem:[%s5357_s13 + $0x14] sm:$0x1]  ;;  %v1755_v32 = vrot.slane %v5619_v24, 5  ;;  %v1507_v37 = vmax.f32 %v1491_v16, 0.0  ;;  %v1589_v59 = vld [vmem:[%s5357_s13 + $0x10] sm:$0xf]  ;;  %v1633_v58 = vsel %vm5600_vm0, %v5634_v35, %v5607_v13  ;;  %v5673_v4 = vunpack.c.l.b16 %v1619_v25 }
 0x218   : > { %2922 = vmatpush.bf16.msrb.mxu1 %v4578_v15  ;;  %3009 = vmatpush.bf16.msrb.mxu0 %v4602_v39  ;;  %v4036_v15 = vld [vmem:[%s5357_s13 + $0x10] sm:$0xf]  ;;  %v4616_v39 = vld [vmem:[%s6380_s2 + $0x1a0] sm:$0xff]  ;;  %v1800_v48 = vor.u32 %v1799_v36, %v1796_v21  ;;  %v1509_v5 = vmax.f32 %v1493_v17, 0.0  ;;  %v4012_v3 = vld [vmem:[%s5357_s13 + $0x2c] sm:$0x1]  ;;  %v5704_v36 = vunpack.c.l.b16 %v1633_v58 }
 0x219   : > { %3067 = vmatpush.bf16.msrb.mxu2 %v4618_v41  ;;  %v1808_v27 = vshrl.u32 %v4036_v15, 16  ;;  %v1811_v29 = vshll.u32 %v4036_v15, 16  ;;  %v1756_v46 = vsel %vm5455_vm13, %v4029_v12, %v1755_v32  ;;  %v4574_v60 = vld [vmem:[%s6380_s2 + $0x50] sm:$0xff]  ;;  %v1523_v38 = vpack.c.bf16 %v1507_v37, %v1507_v37  ;;  %v5665_v1 = vld [vmem:[%s5357_s13 + $0x20] sm:$0xe]  ;;  %v4573_v12 = vld [vmem:[%s6380_s2 + $0x48] sm:$0xff] }
 0x21a   : > { %3096 = vmatpush.bf16.msrb.mxu3 %v4626_v2  ;;  %v2190_v54 = vunpack.c.l.b16 %v1756_v46  ;;  %v4598_v62 = vld [vmem:[%s6380_s2 + $0x110] sm:$0xff]  ;;  %v1635_v53 = vshrl.u32 %v1589_v59, 16  ;;  %v4122_v6 = vld [vmem:[%s5357_s13 + $0x18] sm:$0xf]  ;;  %v4557_v7 = vld [vmem:[%s5357_s13 + $0x1c] sm:$0xf0]  ;;  %v1525_v9 = vpack.c.bf16 %v1509_v5, %v1509_v5 }
 0x21b   : > { %v1810_v42 = vrot.slane %v1808_v27, 4  ;;  %v1813_v43 = vrot.slane %v1811_v29, 5  ;;  %v1559_v10 = vsel %vm5432_vm12, %v1523_v38, %v4008_v57  ;;  %v4037_v11 = vld [vmem:[%s5357_s13 + $0x18] sm:$0xf]  ;;  %v4031_v13 = vrot.slane %v5665_v1, 9  ;;  %v4624_v27 = vld [vmem:[%s6380_s2 + $0x1e0] sm:$0xff] }
 0x21c   : > { %2923 = vmatpush.bf16.msrb.mxu1 %v4577_v44  ;;  %3010 = vmatpush.bf16.msrb.mxu0 %v4601_v51  ;;  %v5631_v31 = vld [vmem:[%s5357_s13 + $0x1c] sm:$0x1]  ;;  %v1817_v44 = vshll.u32 %v5626_v26, 16  ;;  %4009 = vst [vmem:[%s5357_s13 + $0x24] sm:$0x1] %v1559_v10  ;;  %v1637_v16 = vrot.slane %v1635_v53, 4  ;;  %v1565_v20 = vsel %vm5432_vm12, %v1525_v9, %v4012_v3 }
 0x21d   : > { %3068 = vmatpush.bf16.msrb.mxu2 %v4617_v63  ;;  %v1759_v41 = vrot.slane %v5631_v31, 5  ;;  %v1814_v55 = vor.u32 %v1813_v43, %v1810_v42  ;;  %v1801_v63 = vrot.slane %v1800_v48, 4  ;;  %v1638_v17 = vshll.u32 %v1589_v59, 16  ;;  %v4038_v25 = vld [vmem:[%s5357_s13 + $0x20] sm:$0xf]  ;;  %v4623_v10 = vld [vmem:[%s6380_s2 + $0x1d8] sm:$0xff] }
 0x21e   : > { %v1819_v56 = vrot.slane %v1817_v44, 5  ;;  %3097 = vmatpush.bf16.msrb.mxu3 %v4625_v50  ;;  %4013 = vst [vmem:[%s5357_s13 + $0x2c] sm:$0x1] %v1565_v20  ;;  %v1822_v35 = vshrl.u32 %v4037_v11, 16  ;;  %v1825_v42 = vshll.u32 %v4037_v11, 16  ;;  %v4572_v44 = vld [vmem:[%s6380_s2 + $0x40] sm:$0xff]  ;;  %v2180_v11 = vpack.c.b16 %v5704_v36, %v5673_v4 }
 0x21f   : > { %v1760_v51 = vsel %vm5455_vm13, %v4030_v19, %v1759_v41  ;;  %v1815_v2 = vrot.slane %v1814_v55, 4  ;;  %v4597_v19 = vld [vmem:[%s6380_s2 + $0x108] sm:$0xff]  ;;  %v1806_v21 = vsel %vm5600_vm0, %v1801_v63, %v5649_v49  ;;  %v1640_v29 = vrot.slane %v1638_v17, 5  ;;  %v5707_v41 = vld [vmem:[%s5357_s13 + $0x1c] sm:$0x1]  ;;  %v4596_v57 = vld [vmem:[%s6380_s2 + $0x100] sm:$0xff] }
 0x220   : > { %2924 = vmatpush.bf16.msrb.mxu1 %v4576_v47  ;;  %3011 = vmatpush.bf16.msrb.mxu0 %v4600_v18  ;;  %v2191_v61 = vunpack.c.l.b16 %v1760_v51  ;;  %v1590_v47 = vld [vmem:[%s5357_s13 + $0x18] sm:$0xf]  ;;  %v3990_v43 = vld [vmem:[%s5357_s13 + $0x34] sm:$0x1]  ;;  %v1723_v46 = vld [vmem:[%s5357_s13 + $0x28] sm:$0xe] }
 0x221   : > { %3069 = vmatpush.bf16.msrb.mxu2 %v4616_v39  ;;  %v4615_v18 = vld [vmem:[%s6380_s2 + $0x198] sm:$0xff]  ;;  %v1820_v22 = vsel %vm5600_vm0, %v1815_v2, %v1819_v56  ;;  %v1652_v32 = vshll.u32 %v1590_v47, 16  ;;  %v4123_v39 = vor.u32 %v4557_v7, %v4122_v6  ;;  %v1641_v48 = vor.u32 %v1640_v29, %v1637_v16  ;;  %v5762_v4 = vld [vmem:[%s5357_s13 + $0x28] sm:$0xf]  ;;  %v4610_v1 = vld [vmem:[%s6380_s2 + $0x170] sm:$0xff] }
 0x222   : > { %v2197_v15 = vpack.c.b16 %v2191_v61, %v2190_v54  ;;  %3098 = vmatpush.bf16.msrb.mxu3 %v4624_v27  ;;  %v1658_v37 = vshll.u32 %v5631_v31, 16  ;;  %v1824_v50 = vrot.slane %v1822_v35, 4  ;;  %v1827_v51 = vrot.slane %v1825_v42, 5  ;;  %v3992_v55 = vld [vmem:[%s5357_s13 + $0x3c] sm:$0x1] }
 0x223   : > { %2915 = vmatmul.bf16.gmra.mxu1 %v4115_v23  ;;  %2905 = vmatmul.bf16.gmra.mxu0 %v4107_v30  ;;  %v1649_v23 = vshrl.u32 %v1590_v47, 16  ;;  %v1644_v30 = vshll.u32 %v5619_v24, 16  ;;  %v5715_v24 = vunpack.c.l.b16 %v1820_v22  ;;  %v1654_v49 = vrot.slane %v1652_v32, 5  ;;  %v4611_v56 = vld [vmem:[%s6380_s2 + $0x178] sm:$0xff]  ;;  %v5731_v63 = vld [vmem:[%s5357_s13 + $0x24] sm:$0x1] }
 0x224   : > { %2925 = vmatpush.bf16.msrb.mxu1 %v4575_v40  ;;  %3012 = vmatpush.bf16.msrb.mxu0 %v4599_v45  ;;  %v5713_v45 = vunpack.c.l.b16 %v1806_v21  ;;  %v1836_v54 = vshrl.u32 %v4038_v25, 16  ;;  %v1839_v31 = vshll.u32 %v4038_v25, 16  ;;  %v1461_v61 = vunpack.c.l.bf16 %v3990_v43  ;;  %v5734_v2 = vld [vmem:[%s5357_s13 + $0x24] sm:$0x1]  ;;  %v5740_v6 = vld [vmem:[%s6380_s2 + $0x238] sm:$0xff]  ;;  %v5781_v43 = vld [vmem:[%s6380_s2 + $0x230] sm:$0xff] }
 0x225   : > { %3070 = vmatpush.bf16.msrb.mxu2 %v4615_v18  ;;  %v1651_v40 = vrot.slane %v1649_v23, 4  ;;  %v1646_v59 = vrot.slane %v1644_v30, 5  ;;  %2992 = vmatmul.bf16.gmra.mxu3 %v4123_v39  ;;  %v1642_v5 = vrot.slane %v1641_v48, 4  ;;  %v1828_v3 = vor.u32 %v1827_v51, %v1824_v50  ;;  %v5765_v22 = vld [vmem:[%s5357_s13 + $0x2c] sm:$0xf0]  ;;  %v4609_v50 = vld [vmem:[%s6380_s2 + $0x168] sm:$0xff] }
 0x226   : > { %2963 = vmatmul.bf16.gmra.mxu2 %v2197_v15  ;;  %v1838_v47 = vrot.slane %v1836_v54, 4  ;;  %v1763_v53 = vrot.slane %v5731_v63, 5  ;;  %v4032_v58 = vrot.slane %v1723_v46, 9  ;;  %v1841_v7 = vrot.slane %v1839_v31, 5  ;;  %v5750_v15 = vld [vmem:[%s5357_s13 + $0x2c] sm:$0x1]  ;;  %3099 = vmatpush.bf16.msrb.mxu3 %v4623_v10 }
 0x227   : > { %v1655_v38 = vor.u32 %v1654_v49, %v1651_v40  ;;  %v1463_v9 = vunpack.c.l.bf16 %v3992_v55  ;;  %v1845_v16 = vshll.u32 %v5734_v2, 16  ;;  %v1478_v17 = vmul.f32 %v5364_v33, %v1461_v61  ;;  %v1591_v29 = vld [vmem:[%s5357_s13 + $0x20] sm:$0xf]  ;;  %v4016_v48 = vld [vmem:[%s5357_s13 + $0x34] sm:$0x1] }
 0x228   : > { %2926 = vmatpush.bf16.msrb.mxu1 %v4574_v60  ;;  %3013 = vmatpush.bf16.msrb.mxu0 %v4598_v62  ;;  %v1831_v60 = vshll.u32 %v5707_v41, 16  ;;  %v4614_v62 = vld [vmem:[%s6380_s2 + $0x190] sm:$0xff]  ;;  %v1764_v18 = vsel %vm5455_vm13, %v4031_v13, %v1763_v53  ;;  %v5759_v21 = vrot.slane %v1658_v37, 5  ;;  %v1842_v20 = vor.u32 %v1841_v7, %v1838_v47  ;;  %v4020_v55 = vld [vmem:[%s5357_s13 + $0x3c] sm:$0x1]  ;;  %v4612_v7 = vld [vmem:[%s6380_s2 + $0x180] sm:$0xff] }
 0x229   : > { %3071 = vmatpush.bf16.msrb.mxu2 %v4614_v62  ;;  %v1647_v13 = vsel %vm5600_vm0, %v1642_v5, %v1646_v59  ;;  %v1656_v23 = vrot.slane %v1655_v38, 4  ;;  %v1829_v25 = vrot.slane %v1828_v3, 4  ;;  %v1847_v35 = vrot.slane %v1845_v16, 5  ;;  %v3993_v59 = vld [vmem:[%s5357_s13 + $0x40] sm:$0xf] }
 0x22a   : > { %v1833_v27 = vrot.slane %v1831_v60, 5  ;;  %v1843_v32 = vrot.slane %v1842_v20, 4  ;;  %v1480_v36 = vmul.f32 %v5364_v33, %v1463_v9  ;;  %v2192_v39 = vunpack.c.l.b16 %v1764_v18  ;;  %v4039_v5 = vld [vmem:[%s5357_s13 + $0x28] sm:$0xf]  ;;  %v4622_v9 = vld [vmem:[%s6380_s2 + $0x1d0] sm:$0xff]  ;;  %v4608_v18 = vld [vmem:[%s6380_s2 + $0x160] sm:$0xff] }
 0x22b   : > { %v1495_v42 = vadd.f32 %v5366_v34, %v1478_v17  ;;  %v1663_v49 = vshrl.u32 %v1591_v29, 16  ;;  %v1661_v37 = vsel %vm5600_vm0, %v1656_v23, %v5759_v21  ;;  %v1686_v16 = vshll.u32 %v5750_v15, 16  ;;  %3100 = vmatpush.bf16.msrb.mxu3 %v4622_v9 }
 0x22c   : > { %2927 = vmatpush.bf16.msrb.mxu1 %v4573_v12  ;;  %3014 = vmatpush.bf16.msrb.mxu0 %v4597_v19  ;;  %v2236_v12 = vpack.c.b16 %v5715_v24, %v5713_v45  ;;  %v1767_v19 = vrot.slane %v5750_v15, 5  ;;  %v5784_v45 = vunpack.c.l.b16 %v1647_v13  ;;  %v4127_v24 = vor.u32 %v5765_v22, %v5762_v4  ;;  %v4040_v22 = vld [vmem:[%s5357_s13 + $0x30] sm:$0xf] }
 0x22d   : > { %v1497_v46 = vadd.f32 %v5366_v34, %v1480_v36  ;;  %v1834_v51 = vsel %vm5600_vm0, %v1829_v25, %v1833_v27  ;;  %v1511_v54 = vmax.f32 %v1495_v42, 0.0  ;;  %v1848_v60 = vsel %vm5600_vm0, %v1843_v32, %v1847_v35  ;;  %v1724_v25 = vld [vmem:[%s5357_s13 + $0x30] sm:$0xe]  ;;  %v5838_v27 = vld [vmem:[%s5357_s13 + $0x38] sm:$0xe]  ;;  %v5848_v42 = vld [vmem:[%s6380_s2 + $0x220] sm:$0xff] }
 0x22e   : > { %v1768_v30 = vsel %vm5455_vm13, %v4032_v58, %v1767_v19  ;;  %v1665_v61 = vrot.slane %v1663_v49, 4  ;;  %v5810_v58 = vld [vmem:[%s6380_s2 + $0x228] sm:$0xff]  ;;  %v1464_v4 = vunpack.c.l.bf16 %v3993_v59  ;;  %v1850_v20 = vshrl.u32 %v4039_v5, 16 }
 0x22f   : > { %v2193_v40 = vunpack.c.l.b16 %v1768_v30  ;;  %v1513_v31 = vmax.f32 %v1497_v46, 0.0  ;;  %v1527_v3 = vpack.c.bf16 %v1511_v54, %v1511_v54  ;;  %v5831_v13 = vunpack.c.l.b16 %v1834_v51  ;;  %v5843_v32 = vld [vmem:[%s5357_s13 + $0x2c] sm:$0x1]  ;;  %v1593_v51 = vld [vmem:[%s5357_s13 + $0x30] sm:$0xf] }
 0x230   : > { %2928 = vmatpush.bf16.msrb.mxu1 %v4572_v44  ;;  %3015 = vmatpush.bf16.msrb.mxu0 %v4596_v57  ;;  %v1592_v44 = vld [vmem:[%s5357_s13 + $0x28] sm:$0xf]  ;;  %v5833_v23 = vunpack.c.l.b16 %v1848_v60  ;;  %v1481_v30 = vmul.f32 %v5364_v33, %v1464_v4  ;;  %v1852_v35 = vrot.slane %v1850_v20, 4  ;;  %v1688_v49 = vrot.slane %v1686_v16, 5  ;;  %v4022_v60 = vld [vmem:[%s5357_s13 + $0x40] sm:$0xf] }
 0x231   : > { %v4613_v57 = vld [vmem:[%s6380_s2 + $0x188] sm:$0xff]  ;;  %v1677_v62 = vshrl.u32 %v1592_v44, 16  ;;  %v2198_v38 = vpack.c.b16 %v2193_v40, %v2192_v39  ;;  %v1680_v53 = vshll.u32 %v1592_v44, 16  ;;  %v1529_v10 = vpack.c.bf16 %v1513_v31, %v1513_v31 }
 0x232   : > { %3072 = vmatpush.bf16.msrb.mxu2 %v4613_v57  ;;  %v1571_v17 = vsel %vm5432_vm12, %v1527_v3, %v4016_v48  ;;  %v1864_v39 = vshrl.u32 %v4040_v22, 16  ;;  %v1867_v40 = vshll.u32 %v4040_v22, 16  ;;  %v4621_v44 = vld [vmem:[%s6380_s2 + $0x1c8] sm:$0xff]  ;;  %v4033_v31 = vrot.slane %v1724_v25, 9  ;;  %v4041_v22 = vld [vmem:[%s5357_s13 + $0x38] sm:$0xf] }
 0x233   : > { %2929 = vmatmul.bf16.vlgmr.msrb.gmra.mxu1 %v2180_v11  ;;  %3016 = vmatmul.bf16.vlgmr.msrb.gmra.mxu0 %v2236_v12  ;;  %v1672_v11 = vshll.u32 %v5731_v63, 16  ;;  %v1679_v12 = vrot.slane %v1677_v62, 4  ;;  %v1682_v21 = vrot.slane %v1680_v53, 5  ;;  %v5826_v63 = vunpack.c.l.b16 %v1661_v37  ;;  %4017 = vst [vmem:[%s5357_s13 + $0x34] sm:$0x1] %v1571_v17  ;;  %v4607_v37 = vld [vmem:[%s6380_s2 + $0x158] sm:$0xff] }
 0x234   : > { %3037 = vmatpush.bf16.msra.mxu1 %v4611_v56  ;;  %3124 = vmatpush.bf16.msra.mxu0 %v5740_v6  ;;  %v1666_v56 = vshll.u32 %v1591_v29, 16  ;;  %v1577_v15 = vsel %vm5432_vm12, %v1529_v10, %v4020_v55  ;;  %v1859_v55 = vshll.u32 %v5843_v32, 16  ;;  %v2237_v3 = vpack.c.b16 %v5833_v23, %v5831_v13 }
 0x235   : > { %4021 = vst [vmem:[%s5357_s13 + $0x3c] sm:$0x1] %v1577_v15  ;;  %v1683_v29 = vor.u32 %v1682_v21, %v1679_v12  ;;  %2997 = vmatmul.bf16.gmra.mxu3 %v4127_v24  ;;  %v1674_v48 = vrot.slane %v1672_v11, 5  ;;  %v1869_v24 = vrot.slane %v1867_v40, 5  ;;  %v2181_v57 = vpack.c.b16 %v5826_v63, %v5784_v45  ;;  %v4620_v40 = vld [vmem:[%s6380_s2 + $0x1c0] sm:$0xff] }
 0x236   : > { %v1668_v47 = vrot.slane %v1666_v56, 5  ;;  %3073 = vmatpush.bf16.msrb.mxu2 %v4612_v7  ;;  %v1866_v56 = vrot.slane %v1864_v39, 4  ;;  %3101 = vmatpush.bf16.msrb.mxu3 %v4621_v44  ;;  %v4606_v7 = vld [vmem:[%s6380_s2 + $0x150] sm:$0xff]  ;;  %v1694_v9 = vshll.u32 %v1593_v51, 16  ;;  %v1861_v17 = vrot.slane %v1859_v55, 5  ;;  %v4631_v39 = vld [vmem:[%s6380_s2 + $0x218] sm:$0xff] }
 0x237   : > { %2968 = vmatmul.bf16.gmra.mxu2 %v2198_v38  ;;  %v1684_v54 = vrot.slane %v1683_v29, 4  ;;  %v1691_v38 = vshrl.u32 %v1593_v51, 16 }
 0x238   : > { %3038 = vmatpush.bf16.msra.mxu1 %v4610_v1  ;;  %3125 = vmatpush.bf16.msra.mxu0 %v5781_v43  ;;  %v1669_v19 = vor.u32 %v1668_v47, %v1665_v61  ;;  %v1853_v1 = vshll.u32 %v4039_v5, 16  ;;  %v4034_v61 = vrot.slane %v5838_v27, 9  ;;  %v1594_v5 = vld [vmem:[%s5357_s13 + $0x38] sm:$0xf]  ;;  %v1870_v53 = vor.u32 %v1869_v24, %v1866_v56 }
 0x239   : > { %v1689_v16 = vsel %vm5600_vm0, %v1684_v54, %v1688_v49  ;;  %v1693_v20 = vrot.slane %v1691_v38, 4  ;;  %v1696_v25 = vrot.slane %v1694_v9, 5  ;;  %v1878_v49 = vshrl.u32 %v4041_v22, 16  ;;  %v4130_v54 = vld [vmem:[%s5357_s13 + $0x38] sm:$0xf] }
 0x23a   : > { %v1855_v36 = vrot.slane %v1853_v1, 5  ;;  %v1670_v46 = vrot.slane %v1669_v19, 4  ;;  %4655 = vmatpush.bf16.msra.mxu2 %v5740_v6  ;;  %v1601_v47 = vld [vmem:[%s5357_s13 + $0x34] sm:$0x1]  ;;  %v1705_v1 = vshrl.u32 %v1594_v5, 16  ;;  %v1871_v23 = vrot.slane %v1870_v53, 4  ;;  %3102 = vmatpush.bf16.msrb.mxu3 %v4620_v40 }
 0x23b   : > { %v5871_v45 = vld [vmem:[%s5357_s13 + $0x34] sm:$0x1]  ;;  %v1771_v11 = vrot.slane %v1601_v47, 5  ;;  %v1697_v55 = vor.u32 %v1696_v25, %v1693_v20 }
 0x23c   : > { %3039 = vmatpush.bf16.msra.mxu1 %v4609_v50  ;;  %3126 = vmatpush.bf16.msra.mxu0 %v5810_v58  ;;  %v1498_v50 = vadd.f32 %v5366_v34, %v1481_v30  ;;  %v3994_v34 = vld [vmem:[%s5357_s13 + $0x44] sm:$0x1]  ;;  %v1856_v62 = vor.u32 %v1855_v36, %v1852_v35  ;;  %v5877_v10 = vld [vmem:[%s5357_s13 + $0x3c] sm:$0x1]  ;;  %v1675_v12 = vsel %vm5600_vm0, %v1670_v46, %v1674_v48  ;;  %v1873_v21 = vshll.u32 %v5871_v45, 16  ;;  %v4605_v36 = vld [vmem:[%s6380_s2 + $0x148] sm:$0xff] }
 0x23d   : > { %v1465_v4 = vunpack.c.l.bf16 %v3994_v34  ;;  %v1772_v63 = vsel %vm5455_vm13, %v4033_v31, %v1771_v11  ;;  %v1700_v30 = vshll.u32 %v1601_v47, 16  ;;  %v1708_v35 = vshll.u32 %v1594_v5, 16  ;;  %v4024_v31 = vld [vmem:[%s5357_s13 + $0x44] sm:$0x1] }
 0x23e   : > { %v1514_v59 = vmax.f32 %v1498_v50, 0.0  ;;  %4656 = vmatpush.bf16.msra.mxu2 %v5781_v43  ;;  %v1857_v15 = vrot.slane %v1856_v62, 4  ;;  %v2194_v43 = vunpack.c.l.b16 %v1772_v63  ;;  %v1875_v29 = vrot.slane %v1873_v21, 5  ;;  %v4069_v62 = vld [vmem:[%s5357_s13 + $0x18] sm:$0xf] }
 0x23f   : > { %v5903_v44 = vunpack.c.l.b16 %v1675_v12  ;;  %v5905_v46 = vunpack.c.l.b16 %v1689_v16  ;;  %v1482_v48 = vmul.f32 %v5364_v33, %v1465_v4  ;;  %v1707_v56 = vrot.slane %v1705_v1, 4  ;;  %v4754_v33 = vld [vmem:[#allocation3 + $0x1] ss:$0 sm:$0xff]  ;;  %v5941_v63 = vld [vmem:[%s5357_s13 + $0x1c] sm:$0x1]  ;;  %v4629_v1 = vld [vmem:[%s6380_s2 + $0x208] sm:$0xff] }
 0x240   : > { %3040 = vmatpush.bf16.msra.mxu1 %v4608_v18  ;;  %3127 = vmatpush.bf16.msra.mxu0 %v5848_v42  ;;  %v1530_v6 = vpack.c.bf16 %v1514_v59, %v1514_v59  ;;  %v1775_v18 = vrot.slane %v5877_v10, 5  ;;  %v1862_v51 = vsel %vm5600_vm0, %v1857_v15, %v1861_v17  ;;  %v1876_v59 = vsel %vm5600_vm0, %v1871_v23, %v1875_v29  ;;  %v5932_v17 = vld [vmem:[%s5357_s13 + $0x14] sm:$0x1] }
 0x241   : > { %v1499_v24 = vadd.f32 %v4754_v33, %v1482_v48  ;;  %v1710_v34 = vrot.slane %v1708_v35, 5  ;;  %v2182_v38 = vpack.c.b16 %v5905_v46, %v5903_v44  ;;  %v2232_v47 = vunpack.c.l.b16 %v1862_v51  ;;  %v4560_v44 = vld [vmem:[%s5357_s13 + $0x14] sm:$0xf0] }
 0x242   : > { %v1580_v19 = vsel %vm5394_vm7, %v1530_v6, %v4022_v60  ;;  %v1776_v13 = vsel %vm5455_vm13, %v4034_v61, %v1775_v18  ;;  %4657 = vmatpush.bf16.msra.mxu2 %v5810_v58  ;;  %v4604_v58 = vld [vmem:[%s6380_s2 + $0x140] sm:$0xff]  ;;  %v5918_v60 = vrot.slane %v1700_v30, 5  ;;  %v5922_v61 = vld [vmem:[%s5357_s13 + $0x3c] sm:$0x1]  ;;  %v1714_v11 = vshll.u32 %v5877_v10, 16  ;;  %v4630_v18 = vld [vmem:[%s6380_s2 + $0x210] sm:$0xff] }
 0x243   : > { %4023 = vst [vmem:[%s5357_s13 + $0x40] sm:$0xf] %v1580_v19  ;;  %2934 = vmatmul.bf16.gmra.mxu1 %v2181_v57  ;;  %3021 = vmatmul.bf16.gmra.mxu0 %v2237_v3  ;;  %v2195_v27 = vunpack.c.l.b16 %v1776_v13  ;;  %v1881_v57 = vshll.u32 %v4041_v22, 16  ;;  %v1515_v6 = vmax.f32 %v1499_v24, 0.0  ;;  %v2233_v19 = vunpack.c.l.b16 %v1876_v59 }
 0x244   : > { %3041 = vmatpush.bf16.msra.mxu1 %v4607_v37  ;;  %v4068_v37 = vld [vmem:[%s5357_s13 + $0x10] sm:$0xf]  ;;  %3128 = vmatpush.bf16.msra.mxu0 %v4631_v39  ;;  %v5937_v21 = vrot.slane %v1697_v55, 4  ;;  %v1887_v10 = vshll.u32 %v5922_v61, 16  ;;  %v1990_v23 = vshll.u32 %v5932_v17, 16  ;;  %v1995_v25 = vshrl.u32 %v4069_v62, 16 }
 0x245   : > { %v2199_v50 = vpack.c.b16 %v2195_v27, %v2194_v43  ;;  %v1981_v5 = vshrl.u32 %v4068_v37, 16  ;;  %v1883_v12 = vrot.slane %v1881_v57, 5  ;;  %v1531_v4 = vpack.c.bf16 %v1515_v6, %v1515_v6  ;;  %v4134_v27 = vld [vmem:[%s5357_s13 + $0x10] sm:$0xf] }
 0x246   : > { %4658 = vmatpush.bf16.msra.mxu2 %v5848_v42  ;;  %v1711_v42 = vor.u32 %v1710_v34, %v1707_v56  ;;  %v1984_v20 = vshll.u32 %v4068_v37, 16  ;;  %v2238_v40 = vpack.c.b16 %v2233_v19, %v2232_v47  ;;  %v1716_v46 = vrot.slane %v1714_v11, 5  ;;  %v4071_v34 = vld [vmem:[%s5357_s13 + $0x28] sm:$0xf] }
 0x247   : > { %2973 = vmatmul.bf16.gmra.mxu2 %v2199_v50  ;;  %v1983_v15 = vrot.slane %v1981_v5, 4  ;;  %v1583_v13 = vsel %vm5432_vm12, %v1531_v4, %v4024_v31  ;;  %v1997_v48 = vrot.slane %v1995_v25, 4  ;;  %v1992_v51 = vrot.slane %v1990_v23, 5 }
 0x248   : > { %3042 = vmatpush.bf16.msra.mxu1 %v4606_v7  ;;  %v1880_v7 = vrot.slane %v1878_v49, 4  ;;  %3129 = vmatpush.bf16.msra.mxu0 %v4630_v18  ;;  %4025 = vst [vmem:[%s5357_s13 + $0x44] sm:$0x1] %v1583_v13  ;;  %v1986_v35 = vrot.slane %v1984_v20, 5  ;;  %v2004_v49 = vshll.u32 %v5941_v63, 16  ;;  %v1712_v37 = vrot.slane %v1711_v42, 4 }
 0x249   : > { %v1889_v56 = vrot.slane %v1887_v10, 5  ;;  %v4135_v59 = vor.u32 %v4560_v44, %v4134_v27  ;;  %v1703_v5 = vsel %vm5600_vm0, %v5937_v21, %v5918_v60  ;;  %v5975_v60 = vld [vmem:[%s5357_s13 + $0x2c] sm:$0x1]  ;;  %v2023_v4 = vshrl.u32 %v4071_v34, 16 }
 0x24a   : > { %v4559_v3 = vld [vmem:[%s5357_s13 + $0x3c] sm:$0xf0]  ;;  %v1884_v43 = vor.u32 %v1883_v12, %v1880_v7  ;;  %4659 = vmatpush.bf16.msra.mxu2 %v4631_v39  ;;  %v1987_v50 = vor.u32 %v1986_v35, %v1983_v15  ;;  %v5967_v7 = vld [vmem:[%s5357_s13 + $0x24] sm:$0x1]  ;;  %v2026_v15 = vshll.u32 %v4071_v34, 16  ;;  %v2178_v25 = vunpack.c.l.b16 %v1703_v5 }
 0x24b   : > { %v4042_v53 = vld [vmem:[%s5357_s13 + $0x40] sm:$0xf]  ;;  %v4131_v9 = vor.u32 %v4559_v3, %v4130_v54  ;;  %v1717_v3 = vsel %vm5600_vm0, %v1712_v37, %v1716_v46  ;;  %v2018_v10 = vshll.u32 %v5967_v7, 16  ;;  %v2025_v13 = vrot.slane %v2023_v4, 4  ;;  %v4073_v37 = vld [vmem:[%s5357_s13 + $0x38] sm:$0xf] }
 0x24c   : > { %3043 = vmatpush.bf16.msra.mxu1 %v4605_v36  ;;  %v1892_v16 = vshrl.u32 %v4042_v53, 16  ;;  %v1895_v22 = vshll.u32 %v4042_v53, 16  ;;  %v1998_v36 = vshll.u32 %v4069_v62, 16  ;;  %3130 = vmatpush.bf16.msra.mxu0 %v4629_v1  ;;  %v4070_v39 = vld [vmem:[%s5357_s13 + $0x20] sm:$0xf]  ;;  %v1885_v55 = vrot.slane %v1884_v43, 4 }
 0x24d   : > { %3002 = vmatmul.bf16.gmra.mxu3 %v4131_v9  ;;  %v1988_v24 = vrot.slane %v1987_v50, 4  ;;  %v2009_v31 = vshrl.u32 %v4070_v39, 16  ;;  %v2012_v62 = vshll.u32 %v4070_v39, 16  ;;  %v4628_v53 = vld [vmem:[%s6380_s2 + $0x200] sm:$0xff]  ;;  %v2032_v43 = vshll.u32 %v5975_v60, 16 }
 0x24e   : > { %v1894_v29 = vrot.slane %v1892_v16, 4  ;;  %v1897_v30 = vrot.slane %v1895_v22, 5  ;;  %v2000_v54 = vrot.slane %v1998_v36, 5  ;;  %4660 = vmatpush.bf16.msra.mxu2 %v4630_v18  ;;  %v1890_v9 = vsel %vm5600_vm0, %v1885_v55, %v1889_v56  ;;  %v4051_v50 = vld [vmem:[%s5357_s13 + $0x8] sm:$0xe] }
 0x24f   : > { %v1993_v47 = vsel %vm5600_vm0, %v1988_v24, %v1992_v51  ;;  %v2011_v12 = vrot.slane %v2009_v31, 4  ;;  %v2014_v16 = vrot.slane %v2012_v62, 5  ;;  %v2179_v27 = vunpack.c.l.b16 %v1717_v3  ;;  %v4052_v51 = vld [vmem:[%s5357_s13 + $0x10] sm:$0xe]  ;;  %v4085_v24 = vld [vmem:[%s5357_s13 + $0x18] sm:$0xe] }
 0x250   : > { %3044 = vmatpush.bf16.msra.mxu1 %v4604_v58  ;;  %v1898_v33 = vor.u32 %v1897_v30, %v1894_v29  ;;  %v2001_v57 = vor.u32 %v2000_v54, %v1997_v48  ;;  %v2006_v58 = vrot.slane %v2004_v49, 5  ;;  %v2284_v11 = vunpack.c.l.b16 %v1993_v47  ;;  %3131 = vmatpush.bf16.msra.mxu0 %v4628_v53  ;;  %v4072_v49 = vld [vmem:[%s5357_s13 + $0x30] sm:$0xf] }
 0x251   : > { %v2015_v42 = vor.u32 %v2014_v16, %v2011_v12  ;;  %v2234_v30 = vunpack.c.l.b16 %v1890_v9  ;;  %v2034_v46 = vrot.slane %v2032_v43, 5  ;;  %v2183_v54 = vpack.c.b16 %v2179_v27, %v2178_v25  ;;  %v4084_v56 = vld [vmem:[%s5357_s13 + $0x10] sm:$0xe]  ;;  %v4561_v9 = vld [vmem:[%s5357_s13 + $0x24] sm:$0xf0] }
 0x252   : > { %v2002_v6 = vrot.slane %v2001_v57, 4  ;;  %4661 = vmatpush.bf16.msra.mxu2 %v4629_v1  ;;  %v1899_v18 = vrot.slane %v1898_v33, 4  ;;  %v2028_v1 = vrot.slane %v2026_v15, 5  ;;  %v2037_v57 = vshrl.u32 %v4072_v49, 16 }
 0x253   : > { %2939 = vmatmul.bf16.gmra.mxu1 %v2182_v38  ;;  %3026 = vmatmul.bf16.gmra.mxu0 %v2238_v40  ;;  %v5970_v38 = vld [vmem:[%s5357_s13 + $0x44] sm:$0x1]  ;;  %v2016_v36 = vrot.slane %v2015_v42, 4  ;;  %v2020_v40 = vrot.slane %v2018_v10, 5  ;;  %v4059_v34 = vrot.slane %v4051_v50, 9  ;;  %v1931_v31 = vrot.slane %v5592_v0, 5 }
 0x254   : > { %v1901_v19 = vshll.u32 %v5970_v38, 16  ;;  %v2007_v21 = vsel %vm5600_vm0, %v2002_v6, %v2006_v58  ;;  %v2029_v44 = vor.u32 %v2028_v1, %v2025_v13  ;;  %v2040_v58 = vshll.u32 %v4072_v49, 16  ;;  %v4053_v49 = vld [vmem:[%s5357_s13 + $0x18] sm:$0xe] }
 0x255   : > { %v2285_v22 = vunpack.c.l.b16 %v2007_v21  ;;  %v2021_v55 = vsel %vm5600_vm0, %v2016_v36, %v2020_v40  ;;  %v4060_v62 = vrot.slane %v4052_v51, 9  ;;  %v1935_v5 = vrot.slane %v5626_v26, 5  ;;  %v4054_v51 = vld [vmem:[%s5357_s13 + $0x20] sm:$0xe] }
 0x256   : > { %v1903_v20 = vrot.slane %v1901_v19, 5  ;;  %4662 = vmatpush.bf16.msra.mxu2 %v4628_v53  ;;  %v2030_v48 = vrot.slane %v2029_v44, 4  ;;  %v4092_v3 = vrot.slane %v4084_v56, 9  ;;  %v2118_v47 = vrot.slane %v5932_v17, 5  ;;  %v4138_v53 = vld [vmem:[%s5357_s13 + $0x20] sm:$0xf] }
 0x257   : > { %v2292_v23 = vpack.c.b16 %v2285_v22, %v2284_v11  ;;  %3074 = vmatmul.bf16.vlgmr.msrb.gmra.mxu2 %v4135_v59  ;;  %v2051_v59 = vshrl.u32 %v4073_v37, 16  ;;  %v2054_v6 = vshll.u32 %v4073_v37, 16  ;;  %v2286_v11 = vunpack.c.l.b16 %v2021_v55  ;;  %v6001_v19 = vld [vmem:[%s5357_s13 + $0x34] sm:$0x1]  ;;  %v6004_v22 = vld [vmem:[%s5357_s13 + $0x3c] sm:$0x1] }
 0x258   : > { %v1904_v29 = vsel %vm5600_vm0, %v1899_v18, %v1903_v20  ;;  %v2035_v33 = vsel %vm5600_vm0, %v2030_v48, %v2034_v46  ;;  %v4093_v16 = vrot.slane %v4085_v24, 9  ;;  %v2122_v18 = vrot.slane %v5941_v63, 5  ;;  %v4074_v46 = vld [vmem:[%s5357_s13 + $0x40] sm:$0xf]  ;;  %v4075_v48 = vld [vmem:[%s5357_s13 + $0x48] sm:$0xf] }
 0x259   : > { %v2235_v35 = vunpack.c.l.b16 %v1904_v29  ;;  %v2287_v12 = vunpack.c.l.b16 %v2035_v33  ;;  %v2039_v0 = vrot.slane %v2037_v57, 4  ;;  %v2042_v21 = vrot.slane %v2040_v58, 5  ;;  %v4086_v55 = vld [vmem:[%s5357_s13 + $0x20] sm:$0xe]  ;;  %v4087_v56 = vld [vmem:[%s5357_s13 + $0x28] sm:$0xe] }
 0x25a   : > { %v2053_v4 = vrot.slane %v2051_v59, 4  ;;  %v2056_v26 = vrot.slane %v2054_v6, 5  ;;  %v4139_v42 = vor.u32 %v4561_v9, %v4138_v53  ;;  %v1932_v17 = vsel %vm5455_vm13, %v4059_v34, %v1931_v31  ;;  %v4142_v59 = vld [vmem:[%s5357_s13 + $0x30] sm:$0xf] }
 0x25b   : > { %v2239_v39 = vpack.c.b16 %v2235_v35, %v2234_v30  ;;  %v1936_v10 = vsel %vm5455_vm13, %v4060_v62, %v1935_v5  ;;  %v2119_v63 = vsel %vm5455_vm13, %v4092_v3, %v2118_v47  ;;  %v2123_v15 = vsel %vm5455_vm13, %v4093_v16, %v2122_v18  ;;  %v4562_v62 = vld [vmem:[%s5357_s13 + $0x34] sm:$0xf0] }
 0x25c   : > { %v2046_v20 = vshll.u32 %v6001_v19, 16  ;;  %v2293_v13 = vpack.c.b16 %v2287_v12, %v2286_v11  ;;  %v2043_v43 = vor.u32 %v2042_v21, %v2039_v0  ;;  %v2060_v1 = vshll.u32 %v6004_v22, 16 }
 0x25d   : > { %3103 = vmatmul.bf16.vlgmr.msrb.gmra.mxu3 %v2292_v23  ;;  %v2057_v23 = vor.u32 %v2056_v26, %v2053_v4  ;;  %v2244_v25 = vunpack.c.l.b16 %v1932_v17  ;;  %v2245_v27 = vunpack.c.l.b16 %v1936_v10  ;;  %v2300_v29 = vunpack.c.l.b16 %v2119_v63  ;;  %v6033_v4 = vld [vmem:[%s5357_s13 + $0x44] sm:$0x1]  ;;  %v6036_v26 = vld [vmem:[%s5357_s13 + $0x4c] sm:$0x1] }
 0x25e   : > { %v2301_v30 = vunpack.c.l.b16 %v2123_v15  ;;  %v2044_v35 = vrot.slane %v2043_v43, 4  ;;  %v2048_v36 = vrot.slane %v2046_v20, 5  ;;  %v2062_v44 = vrot.slane %v2060_v1, 5 }
 0x25f   : > { %v2058_v40 = vrot.slane %v2057_v23, 4  ;;  %v2252_v37 = vpack.c.b16 %v2245_v27, %v2244_v25  ;;  %v2065_v33 = vshrl.u32 %v4074_v46, 16  ;;  %v2068_v24 = vshll.u32 %v4074_v46, 16 }
 0x260   : > { %v2308_v50 = vpack.c.b16 %v2301_v30, %v2300_v29  ;;  %v2079_v57 = vshrl.u32 %v4075_v48, 16  ;;  %v2082_v58 = vshll.u32 %v4075_v48, 16  ;;  %v4061_v34 = vrot.slane %v4053_v49, 9  ;;  %v4088_v49 = vld [vmem:[%s5357_s13 + $0x30] sm:$0xe] }
 0x261   : > { %v1939_v31 = vrot.slane %v5707_v41, 5  ;;  %v4062_v5 = vrot.slane %v4054_v51, 9  ;;  %v1943_v3 = vrot.slane %v5734_v2, 5  ;;  %v4094_v47 = vrot.slane %v4086_v55, 9  ;;  %v4563_v51 = vld [vmem:[%s5357_s13 + $0x44] sm:$0xf0] }
 0x262   : > { %v2126_v6 = vrot.slane %v5967_v7, 5  ;;  %v4095_v11 = vrot.slane %v4087_v56, 9  ;;  %v2130_v12 = vrot.slane %v5975_v60, 5  ;;  %v2067_v16 = vrot.slane %v2065_v33, 4 }
 0x263   : > { %2944 = vmatmul.bf16.gmra.mxu1 %v2183_v54  ;;  %3031 = vmatmul.bf16.gmra.mxu0 %v2239_v39  ;;  %v2049_v54 = vsel %vm5600_vm0, %v2044_v35, %v2048_v36  ;;  %v2063_v39 = vsel %vm5600_vm0, %v2058_v40, %v2062_v44  ;;  %v2070_v18 = vrot.slane %v2068_v24, 5  ;;  %v2081_v0 = vrot.slane %v2079_v57, 4  ;;  %v4055_v40 = vld [vmem:[%s5357_s13 + $0x28] sm:$0xe]  ;;  %v4056_v44 = vld [vmem:[%s5357_s13 + $0x30] sm:$0xe] }
 0x264   : > { %v2288_v53 = vunpack.c.l.b16 %v2049_v54  ;;  %v2289_v9 = vunpack.c.l.b16 %v2063_v39  ;;  %v2084_v41 = vrot.slane %v2082_v58, 5  ;;  %v4143_v21 = vor.u32 %v4562_v62, %v4142_v59  ;;  %v4090_v62 = vld [vmem:[%s5357_s13 + $0x40] sm:$0xe] }
 0x265   : > { %v1940_v2 = vsel %vm5455_vm13, %v4061_v34, %v1939_v31  ;;  %v1944_v7 = vsel %vm5455_vm13, %v4062_v5, %v1943_v3  ;;  %v2127_v17 = vsel %vm5455_vm13, %v4094_v47, %v2126_v6  ;;  %v2131_v60 = vsel %vm5455_vm13, %v4095_v11, %v2130_v12  ;;  %v4091_v5 = vld [vmem:[%s5357_s13 + $0x48] sm:$0xe] }
 0x266   : > { %v2071_v10 = vor.u32 %v2070_v18, %v2067_v16  ;;  %v2074_v63 = vshll.u32 %v6033_v4, 16  ;;  %v2085_v15 = vor.u32 %v2084_v41, %v2081_v0  ;;  %v2088_v20 = vshll.u32 %v6036_v26, 16 }
 0x267   : > { %3079 = vmatmul.bf16.gmra.mxu2 %v4139_v42  ;;  %v2294_v42 = vpack.c.b16 %v2289_v9, %v2288_v53  ;;  %v2247_v43 = vunpack.c.l.b16 %v1944_v7  ;;  %v2302_v23 = vunpack.c.l.b16 %v2127_v17  ;;  %v2303_v1 = vunpack.c.l.b16 %v2131_v60  ;;  %v4058_v17 = vld [vmem:[%s5357_s13 + $0x40] sm:$0xe] }
 0x268   : > { %v2072_v25 = vrot.slane %v2071_v10, 4  ;;  %v2076_v27 = vrot.slane %v2074_v63, 5  ;;  %v2086_v29 = vrot.slane %v2085_v15, 4  ;;  %v2090_v30 = vrot.slane %v2088_v20, 5 }
 0x269   : > { %v2309_v36 = vpack.c.b16 %v2303_v1, %v2302_v23  ;;  %v4063_v54 = vrot.slane %v4055_v40, 9  ;;  %v1947_v39 = vrot.slane %v5843_v32, 5  ;;  %v4064_v55 = vrot.slane %v4056_v44, 9 }
 0x26a   : > { %v2077_v46 = vsel %vm5600_vm0, %v2072_v25, %v2076_v27  ;;  %v2091_v48 = vsel %vm5600_vm0, %v2086_v29, %v2090_v30  ;;  %v1951_v56 = vrot.slane %v5871_v45, 5  ;;  %v4096_v57 = vrot.slane %v4088_v49, 9 }
 0x26b   : > { %v2290_v33 = vunpack.c.l.b16 %v2077_v46  ;;  %v2291_v24 = vunpack.c.l.b16 %v2091_v48  ;;  %v2134_v8 = vrot.slane %v6001_v19, 5  ;;  %v2138_v59 = vrot.slane %v6004_v22, 5 }
 0x26c   : > { %v1948_v32 = vsel %vm5455_vm13, %v4063_v54, %v1947_v39  ;;  %v1952_v3 = vsel %vm5455_vm13, %v4064_v55, %v1951_v56  ;;  %v2142_v19 = vrot.slane %v6033_v4, 5  ;;  %v2146_v22 = vrot.slane %v6036_v26, 5 }
 0x26d   : > { %3108 = vmatmul.bf16.gmra.mxu3 %v2293_v13  ;;  %v2246_v13 = vunpack.c.l.b16 %v1940_v2  ;;  %v2295_v31 = vpack.c.b16 %v2291_v24, %v2290_v33  ;;  %v2135_v45 = vsel %vm5455_vm13, %v4096_v57, %v2134_v8  ;;  %v4098_v6 = vrot.slane %v4090_v62, 9 }
 0x26e   : > { %v4099_v53 = vrot.slane %v4091_v5, 9  ;;  %v2248_v9 = vunpack.c.l.b16 %v1948_v32  ;;  %v2249_v11 = vunpack.c.l.b16 %v1952_v3  ;;  %v2304_v12 = vunpack.c.l.b16 %v2135_v45 }
 0x26f   : > { %v2253_v35 = vpack.c.b16 %v2247_v43, %v2246_v13  ;;  %v2143_v18 = vsel %vm5455_vm13, %v4098_v6, %v2142_v19  ;;  %v1955_v10 = vrot.slane %v5922_v61, 5  ;;  %v4066_v63 = vrot.slane %v4058_v17, 9 }
 0x270   : > { %v2147_v0 = vsel %vm5455_vm13, %v4099_v53, %v2146_v22  ;;  %v2254_v41 = vpack.c.b16 %v2249_v11, %v2248_v9  ;;  %v2306_v26 = vunpack.c.l.b16 %v2143_v18  ;;  %v1959_v15 = vrot.slane %v5970_v38, 5 }
 0x271   : > { %v2307_v7 = vunpack.c.l.b16 %v2147_v0 }
 0x272   : > { %v1960_v1 = vsel %vm5455_vm13, %v4066_v63, %v1959_v15 }
 0x273   : > { %3045 = vmatmul.bf16.vlgmr.msra.gmra.mxu1 %v2252_v37  ;;  %3132 = vmatmul.bf16.vlgmr.msra.gmra.mxu0 %v2308_v50  ;;  %v4089_v37 = vld [vmem:[%s5357_s13 + $0x38] sm:$0xe]  ;;  %v4146_v50 = vld [vmem:[%s5357_s13 + $0x40] sm:$0xf]  ;;  %v2311_v20 = vpack.c.b16 %v2307_v7, %v2306_v26  ;;  %v2251_v27 = vunpack.c.l.b16 %v1960_v1 }
 0x274   : > { %v4097_v58 = vrot.slane %v4089_v37, 9  ;;  %v4147_v34 = vor.u32 %v4563_v51, %v4146_v50 }
 0x276   : > { %v2139_v47 = vsel %vm5455_vm13, %v4097_v58, %v2138_v59 }
 0x277   : > { %3084 = vmatmul.bf16.gmra.mxu2 %v4143_v21  ;;  %v2305_v16 = vunpack.c.l.b16 %v2139_v47 }
 0x279   : > { %v2310_v21 = vpack.c.b16 %v2305_v16, %v2304_v12 }
 0x27d   : > { %3113 = vmatmul.bf16.gmra.mxu3 %v2294_v42  ;;  %v4057_v42 = vld [vmem:[%s5357_s13 + $0x38] sm:$0xe] }
 0x27e   : > { %v4065_v60 = vrot.slane %v4057_v42, 9 }
 0x280   : > { %v1956_v23 = vsel %vm5455_vm13, %v4065_v60, %v1955_v10 }
 0x281   : > { %v2250_v25 = vunpack.c.l.b16 %v1956_v23 }
 0x283   : > { %3050 = vmatmul.bf16.gmra.mxu1 %v2253_v35  ;;  %3137 = vmatmul.bf16.gmra.mxu0 %v2309_v36  ;;  %v2255_v35 = vpack.c.b16 %v2251_v27, %v2250_v25 }
 0x287   : > { %3089 = vmatmul.bf16.gmra.mxu2 %v4147_v34 }
 0x28d   : > { %3118 = vmatmul.bf16.gmra.mxu3 %v2295_v31 }
 0x290   : > { %v2911_v4 = vpop.f32.mrf.mxu1  ;;  %v2901_v2 = vpop.f32.mrf.mxu0 }
 0x293   : > { %3055 = vmatmul.bf16.gmra.mxu1 %v2254_v41  ;;  %3142 = vmatmul.bf16.gmra.mxu0 %v2310_v21 }
 0x297   : > { %3147 = vmatmul.bf16.vlgmr.msra.gmra.mxu2 %v2311_v20 }
 0x298   : > { %v2913_v13 = vpop.f32.mrf.mxu1  ;;  %v2903_v43 = vpop.f32.mrf.mxu0 }
 0x299   : > { %v2959_v29 = vpop.f32.mrf.mxu2  ;;  %v2988_v30 = vpop.f32.mrf.mxu3 }
 0x2a0   : > { %v2916_v36 = vpop.f32.mrf.mxu1  ;;  %v2906_v61 = vpop.f32.mrf.mxu0 }
 0x2a1   : > { %v2961_v40 = vpop.f32.mrf.mxu2  ;;  %v2990_v38 = vpop.f32.mrf.mxu3 }
 0x2a3   : > { %3060 = vmatmul.bf16.gmra.mxu1 %v2255_v35 }
 0x2a8   : > { %v2918_v44 = vpop.f32.mrf.mxu1  ;;  %v2908_v46 = vpop.f32.mrf.mxu0 }
 0x2a9   : > { %v2964_v48 = vpop.f32.mrf.mxu2  ;;  %v6086_v49 = vpop.f32.mrf.mxu3 }
 0x2b0   : > { %v2930_v37 = vpop.f32.mrf.mxu1  ;;  %v3017_v50 = vpop.f32.mrf.mxu0 }
 0x2b1   : > { %v2931_v28 = vadd.f32 %v2930_v37, %v2901_v2  ;;  %v2966_v54 = vpop.f32.mrf.mxu2  ;;  %v6088_v39 = vpop.f32.mrf.mxu3 }
 0x2b3   : > { %v2960_v51 = vadd.f32 %v2959_v29, %v2931_v28 }
 0x2b5   : > { %v2989_v20 = vadd.f32 %v2988_v30, %v2960_v51 }
 0x2b7   : > { %v3018_v23 = vadd.f32 %v3017_v50, %v2989_v20 }
 0x2b8   : > { %v2932_v55 = vpop.f32.mrf.mxu1  ;;  %v3019_v56 = vpop.f32.mrf.mxu0 }
 0x2b9   : > { %v2933_v33 = vadd.f32 %v2932_v55, %v2903_v43  ;;  %v6090_v8 = vpop.f32.mrf.mxu3 }
 0x2ba   : > { %v2969_v57 = vpop.f32.mrf.mxu2 }
 0x2bb   : > { %v2962_v24 = vadd.f32 %v2961_v40, %v2933_v33 }
 0x2bd   : > { %v2991_v35 = vadd.f32 %v2990_v38, %v2962_v24 }
 0x2c0   : > { %v2935_v58 = vpop.f32.mrf.mxu1  ;;  %v3022_v59 = vpop.f32.mrf.mxu0 }
 0x2c1   : > { %v2936_v34 = vadd.f32 %v2935_v58, %v2906_v61  ;;  %v6092_v5 = vpop.f32.mrf.mxu3  ;;  %v4436_v58 = vld [vmem:[%s5357_s13 + $0x8] sm:$0xf] }
 0x2c2   : > { %v2971_v62 = vpop.f32.mrf.mxu2 }
 0x2c3   : > { %v2965_v31 = vadd.f32 %v2964_v48, %v2936_v34  ;;  %v4438_v34 = vld [vmem:[%s5357_s13 + $0xc] sm:$0x1] }
 0x2c5   : > { %v2994_v50 = vadd.f32 %v6086_v49, %v2965_v31 }
 0x2c8   : > { %v2937_v32 = vpop.f32.mrf.mxu1  ;;  %v6094_v3 = vpop.f32.mrf.mxu0 }
 0x2c9   : > { %v2938_v45 = vadd.f32 %v2937_v32, %v2908_v46  ;;  %v3020_v46 = vadd.f32 %v3019_v56, %v2991_v35 }
 0x2ca   : > { %v2974_v19 = vpop.f32.mrf.mxu2 }
 0x2cb   : > { %v6096_v47 = vadd.f32 %v2966_v54, %v2938_v45  ;;  %v3023_v45 = vadd.f32 %v3022_v59, %v2994_v50 }
 0x2d0   : > { %v2940_v22 = vpop.f32.mrf.mxu1  ;;  %v6098_v6 = vpop.f32.mrf.mxu0 }
 0x2d1   : > { %v2941_v53 = vadd.f32 %v2940_v22, %v2911_v4  ;;  %v6100_v9 = vpop.f32.mrf.mxu3 }
 0x2d2   : > { %v2976_v12 = vpop.f32.mrf.mxu2 }
 0x2d3   : > { %v6102_v11 = vadd.f32 %v2969_v57, %v2941_v53 }
 0x2d8   : > { %v2942_v16 = vpop.f32.mrf.mxu1  ;;  %v6104_v18 = vpop.f32.mrf.mxu0 }
 0x2d9   : > { %v2943_v0 = vadd.f32 %v2942_v16, %v2913_v13  ;;  %v6108_v21 = vpop.f32.mrf.mxu3 }
 0x2da   : > { %v3075_v2 = vpop.f32.mrf.mxu2 }
 0x2db   : > { %v6106_v41 = vadd.f32 %v2971_v62, %v2943_v0 }
 0x2e0   : > { %v2945_v26 = vpop.f32.mrf.mxu1  ;;  %v6110_v7 = vpop.f32.mrf.mxu0 }
 0x2e1   : > { %v2946_v42 = vadd.f32 %v2945_v26, %v2916_v36  ;;  %v3104_v60 = vpop.f32.mrf.mxu3  ;;  %v2996_v26 = vadd.f32 %v6088_v39, %v6096_v47 }
 0x2e2   : > { %v3077_v4 = vpop.f32.mrf.mxu2 }
 0x2e3   : > { %v6112_v17 = vadd.f32 %v2974_v19, %v2946_v42 }
 0x2e8   : > { %v2947_v10 = vpop.f32.mrf.mxu1  ;;  %v6114_v63 = vpop.f32.mrf.mxu0 }
 0x2e9   : > { %v2948_v15 = vadd.f32 %v2947_v10, %v2918_v44  ;;  %v3106_v1 = vpop.f32.mrf.mxu3 }
 0x2ea   : > { %v3080_v13 = vpop.f32.mrf.mxu2 }
 0x2eb   : > { %v6116_v43 = vadd.f32 %v2976_v12, %v2948_v15 }
 0x2f0   : > { %v3046_v25 = vpop.f32.mrf.mxu1  ;;  %v3133_v27 = vpop.f32.mrf.mxu0 }
 0x2f1   : > { %v3047_v29 = vadd.f32 %v3046_v25, %v3018_v23  ;;  %v3109_v51 = vpop.f32.mrf.mxu3  ;;  %v4440_v25 = vld [vmem:[%s5357_s13 + $0x10] sm:$0xf] }
 0x2f2   : > { %v3082_v36 = vpop.f32.mrf.mxu2 }
 0x2f3   : > { %v3076_v61 = vadd.f32 %v3075_v2, %v3047_v29 }
 0x2f5   : > { %v3105_v40 = vadd.f32 %v3104_v60, %v3076_v61 }
 0x2f7   : > { %v3134_v48 = vadd.f32 %v3133_v27, %v3105_v40  ;;  %v4442_v27 = vld [vmem:[%s5357_s13 + $0x14] sm:$0x1] }
 0x2f8   : > { %v3048_v37 = vpop.f32.mrf.mxu1  ;;  %v3135_v28 = vpop.f32.mrf.mxu0 }
 0x2f9   : > { %v3193_v44 = vpack.c.bf16 %v3134_v48, %v3134_v48  ;;  %v3049_v30 = vadd.f32 %v3048_v37, %v3020_v46  ;;  %v3170_v19 = vmul.f32 %v3134_v48, %v3134_v48  ;;  %v3111_v60 = vpop.f32.mrf.mxu3 }
 0x2fa   : > { %v6119_v33 = vpop.f32.mrf.mxu2 }
 0x2fb   : > { %v3202_v54 = vshrl.u32 %v3193_v44, 16  ;;  %v3078_v55 = vadd.f32 %v3077_v4, %v3049_v30  ;;  %v3205_v38 = vshll.u32 %v3193_v44, 16  ;;  %v2999_v44 = vadd.f32 %v6090_v8, %v6102_v11 }
 0x2fd   : > { %v3204_v57 = vrot.slane %v3202_v54, 7  ;;  %v3107_v24 = vadd.f32 %v3106_v1, %v3078_v55  ;;  %v3025_v1 = vadd.f32 %v6094_v3, %v2996_v26 }
 0x2ff   : > { %v3207_v56 = vor.u32 %v3205_v38, %v3204_v57  ;;  %v3208_v62 = vrot.slane %v3204_v57, 4  ;;  %v3136_v32 = vadd.f32 %v3135_v28, %v3107_v24  ;;  %v3028_v24 = vadd.f32 %v6098_v6, %v2999_v44  ;;  %v4454_v44 = vld [vmem:[%s5357_s13 + $0x2c] sm:$0x1] }
 0x300   : > { %v3051_v22 = vpop.f32.mrf.mxu1  ;;  %v3138_v53 = vpop.f32.mrf.mxu0 }
 0x301   : > { %v3282_v12 = vsel %vm5394_vm7, %v3207_v56, %v4436_v58  ;;  %v3285_v49 = vsel %vm5432_vm12, %v3208_v62, %v4438_v34  ;;  %v3154_v31 = vadd.f32 %v3136_v32, %v3134_v48  ;;  %v3171_v16 = vmul.f32 %v3136_v32, %v3136_v32  ;;  %v3114_v55 = vpop.f32.mrf.mxu3  ;;  %v4444_v58 = vld [vmem:[%s5357_s13 + $0x18] sm:$0xf]  ;;  %v4446_v34 = vld [vmem:[%s5357_s13 + $0x1c] sm:$0x1] }
 0x302   : > { %4437 = vst [vmem:[%s5357_s13 + $0x8] sm:$0xf] %v3282_v12  ;;  %v3194_v0 = vpack.c.bf16 %v3136_v32, %v3136_v32  ;;  %v3052_v2 = vadd.f32 %v3051_v22, %v3023_v45  ;;  %v6131_v20 = vpop.f32.mrf.mxu2 }
 0x303   : > { %4439 = vst [vmem:[%s5357_s13 + $0xc] sm:$0x1] %v3285_v49  ;;  %v3178_v59 = vadd.f32 %v3171_v16, %v3170_v19 }
 0x304   : > { %v3210_v42 = vshrl.u32 %v3194_v0, 16  ;;  %v3081_v4 = vadd.f32 %v3080_v13, %v3052_v2  ;;  %v3213_v15 = vshll.u32 %v3194_v0, 16 }
 0x306   : > { %v3212_v10 = vrot.slane %v3210_v42, 7  ;;  %v3110_v23 = vadd.f32 %v3109_v51, %v3081_v4  ;;  %v4448_v42 = vld [vmem:[%s5357_s13 + $0x20] sm:$0xf] }
 0x308   : > { %v3215_v29 = vor.u32 %v3213_v15, %v3212_v10  ;;  %v3216_v35 = vrot.slane %v3212_v10, 4  ;;  %v3139_v61 = vadd.f32 %v3138_v53, %v3110_v23  ;;  %v3053_v39 = vpop.f32.mrf.mxu1  ;;  %v3140_v47 = vpop.f32.mrf.mxu0  ;;  %v3001_v53 = vadd.f32 %v6092_v5, %v6106_v41  ;;  %v4450_v5 = vld [vmem:[%s5357_s13 + $0x24] sm:$0x1] }
 0x309   : > { %v3054_v40 = vadd.f32 %v3053_v39, %v3025_v1 }
 0x30a   : > { %v3288_v13 = vsel %vm5394_vm7, %v3215_v29, %v4440_v25  ;;  %v3291_v46 = vsel %vm5432_vm12, %v3216_v35, %v4442_v27  ;;  %v3155_v48 = vadd.f32 %v3154_v31, %v3139_v61  ;;  %v3172_v37 = vmul.f32 %v3139_v61, %v3139_v61  ;;  %v6147_v56 = vpop.f32.mrf.mxu2 }
 0x30b   : > { %4441 = vst [vmem:[%s5357_s13 + $0x10] sm:$0xf] %v3288_v13  ;;  %v3195_v3 = vpack.c.bf16 %v3139_v61, %v3139_v61  ;;  %v3083_v28 = vadd.f32 %v3082_v36, %v3054_v40  ;;  %v3004_v61 = vadd.f32 %v6100_v9, %v6112_v17 }
 0x30c   : > { %4443 = vst [vmem:[%s5357_s13 + $0x14] sm:$0x1] %v3291_v46  ;;  %v3179_v30 = vadd.f32 %v3178_v59, %v3172_v37  ;;  %v3030_v59 = vadd.f32 %v6104_v18, %v3001_v53 }
 0x30d   : > { %v3218_v51 = vshrl.u32 %v3195_v3, 16  ;;  %v3112_v54 = vadd.f32 %v3111_v60, %v3083_v28  ;;  %v3221_v57 = vshll.u32 %v3195_v3, 16  ;;  %v3116_v60 = vpop.f32.mrf.mxu3  ;;  %v3033_v3 = vadd.f32 %v6110_v7, %v3004_v61  ;;  %v4452_v28 = vld [vmem:[%s5357_s13 + $0x28] sm:$0xf] }
 0x30f   : > { %v3220_v50 = vrot.slane %v3218_v51, 7  ;;  %v3141_v38 = vadd.f32 %v3140_v47, %v3112_v54 }
 0x310   : > { %v3056_v36 = vpop.f32.mrf.mxu1  ;;  %v3143_v22 = vpop.f32.mrf.mxu0 }
 0x311   : > { %v3223_v62 = vor.u32 %v3221_v57, %v3220_v50  ;;  %v3224_v32 = vrot.slane %v3220_v50, 4  ;;  %v3156_v8 = vadd.f32 %v3155_v48, %v3141_v38  ;;  %v3173_v11 = vmul.f32 %v3141_v38, %v3141_v38 }
 0x312   : > { %v3196_v45 = vpack.c.bf16 %v3141_v38, %v3141_v38  ;;  %v3057_v19 = vadd.f32 %v3056_v36, %v3028_v24  ;;  %v3092_v25 = vpop.f32.mrf.mxu2  ;;  %v3006_v57 = vadd.f32 %v6108_v21, %v6116_v43  ;;  %v4456_v43 = vld [vmem:[%s5357_s13 + $0x30] sm:$0xf] }
 0x313   : > { %v3294_v6 = vsel %vm5394_vm7, %v3223_v62, %v4444_v58  ;;  %v3297_v12 = vsel %vm5432_vm12, %v3224_v32, %v4446_v34  ;;  %v3180_v49 = vadd.f32 %v3179_v30, %v3173_v11  ;;  %v4458_v11 = vld [vmem:[%s5357_s13 + $0x34] sm:$0x1] }
 0x314   : > { %4445 = vst [vmem:[%s5357_s13 + $0x18] sm:$0xf] %v3294_v6  ;;  %v3226_v31 = vshrl.u32 %v3196_v45, 16  ;;  %v3086_v16 = vadd.f32 %v6119_v33, %v3057_v19  ;;  %v3229_v2 = vshll.u32 %v3196_v45, 16  ;;  %v3035_v21 = vadd.f32 %v6114_v63, %v3006_v57 }
 0x315   : > { %4447 = vst [vmem:[%s5357_s13 + $0x1c] sm:$0x1] %v3297_v12  ;;  %v3119_v9 = vpop.f32.mrf.mxu3 }
 0x316   : > { %v3228_v0 = vrot.slane %v3226_v31, 7  ;;  %v3115_v26 = vadd.f32 %v3114_v55, %v3086_v16 }
 0x318   : > { %v3231_v41 = vor.u32 %v3229_v2, %v3228_v0  ;;  %v3232_v4 = vrot.slane %v3228_v0, 4  ;;  %v3144_v10 = vadd.f32 %v3143_v22, %v3115_v26  ;;  %v3058_v15 = vpop.f32.mrf.mxu1  ;;  %v3145_v47 = vpop.f32.mrf.mxu0 }
 0x319   : > { %v3059_v23 = vadd.f32 %v3058_v15, %v3030_v59 }
 0x31a   : > { %v3300_v1 = vsel %vm5394_vm7, %v3231_v41, %v4448_v42  ;;  %v3303_v33 = vsel %vm5432_vm12, %v3232_v4, %v4450_v5  ;;  %v3157_v27 = vadd.f32 %v3156_v8, %v3144_v10  ;;  %v3174_v18 = vmul.f32 %v3144_v10, %v3144_v10  ;;  %v3148_v34 = vpop.f32.mrf.mxu2 }
 0x31b   : > { %4449 = vst [vmem:[%s5357_s13 + $0x20] sm:$0xf] %v3300_v1  ;;  %v3197_v29 = vpack.c.bf16 %v3144_v10, %v3144_v10  ;;  %v3088_v35 = vadd.f32 %v6131_v20, %v3059_v23  ;;  %v4462_v10 = vld [vmem:[%s5357_s13 + $0x3c] sm:$0x1] }
 0x31c   : > { %4451 = vst [vmem:[%s5357_s13 + $0x24] sm:$0x1] %v3303_v33  ;;  %v3181_v39 = vadd.f32 %v3180_v49, %v3174_v18 }
 0x31d   : > { %v3234_v40 = vshrl.u32 %v3197_v29, 16  ;;  %v3117_v13 = vadd.f32 %v3116_v60, %v3088_v35  ;;  %v3237_v48 = vshll.u32 %v3197_v29, 16  ;;  %v3121_v2 = vpop.f32.mrf.mxu3  ;;  %v4460_v60 = vld [vmem:[%s5357_s13 + $0x38] sm:$0xf] }
 0x31f   : > { %v3236_v46 = vrot.slane %v3234_v40, 7  ;;  %v3146_v37 = vadd.f32 %v3145_v47, %v3117_v13 }
 0x320   : > { %v3061_v30 = vpop.f32.mrf.mxu1 }
 0x321   : > { %v3239_v51 = vor.u32 %v3237_v48, %v3236_v46  ;;  %v3240_v20 = vrot.slane %v3236_v46, 4  ;;  %v3158_v54 = vadd.f32 %v3157_v27, %v3146_v37  ;;  %v3175_v55 = vmul.f32 %v3146_v37, %v3146_v37 }
 0x322   : > { %v3198_v17 = vpack.c.bf16 %v3146_v37, %v3146_v37  ;;  %v3062_v50 = vadd.f32 %v3061_v30, %v3033_v3  ;;  %v3150_v42 = vpop.f32.mrf.mxu2  ;;  %v4464_v37 = vld [vmem:[%s5357_s13 + $0x40] sm:$0xf]  ;;  %v4466_v3 = vld [vmem:[%s5357_s13 + $0x44] sm:$0x1] }
 0x323   : > { %v3306_v38 = vsel %vm5394_vm7, %v3239_v51, %v4452_v28  ;;  %v3309_v7 = vsel %vm5432_vm12, %v3240_v20, %v4454_v44  ;;  %v3182_v24 = vadd.f32 %v3181_v39, %v3175_v55 }
 0x324   : > { %4453 = vst [vmem:[%s5357_s13 + $0x28] sm:$0xf] %v3306_v38  ;;  %v3242_v58 = vshrl.u32 %v3198_v17, 16  ;;  %v3091_v36 = vadd.f32 %v6147_v56, %v3062_v50  ;;  %v3245_v32 = vshll.u32 %v3198_v17, 16  ;;  %v3153_v17 = vld [vmem:[#allocation3 + $0x4] sm:$0x1] }
 0x325   : > { %4455 = vst [vmem:[%s5357_s13 + $0x2c] sm:$0x1] %v3309_v7  ;;  %v3169_v38 = vld [vmem:[#allocation3 + $0x5] sm:$0x1] }
 0x326   : > { %v3244_v62 = vrot.slane %v3242_v58, 7  ;;  %v3120_v8 = vadd.f32 %v3119_v9, %v3091_v36 }
 0x328   : > { %v3247_v45 = vor.u32 %v3245_v32, %v3244_v62  ;;  %v3248_v19 = vrot.slane %v3244_v62, 4  ;;  %v3149_v22 = vadd.f32 %v3148_v34, %v3120_v8  ;;  %v3063_v53 = vpop.f32.mrf.mxu1 }
 0x329   : > { %v3064_v6 = vadd.f32 %v3063_v53, %v3035_v21 }
 0x32a   : > { %v3312_v12 = vsel %vm5394_vm7, %v3247_v45, %v4456_v43  ;;  %v3315_v56 = vsel %vm5432_vm12, %v3248_v19, %v4458_v11  ;;  %v3159_v49 = vadd.f32 %v3158_v54, %v3149_v22  ;;  %v3176_v31 = vmul.f32 %v3149_v22, %v3149_v22 }
 0x32b   : > { %4457 = vst [vmem:[%s5357_s13 + $0x30] sm:$0xf] %v3312_v12  ;;  %v3199_v16 = vpack.c.bf16 %v3149_v22, %v3149_v22  ;;  %v3093_v63 = vadd.f32 %v3092_v25, %v3064_v6 }
 0x32c   : > { %4459 = vst [vmem:[%s5357_s13 + $0x34] sm:$0x1] %v3315_v56  ;;  %v3183_v0 = vadd.f32 %v3182_v24, %v3176_v31 }
 0x32d   : > { %v3250_v26 = vshrl.u32 %v3199_v16, 16  ;;  %v3122_v59 = vadd.f32 %v3121_v2, %v3093_v63  ;;  %v3253_v41 = vshll.u32 %v3199_v16, 16 }
 0x32f   : > { %v3252_v5 = vrot.slane %v3250_v26, 7  ;;  %v3151_v4 = vadd.f32 %v3150_v42, %v3122_v59 }
 0x331   : > { %v3255_v15 = vor.u32 %v3253_v41, %v3252_v5  ;;  %v3256_v23 = vrot.slane %v3252_v5, 4  ;;  %v3160_v1 = vadd.f32 %v3159_v49, %v3151_v4  ;;  %v3177_v33 = vmul.f32 %v3151_v4, %v3151_v4 }
 0x332   : > { %v3200_v25 = vpack.c.bf16 %v3151_v4, %v3151_v4 }
 0x333   : > { %v3318_v27 = vsel %vm5394_vm7, %v3255_v15, %v4460_v60  ;;  %v3321_v18 = vsel %vm5432_vm12, %v3256_v23, %v4462_v10  ;;  %v3161_v29 = vrot.slane %v3160_v1, 4  ;;  %v3184_v35 = vadd.f32 %v3183_v0, %v3177_v33 }
 0x334   : > { %4461 = vst [vmem:[%s5357_s13 + $0x38] sm:$0xf] %v3318_v27  ;;  %v3258_v61 = vshrl.u32 %v3200_v25, 16  ;;  %v3261_v13 = vshll.u32 %v3200_v25, 16 }
 0x335   : > { %4463 = vst [vmem:[%s5357_s13 + $0x3c] sm:$0x1] %v3321_v18  ;;  %v3162_v39 = vadd.f32 %v3161_v29, %v3160_v1  ;;  %v3185_v47 = vrot.slane %v3184_v35, 4 }
 0x336   : > { %v3260_v40 = vrot.slane %v3258_v61, 7 }
 0x337   : > { %v3163_v46 = vrot.slane %v3162_v39, 2  ;;  %v3186_v48 = vadd.f32 %v3185_v47, %v3184_v35 }
 0x338   : > { %v3263_v28 = vor.u32 %v3261_v13, %v3260_v40  ;;  %v3264_v44 = vrot.slane %v3260_v40, 4 }
 0x339   : > { %v3164_v30 = vadd.f32 %v3163_v46, %v3162_v39  ;;  %v3187_v51 = vrot.slane %v3186_v48, 2 }
 0x33a   : > { %v3324_v20 = vsel %vm5394_vm7, %v3263_v28, %v4464_v37  ;;  %v3327_v54 = vsel %vm5432_vm12, %v3264_v44, %v4466_v3 }
 0x33b   : > { %v3165_v55 = vrot.slane %v3164_v30, 1  ;;  %v3188_v9 = vadd.f32 %v3187_v51, %v3186_v48  ;;  %4465 = vst [vmem:[%s5357_s13 + $0x40] sm:$0xf] %v3324_v20 }
 0x33c   : > { %4467 = vst [vmem:[%s5357_s13 + $0x44] sm:$0x1] %v3327_v54 }
 0x33d   : > { %v3166_v50 = vadd.f32 %v3165_v55, %v3164_v30  ;;  %v3189_v57 = vrot.slane %v3188_v9, 1 }
 0x33f   : > { %v3167_v7 = vadd.f32 %v3166_v50, %v3153_v17  ;;  %v3190_v24 = vadd.f32 %v3189_v57, %v3188_v9 }
 0x341   : > { %3168 = vst [vmem:[#allocation3 + $0x4] sm:$0x1] %v3167_v7  ;;  %v3191_v58 = vadd.f32 %v3190_v24, %v3169_v38 }
 0x343   : > { %3192 = vst [vmem:[#allocation3 + $0x5] sm:$0x1] %v3191_v58 }
 0x344 PF: > { %p3329_p10 = scmp.eq.s32.totalorder %s4845_s22, 2 }
 0x346   : > { %p3330_p11 = pnand %p3329_p10, %p257_p2 }
 0x348   : > { %3333 = sbr.rel (%p3330_p11) target bundleno = 882 (0x372), region = 60 }
 0x34d   : > { %v3334_v52 = vld [vmem:[#allocation3 + $0x4] sm:$0x1]  ;;  %v3336_v14 = vld [vmem:[#allocation3 + $0x5] sm:$0x1]  ;;  %v3359_v62 = vld [vmem:[#allocation3 + $0x2] sm:$0x1] }
 0x34e   : > { %v3335_v34 = vmul.f32 0.0078125, %v3334_v52  ;;  %v3337_v36 = vmul.f32 0.0078125, %v3336_v14  ;;  %v3360_v32 = vmul.f32 0.0078125, %v3359_v62  ;;  %v3361_v8 = vld [vmem:[#allocation3 + $0x3] sm:$0x1] }
 0x34f   : > { %v3362_v43 = vmul.f32 0.0078125, %v3361_v8  ;;  %v3341_v5 = vld [vmem:[%s6382_s4 + $0x2] sm:$0x1]  ;;  %v3366_v4 = vld [vmem:[%s6382_s4 + $0x4] sm:$0x1] }
 0x350   : > { %v3338_v21 = vmul.f32 %v3335_v34, %v3335_v34  ;;  %v3363_v11 = vmul.f32 %v3360_v32, %v3360_v32  ;;  %v3354_v1 = vld [vmem:[%s6382_s4 + $0x3] sm:$0x1]  ;;  %v3379_v27 = vld [vmem:[%s6382_s4 + $0x5] sm:$0x1] }
 0x352   : > { %v3339_v45 = vsub.f32 %v3337_v36, %v3338_v21  ;;  %v3364_v19 = vsub.f32 %v3362_v43, %v3363_v11 }
 0x354   : > { %v3340_v22 = vmax.f32 %v3339_v45, 0.0  ;;  %v3365_v53 = vmax.f32 %v3364_v19, 0.0 }
 0x356   : > { %v3342_v6 = vadd.f32 1e-05, %v3340_v22  ;;  %v3367_v12 = vadd.f32 1e-05, %v3365_v53 }
 0x358   : > { %4755 = vrsqrt.f32 %v3342_v6  ;;  %vm3349_vm1 = vweird.f32 %v3342_v6  ;;  %vm3374_vm3 = vweird.f32 %v3367_v12 }
 0x359   : > { %4757 = vrsqrt.f32 %v3367_v12 }
 0x35e   : > { %v4756_v56 = vpop.eup %4755 }
 0x35f   : > { %v4758_v49 = vpop.eup %4757  ;;  %v3344_v31 = vmul.f32 %v4756_v56, %v3342_v6  ;;  %vm3350_vm2 = vweird.f32 %v4756_v56 }
 0x360   : > { %v3369_v16 = vmul.f32 %v4758_v49, %v3367_v12  ;;  %vm3375_vm4 = vweird.f32 %v4758_v49  ;;  %vm3351_vm5 = vmor %vm3349_vm1, %vm3350_vm2 }
 0x361   : > { %v3345_v63 = vmul.f32 %v4756_v56, %v3344_v31  ;;  %vm3376_vm6 = vmor %vm3374_vm3, %vm3375_vm4 }
 0x362   : > { %v3370_v0 = vmul.f32 %v4758_v49, %v3369_v16 }
 0x363   : > { %v3346_v2 = vmul.f32 0.5, %v3345_v63 }
 0x364   : > { %v3371_v26 = vmul.f32 0.5, %v3370_v0 }
 0x365   : > { %v3347_v59 = vsub.f32 1.5, %v3346_v2 }
 0x366   : > { %v3372_v42 = vsub.f32 1.5, %v3371_v26 }
 0x367   : > { %v3348_v41 = vmul.f32 %v4756_v56, %v3347_v59 }
 0x368   : > { %v3373_v60 = vmul.f32 %v4758_v49, %v3372_v42 }
 0x369   : > { %v3352_v10 = vsel %vm3351_vm5, %v4756_v56, %v3348_v41 }
 0x36a   : > { %v3353_v15 = vmul.f32 %v3352_v10, %v3341_v5  ;;  %v3377_v23 = vsel %vm3376_vm6, %v4758_v49, %v3373_v60 }
 0x36b   : > { %v3378_v33 = vmul.f32 %v3377_v23, %v3366_v4 }
 0x36c   : > { %3357 = vst [vmem:[#allocation3 + $0x4] sm:$0x1] %v3353_v15  ;;  %v3355_v25 = vmul.f32 %v3353_v15, %v3335_v34 }
 0x36d   : > { %3382 = vst [vmem:[#allocation3 + $0x2] sm:$0x1] %v3378_v33  ;;  %v3380_v18 = vmul.f32 %v3378_v33, %v3360_v32 }
 0x36e   : > { %v3356_v29 = vsub.f32 %v3354_v1, %v3355_v25 }
 0x36f   : > { %v3381_v35 = vsub.f32 %v3379_v27, %v3380_v18 }
 0x370   : > { %3358 = vst [vmem:[#allocation3 + $0x5] sm:$0x1] %v3356_v29 }
 0x371   : > { %3383 = vst [vmem:[#allocation3 + $0x3] sm:$0x1] %v3381_v35 }
 0x372 PF: > { %p4468_p12 = scmp.ne.s32.totalorder %s4845_s22, 2 }
 0x373   : > { %s4469_s10 = smul.u32 (!%p4468_p12), 80, %s4841_s21 }
 0x374   : > { %3386 = sbr.rel (%p4468_p12) target bundleno = 1051 (0x41b), region = 64 }
 0x375   : > { %s6241_s13 = scalar_lea.vmem (!%p4468_p12), [#allocation2], %s4469_s10 }
 0x379   : > { %v3468_v61 = vld [vmem:[%s6381_s3] sm:$0xf]  ;;  %vm3502_vm7 = vcmask 1043456   ;;  %v4496_v39 = vld [vmem:[%s4986_s26 + $0xd8] sm:$0xf]  ;;  %vm3489_vm8 = vcmask 64512  }
 0x37a   : > { %v3504_v47 = vsel %vm3502_vm7, %v3468_v61, 0  ;;  %v4636_v40 = vld [vmem:[%s4986_s26 + $0xdc] sm:$0xf0]  ;;  %v4500_v13 = vld [vmem:[%s4986_s26 + $0xe8] sm:$0xf] }
 0x37b   : > { %3513 = vmatpush.bf16.msra.mxu0 %v3504_v47  ;;  %4663 = vmatpush.bf16.msra.mxu1 %v3504_v47  ;;  %v4497_v46 = vor.u32 %v4636_v40, %v4496_v39  ;;  %v4637_v48 = vld [vmem:[%s4986_s26 + $0xec] sm:$0xf0]  ;;  %v4504_v37 = vld [vmem:[%s4986_s26 + $0xf8] sm:$0xf]  ;;  %v4638_v3 = vld [vmem:[%s4986_s26 + $0xfc] sm:$0xf0] }
 0x37c   : > { %4664 = vmatpush.bf16.msra.mxu2 %v3504_v47  ;;  %4665 = vmatpush.bf16.msra.mxu3 %v3504_v47  ;;  %v4501_v28 = vor.u32 %v4637_v48, %v4500_v13  ;;  %v4505_v44 = vor.u32 %v4638_v3, %v4504_v37  ;;  %v4508_v30 = vld [vmem:[%s4986_s26 + $0x108] sm:$0xf]  ;;  %v4639_v51 = vld [vmem:[%s4986_s26 + $0x10c] sm:$0xf0]  ;;  %v4471_v55 = vld [vmem:[%s6241_s13 + $0xc] sm:$0x1] }
 0x37d   : > { %v4509_v20 = vor.u32 %v4639_v51, %v4508_v30  ;;  %v4470_v54 = vld [vmem:[%s6241_s13 + $0x8] sm:$0xf]  ;;  %v3410_v17 = vunpack.c.l.bf16 %v4471_v55  ;;  %v6245_v50 = vld [vmem:[#allocation3 + $0x4] ss:$0 sm:$0xff]  ;;  %v4474_v57 = vld [vmem:[%s6241_s13 + $0x18] sm:$0xf] }
 0x37e   : > { %4510 = vmatmul.msk.bf16.vlgmr.msra.gmra.mxu0 %vm3489_vm8, %v4497_v46  ;;  %4511 = vmatmul.msk.bf16.vlgmr.msra.gmra.mxu1 %vm3489_vm8, %v4501_v28  ;;  %v3409_v9 = vunpack.c.l.bf16 %v4470_v54  ;;  %v4475_v38 = vld [vmem:[%s6241_s13 + $0x1c] sm:$0x1]  ;;  %v4478_v7 = vld [vmem:[%s6241_s13 + $0x28] sm:$0xf]  ;;  %v4479_v24 = vld [vmem:[%s6241_s13 + $0x2c] sm:$0x1]  ;;  %v3413_v14 = vunpack.c.l.bf16 %v4474_v57 }
 0x37f   : > { %4512 = vmatmul.msk.bf16.vlgmr.msra.gmra.mxu2 %vm3489_vm8, %v4505_v44  ;;  %4513 = vmatmul.msk.bf16.vlgmr.msra.gmra.mxu3 %vm3489_vm8, %v4509_v20  ;;  %v4482_v58 = vld [vmem:[%s6241_s13 + $0x38] sm:$0xf]  ;;  %v4483_v52 = vld [vmem:[%s6241_s13 + $0x3c] sm:$0x1]  ;;  %v3414_v34 = vunpack.c.l.bf16 %v4475_v38  ;;  %v3427_v62 = vmul.f32 %v6245_v50, %v3410_v17  ;;  %v6255_v32 = vld [vmem:[#allocation3 + $0x5] ss:$0 sm:$0xff]  ;;  %v3417_v8 = vunpack.c.l.bf16 %v4478_v7  ;;  %v3418_v21 = vunpack.c.l.bf16 %v4479_v24 }
 0x380   : > { %v3426_v36 = vmul.f32 %v6245_v50, %v3409_v9  ;;  %v6257_v43 = vld [vmem:[#allocation3 + $0x2] ss:$0 sm:$0xff]  ;;  %v3421_v11 = vunpack.c.l.bf16 %v4482_v58  ;;  %v3422_v45 = vunpack.c.l.bf16 %v4483_v52  ;;  %v6259_v19 = vld [vmem:[#allocation3 + $0x3] ss:$0 sm:$0xff]  ;;  %v4472_v22 = vld [vmem:[%s6241_s13 + $0x10] sm:$0xf]  ;;  %v3430_v53 = vmul.f32 %v6245_v50, %v3413_v14 }
 0x381   : > { %v3431_v6 = vmul.f32 %v6245_v50, %v3414_v34  ;;  %v4473_v12 = vld [vmem:[%s6241_s13 + $0x14] sm:$0x1]  ;;  %v4476_v56 = vld [vmem:[%s6241_s13 + $0x20] sm:$0xf]  ;;  %v4477_v49 = vld [vmem:[%s6241_s13 + $0x24] sm:$0x1]  ;;  %v3444_v16 = vadd.f32 %v6255_v32, %v3427_v62  ;;  %v3434_v2 = vmul.f32 %v6245_v50, %v3417_v8  ;;  %v3435_v26 = vmul.f32 %v6245_v50, %v3418_v21 }
 0x382   : > { %v3443_v31 = vadd.f32 %v6255_v32, %v3426_v36  ;;  %v3438_v5 = vmul.f32 %v6245_v50, %v3421_v11  ;;  %v3439_v41 = vmul.f32 %v6245_v50, %v3422_v45  ;;  %v3411_v4 = vunpack.c.l.bf16 %v4472_v22  ;;  %v4480_v47 = vld [vmem:[%s6241_s13 + $0x30] sm:$0xf]  ;;  %v4481_v40 = vld [vmem:[%s6241_s13 + $0x34] sm:$0x1]  ;;  %v4484_v7 = vld [vmem:[%s6241_s13 + $0x40] sm:$0xf] }
 0x383   : > { %v3412_v60 = vunpack.c.l.bf16 %v4473_v12  ;;  %v3415_v10 = vunpack.c.l.bf16 %v4476_v56  ;;  %v3416_v15 = vunpack.c.l.bf16 %v4477_v49  ;;  %v3447_v1 = vadd.f32 %v6255_v32, %v3430_v53  ;;  %v4485_v24 = vld [vmem:[%s6241_s13 + $0x44] sm:$0x1] }
 0x384   : > { %v3448_v33 = vadd.f32 %v6255_v32, %v3431_v6  ;;  %v3451_v27 = vadd.f32 %v6255_v32, %v3434_v2  ;;  %v3452_v18 = vadd.f32 %v6255_v32, %v3435_v26  ;;  %v3455_v61 = vadd.f32 %v6255_v32, %v3438_v5 }
 0x385   : > { %v3456_v39 = vadd.f32 %v6255_v32, %v3439_v41  ;;  %v3428_v13 = vmul.f32 %v6245_v50, %v3411_v4  ;;  %v3429_v46 = vmul.f32 %v6245_v50, %v3412_v60  ;;  %v3432_v48 = vmul.f32 %v6245_v50, %v3415_v10 }
 0x386   : > { %v3433_v37 = vmul.f32 %v6245_v50, %v3416_v15  ;;  %v3419_v57 = vunpack.c.l.bf16 %v4480_v47  ;;  %v3420_v38 = vunpack.c.l.bf16 %v4481_v40  ;;  %v3423_v22 = vunpack.c.l.bf16 %v4484_v7 }
 0x387   : > { %v3445_v11 = vadd.f32 %v6255_v32, %v3428_v13  ;;  %v3446_v45 = vadd.f32 %v6255_v32, %v3429_v46  ;;  %v3424_v53 = vunpack.c.l.bf16 %v4485_v24 }
 0x388   : > { %v3440_v60 = vmul.f32 %v6245_v50, %v3423_v22 }
 0x389   : > { %v3441_v10 = vmul.f32 %v6245_v50, %v3424_v53 }
 0x38a   : > { %v3457_v46 = vadd.f32 %v6255_v32, %v3440_v60 }
 0x3fb   : > { %v3515_v63 = vpop.f32.mrf.mxu0  ;;  %v3520_v0 = vpop.f32.mrf.mxu1 }
 0x3fc   : > { %v3537_v59 = vmul.f32 %v6257_v43, %v3515_v63  ;;  %v3539_v42 = vmul.f32 %v6257_v43, %v3520_v0  ;;  %v3436_v63 = vmul.f32 %v6245_v50, %v3419_v57  ;;  %v3437_v0 = vmul.f32 %v6245_v50, %v3420_v38 }
 0x3fe   : > { %v3547_v23 = vadd.f32 %v6259_v19, %v3537_v59  ;;  %v3549_v25 = vadd.f32 %v6259_v19, %v3539_v42  ;;  %v3454_v13 = vadd.f32 %v6255_v32, %v3437_v0 }
 0x400   : > { %v3563_v29 = vrot.slane %v3547_v23, 7  ;;  %v3565_v35 = vrot.slane %v3549_v25, 7 }
 0x402   : > { %v3579_v3 = vadd.f32 %v3563_v29, %v3443_v31  ;;  %v3580_v28 = vadd.f32 %v3563_v29, %v3444_v16  ;;  %v3583_v44 = vadd.f32 %v3565_v35, %v3447_v1  ;;  %v3584_v30 = vadd.f32 %v3565_v35, %v3448_v33  ;;  %v3525_v51 = vpop.f32.mrf.mxu2  ;;  %v3530_v20 = vpop.f32.mrf.mxu3 }
 0x403   : > { %v3541_v54 = vmul.f32 %v6257_v43, %v3525_v51  ;;  %v3543_v55 = vmul.f32 %v6257_v43, %v3530_v20  ;;  %v3517_v9 = vpop.f32.mrf.mxu0  ;;  %v3522_v17 = vpop.f32.mrf.mxu1  ;;  %v3449_v31 = vadd.f32 %v6255_v32, %v3432_v48  ;;  %v3450_v16 = vadd.f32 %v6255_v32, %v3433_v37 }
 0x404   : > { %v3595_v58 = vmax.f32 %v3579_v3, 0.0  ;;  %v3596_v52 = vmax.f32 %v3580_v28, 0.0  ;;  %v3599_v14 = vmax.f32 %v3583_v44, 0.0  ;;  %v3600_v34 = vmax.f32 %v3584_v30, 0.0 }
 0x405   : > { %v3551_v36 = vadd.f32 %v6259_v19, %v3541_v54  ;;  %v3553_v62 = vadd.f32 %v6259_v19, %v3543_v55  ;;  %v3538_v8 = vmul.f32 %v6257_v43, %v3517_v9  ;;  %v3540_v21 = vmul.f32 %v6257_v43, %v3522_v17 }
 0x406   : > { %3611 = vst [vmem:[%s4988_s29 - $0x1] sm:$0xfe] %v3595_v58  ;;  %v3458_v3 = vadd.f32 %v6255_v32, %v3441_v10 }
 0x407   : > { %3612 = vst [vmem:[%s4988_s29 + $0x7] sm:$0x1] %v3596_v52  ;;  %v3567_v6 = vrot.slane %v3551_v36, 7  ;;  %v3569_v12 = vrot.slane %v3553_v62, 7  ;;  %v3548_v56 = vadd.f32 %v6259_v19, %v3538_v8  ;;  %v3550_v49 = vadd.f32 %v6259_v19, %v3540_v21 }
 0x408   : > { %3615 = vst [vmem:[%s4988_s29 + $0xf] sm:$0xfe] %v3599_v14 }
 0x409   : > { %3616 = vst [vmem:[%s4988_s29 + $0x17] sm:$0x1] %v3600_v34  ;;  %v3587_v2 = vadd.f32 %v3567_v6, %v3451_v27  ;;  %v3588_v26 = vadd.f32 %v3567_v6, %v3452_v18  ;;  %v3591_v59 = vadd.f32 %v3569_v12, %v3455_v61  ;;  %v3592_v42 = vadd.f32 %v3569_v12, %v3456_v39 }
 0x40a   : > { %v3564_v5 = vrot.slane %v3548_v56, 7  ;;  %v3566_v41 = vrot.slane %v3550_v49, 7  ;;  %v3527_v4 = vpop.f32.mrf.mxu2  ;;  %v3532_v15 = vpop.f32.mrf.mxu3  ;;  %v3453_v61 = vadd.f32 %v6255_v32, %v3436_v63 }
 0x40b   : > { %v3603_v23 = vmax.f32 %v3587_v2, 0.0  ;;  %v3604_v1 = vmax.f32 %v3588_v26, 0.0  ;;  %v3607_v33 = vmax.f32 %v3591_v59, 0.0  ;;  %v3608_v25 = vmax.f32 %v3592_v42, 0.0 }
 0x40c   : > { %v3581_v29 = vadd.f32 %v3564_v5, %v3445_v11  ;;  %v3582_v27 = vadd.f32 %v3564_v5, %v3446_v45  ;;  %v3585_v18 = vadd.f32 %v3566_v41, %v3449_v31  ;;  %v3586_v35 = vadd.f32 %v3566_v41, %v3450_v16 }
 0x40d   : > { %3619 = vst [vmem:[%s4988_s29 + $0x1f] sm:$0xfe] %v3603_v23  ;;  %v3542_v39 = vmul.f32 %v6257_v43, %v3527_v4  ;;  %v3544_v47 = vmul.f32 %v6257_v43, %v3532_v15 }
 0x40e   : > { %3620 = vst [vmem:[%s4988_s29 + $0x27] sm:$0x1] %v3604_v1  ;;  %v3597_v50 = vmax.f32 %v3581_v29, 0.0  ;;  %v3598_v40 = vmax.f32 %v3582_v27, 0.0  ;;  %v3601_v48 = vmax.f32 %v3585_v18, 0.0  ;;  %v3602_v43 = vmax.f32 %v3586_v35, 0.0 }
 0x40f   : > { %3623 = vst [vmem:[%s4988_s29 + $0x2f] sm:$0xfe] %v3607_v33  ;;  %v3552_v37 = vadd.f32 %v6259_v19, %v3542_v39  ;;  %v3554_v28 = vadd.f32 %v6259_v19, %v3544_v47 }
 0x410   : > { %3624 = vst [vmem:[%s4988_s29 + $0x37] sm:$0x1] %v3608_v25 }
 0x411   : > { %3613 = vst [vmem:[%s4988_s29 + $0x7] sm:$0xfe] %v3597_v50  ;;  %v3568_v44 = vrot.slane %v3552_v37, 7  ;;  %v3570_v30 = vrot.slane %v3554_v28, 7 }
 0x412   : > { %3614 = vst [vmem:[%s4988_s29 + $0xf] sm:$0x1] %v3598_v40 }
 0x413   : > { %3617 = vst [vmem:[%s4988_s29 + $0x17] sm:$0xfe] %v3601_v48  ;;  %v3589_v51 = vadd.f32 %v3568_v44, %v3453_v61  ;;  %v3590_v20 = vadd.f32 %v3568_v44, %v3454_v13  ;;  %v3593_v54 = vadd.f32 %v3570_v30, %v3457_v46  ;;  %v3594_v55 = vadd.f32 %v3570_v30, %v3458_v3 }
 0x414   : > { %3618 = vst [vmem:[%s4988_s29 + $0x1f] sm:$0x1] %v3602_v43 }
 0x415   : > { %v3605_v9 = vmax.f32 %v3589_v51, 0.0  ;;  %v3606_v32 = vmax.f32 %v3590_v20, 0.0  ;;  %v3609_v17 = vmax.f32 %v3593_v54, 0.0  ;;  %v3610_v19 = vmax.f32 %v3594_v55, 0.0 }
 0x417   : > { %3621 = vst [vmem:[%s4988_s29 + $0x27] sm:$0xfe] %v3605_v9 }
 0x418   : > { %3622 = vst [vmem:[%s4988_s29 + $0x2f] sm:$0x1] %v3606_v32 }
 0x419   : > { %3625 = vst [vmem:[%s4988_s29 + $0x37] sm:$0xfe] %v3609_v17 }
 0x41a   : > { %3626 = vst [vmem:[%s4988_s29 + $0x3f] sm:$0x1] %v3610_v19 }
 0x41b PF: > { %s3642_s26 = sshll.u32 %s4988_s29, 4  ;;  %s6420_s21 = smov (!%p3329_p10, %s4841_s21), 0  ;;  %s3643_s26 = int_to_ptr.vmem [resolvable:$true] %s3642_s26 }
 0x41c   : > { %s4640_s12 = sshll.u32 %s6420_s21, 6  ;;  %s6403_s16 = sand.u32 1, %s4833_s19  }
 0x41d   : > { %s3641_s8 = scalar_lea.hbm %s6383_s5, %s4640_s12  ;;  %s3628_s17 = scalar_lea.sflag [#allocation5], %s6403_s16 }
 0x41e   : > { %s3644_s15 = sshll.u32 %s3641_s8, 4  ;;  %s4783_s10 = scalar_lea.hbm %s6383_s5, 128  ;;  %s3645_s15 = int_to_ptr.hbm [resolvable:$true] %s3644_s15 }
 0x41f   : > { %s4777_s30 = sshra.s32 %s3645_s15, 4  ;;  %s4778_s30 = int_to_ptr.hbm [resolvable:$true] %s4777_s30 }
 0x420   : > { %s4779_s9 = scalar_lea.hbm %s4778_s30, 64  ;;  %p4784_p2 = scmp.lt.s32.totalorder %s4778_s30, %s6383_s5 }
 0x421   : > { %p4780_p13 = scmp.ne.s32.totalorder %s4778_s30, %s4779_s9  ;;  %p4785_p3 = scmp.lt.s32.totalorder %s4783_s10, %s4779_s9 }
 0x423   : > { %p4781_p0 = pnand %p4780_p13, %p4956_p7  ;;  %p4786_p4 = por %p4785_p3, %p4784_p2 }
 0x425   : > { %p4782_p1 = pneg %p4781_p0 }
 0x427   : > { %p4787_p5 = pnand %p4786_p4, %p4782_p1 }
 0x429   : > { %4790 = shalt.err (!%p4787_p5)
}
 0x42a   : > { %s4869_s12 = smov 128   ;;  %s4870_s14 = smov 8  }
 0x42b   : > { %4667 = dma.vmem_to_hbm [thread:$0]  (%p4956_p7), %s3643_s26, 1024, %s3645_s15, %s3628_s17, %s4869_s12, %s4869_s12, %s4870_s14  }
 0x42c PF: > { %p4673_p6 = scmp.ge.s32.totalorder %s4857_s25, 2  ;;  %s3659_s0 = sand.u32 1, %s4829_s18  }
 0x42d   : > { %s3660_s8 = scalar_lea.sflag [#allocation5], %s3659_s0 }
 0x42e   : > { %p4670_p9 = pnand %p4673_p6, %p4960_p8 }
 0x430   : > { %p4671_p10 = pneg %p4670_p9 }
 0x432   : > { %4824 = dma.done.wait (%p4671_p10), %s3660_s8, 1024  }
 0x433   : > { %4826 = vsyncadd (%p4671_p10), %s3660_s8, 4294966272  ;;  %s18_s25 = sadd.s32 1, %s4857_s25   ;;  %s6404_s18 = smov %s4833_s19 }
 0x434   : > { %p15_p11 = scmp.ge.s32.totalorder %s18_s25, 8   ;;  %s6405_s19 = smov %s4837_s20 }
 0x435   : > { %s6406_s20 = smov %s4970_s11  ;;  %s6407_s21 = smov %s4849_s23 }
 0x436   : > { %s6408_s22 = smov %s4853_s24  ;;  %s6409_s23 = smov %s6412_s27 }
 0x437   : > { %s6410_s24 = smov %s6416_s28  ;;  %17 = sbr.rel (!%p15_p11) target bundleno = 7 (0x7), region = 110 }
 0x43c   :  { %3666 = vsyncpa [#allocation5], 1 }
 0x43d   :  { %3668 = vsyncpa [#allocation5 + $0x1], 1 }

</bundles_post_ra>
